<compile_context>
chip_gen: v7x
topology: tpu7x:2x2x1
jax: 0.10.0
libtpu: 0.0.40
codegen_flags: <defaults>
</compile_context>

<pallas_src>
import functools
import math

import jax
import jax.numpy as jnp
from jax.experimental import pallas as pl
from jax.experimental.pallas import tpu as pltpu
from jax.scipy.linalg import block_diag


# ----------------------------------------------------------------------------
# Single fused kernel: lane-packed dual pointnet + state MLP + image heads
# ----------------------------------------------------------------------------
def _encoder_kernel(pts_ref, w_in_ref, b_in_ref, w_l_ref, b_l_ref,
                    w_gl_ref, w_gg_ref, b_g_ref, w_out_ref, b_out_ref,
                    state_ref, w1_ref, b1_ref, w2_ref, b2_ref,
                    pmw_ref, w_enc_ref, b_enc_ref, w_ad_ref, b_ad_ref,
                    o_ref, acc_ref, *, batch, npts, num_layers):
    # nn.LeakyReLU(negative_slope=0.0) == ReLU
    relu = lambda t: jnp.maximum(t, 0.0)
    dot = lambda a, w: jnp.dot(a, w, preferred_element_type=jnp.float32)
    c2 = w_in_ref.shape[-1]        # 2*h   (pc | depth lane-packed hidden width)
    out2 = acc_ref.shape[-1]       # 2*out_channels
    out_c = out2 // 2

    # ---- dual MultiStagePointNet, both extractors packed along the lane dim ----
    pts = pts_ref[...]                                            # (B*N, kin_pad)
    y = relu(dot(pts, w_in_ref[...]) + b_in_ref[...])             # (B*N, 2h)

    for i in range(num_layers):
        y = relu(dot(y, w_l_ref[i]) + b_l_ref[i])                 # (B*N, 2h)
        # concat([y, broadcast(per-batch max(y))]) @ w_global
        #   == y @ w_gl  +  broadcast((max y) @ w_gg)              (exact identity)
        y_loc = dot(y, w_gl_ref[i])                               # (B*N, 2h)
        m = jnp.max(y.reshape(batch, npts, c2), axis=1)           # (B, 2h)
        g = dot(m, w_gg_ref[i])                                   # (B, 2h)
        y = relu((y_loc.reshape(batch, npts, c2) + g[:, None, :] + b_g_ref[i])
                 .reshape(batch * npts, c2))                      # (B*N, 2h)
        # Running accumulator (VMEM scratch) replaces the feats-list concat.
        contrib = dot(y, w_out_ref[i])                            # (B*N, 2*out_c)
        if i == 0:
            acc_ref[...] = contrib
        else:
            acc_ref[...] += contrib

    # Per-batch global max pool; b_out added after the max (row-constant bias).
    pn = jnp.max(acc_ref[...].reshape(batch, npts, out2), axis=1) + b_out_ref[...]
    # pn = [pn_feat | depth_feat]  (lane-packing order: pc first, depth second)

    # ---- heads: state MLP + image projections/adaptors (main|wrist packed) ----
    sh = relu(dot(state_ref[...], w1_ref[...]) + b1_ref[...])
    state_feat = dot(sh, w2_ref[...]) + b2_ref[...]               # (B, 64)
    enc = dot(pmw_ref[...], w_enc_ref[...]) + b_enc_ref[...]      # (B, 2*half) = [main|wrist]
    img = dot(enc, w_ad_ref[...]) + b_ad_ref[...]                 # (B, 2*out_c) = [main|wrist]

    # final_feat = cat([depth, img_main, pn, img_wrist, state], -1): slice stores
    o_ref[:, 0:out_c]             = pn[:, out_c:].astype(o_ref.dtype)   # depth_feat
    o_ref[:, out_c:2 * out_c]     = img[:, :out_c].astype(o_ref.dtype)  # image_feat_main
    o_ref[:, 2 * out_c:3 * out_c] = pn[:, :out_c].astype(o_ref.dtype)   # pn_feat
    o_ref[:, 3 * out_c:4 * out_c] = img[:, out_c:].astype(o_ref.dtype)  # image_feat_wrist
    o_ref[:, 4 * out_c:]          = state_feat.astype(o_ref.dtype)      # state_feat


def fused_encoder(pts2d, state, pmw, p, *, batch, npts):
    num_layers = p["w_layers"].shape[0]
    out2 = p["b_out"].shape[-1]
    state_out = p["state_mlp_w2"].shape[-1]
    n_out = 2 * out2 + state_out

    args = (pts2d, p["w_in"], p["b_in"], p["w_layers"], p["b_layers"],
            p["w_gl"], p["w_gg"], p["b_global"], p["w_out"], p["b_out"],
            state, p["state_mlp_w1"], p["state_mlp_b1"],
            p["state_mlp_w2"], p["state_mlp_b2"],
            pmw, p["img_enc_w"], p["img_enc_b"], p["adaptor_w"], p["adaptor_b"])
    vmem = pl.BlockSpec(memory_space=pltpu.MemorySpace.VMEM)
    kernel = functools.partial(_encoder_kernel, batch=batch, npts=npts,
                               num_layers=num_layers)
    # TODO(synk): on v7x a second grid axis over M (split B*N) would feed both
    # TensorCores; at ~100 MFLOP total the win is marginal, so grid=() is kept.
    return pl.pallas_call(
        kernel,
        out_shape=jax.ShapeDtypeStruct((batch, n_out), jnp.float32),
        in_specs=[vmem] * len(args),
        out_specs=vmem,
        scratch_shapes=[pltpu.VMEM((batch * npts, out2), jnp.float32)],
    )(*args)


# ----------------------------------------------------------------------------
# Parameter construction (PyTorch-style uniform init) + lane packing
# ----------------------------------------------------------------------------
def _init_linear(key, fan_in, fan_out):
    kw, kb = jax.random.split(key)
    bound = 1.0 / math.sqrt(fan_in)
    w = jax.random.uniform(kw, (fan_in, fan_out), jnp.float32, -bound, bound)
    b = jax.random.uniform(kb, (fan_out,), jnp.float32, -bound, bound)
    return w, b


def _init_pointnet_raw(key, h, out_c, num_layers):
    keys = jax.random.split(key, 2 + 2 * num_layers)
    w_in, b_in = _init_linear(keys[0], 3, h)
    wl, bl, wgl, wgg, bg = [], [], [], [], []
    for i in range(num_layers):
        w, b = _init_linear(keys[1 + 2 * i], h, h)
        wl.append(w); bl.append(b)
        wg, bgi = _init_linear(keys[2 + 2 * i], 2 * h, h)
        # split the global conv into [local | global] halves (concat elimination)
        wgl.append(wg[:h]); wgg.append(wg[h:]); bg.append(bgi)
    w_out, b_out = _init_linear(keys[-1], h * num_layers, out_c)
    return dict(w_in=w_in, b_in=b_in, wl=wl, bl=bl, wgl=wgl, wgg=wgg, bg=bg,
                w_out=w_out.reshape(num_layers, h, out_c), b_out=b_out)


def _pad_rows(w, mult=8):
    pad = (-w.shape[0]) % mult
    return jnp.pad(w, ((0, pad), (0, 0))) if pad else w


def _pack_pointnets(pc, dp, num_layers):
    """Pack pc/depth extractors along the lane dim: concat inputs/biases,
    block-diagonal hidden weights, so every GEMM is lane-dense (128 wide)."""
    cat1 = lambda a, b: jnp.concatenate([a, b], axis=-1)[None, :]
    return {
        "w_in": _pad_rows(jnp.concatenate([pc["w_in"], dp["w_in"]], axis=1)),
        "b_in": cat1(pc["b_in"], dp["b_in"]),
        "w_layers": jnp.stack([block_diag(pc["wl"][i], dp["wl"][i])
                               for i in range(num_layers)]),
        "b_layers": jnp.stack([cat1(pc["bl"][i], dp["bl"][i])
                               for i in range(num_layers)]),
        "w_gl": jnp.stack([block_diag(pc["wgl"][i], dp["wgl"][i])
                           for i in range(num_layers)]),
        "w_gg": jnp.stack([block_diag(pc["wgg"][i], dp["wgg"][i])
                           for i in range(num_layers)]),
        "b_global": jnp.stack([cat1(pc["bg"][i], dp["bg"][i])
                               for i in range(num_layers)]),
        "w_out": jnp.stack([block_diag(pc["w_out"][i], dp["w_out"][i])
                            for i in range(num_layers)]),
        "b_out": cat1(pc["b_out"], dp["b_out"]),
    }


def build_encoder_params(key, *, state_dim, h_dim, out_channels, num_layers,
                         img_pool_dim, img_half_dim, state_mlp_size=(64, 64)):
    ks = jax.random.split(key, 8)
    pc = _init_pointnet_raw(ks[0], h_dim, out_channels, num_layers)
    dp = _init_pointnet_raw(ks[1], h_dim, out_channels, num_layers)
    params = _pack_pointnets(pc, dp, num_layers)

    # state_mlp: create_mlp(state_dim, 64, [64]) -> Linear(state_dim,64), ReLU, Linear(64,64)
    w1, b1 = _init_linear(ks[2], state_dim, state_mlp_size[0])
    w2, b2 = _init_linear(ks[3], state_mlp_size[0], state_mlp_size[-1])
    params["state_mlp_w1"], params["state_mlp_b1"] = _pad_rows(w1), b1[None, :]
    params["state_mlp_w2"], params["state_mlp_b2"] = w2, b2[None, :]

    # TODO(synk): TimmImgEncoder is an external pretrained timm backbone; stand-in
    # here = global-average-pool (wrapper) + per-camera linear projection.
    # main/wrist pair fused block-diagonally (lane dim 2*img_half_dim = 128).
    wem, bem = _init_linear(ks[4], img_pool_dim, img_half_dim)
    wew, bew = _init_linear(ks[5], img_pool_dim, img_half_dim)
    params["img_enc_w"] = _pad_rows(block_diag(wem, wew))
    params["img_enc_b"] = jnp.concatenate([bem, bew])[None, :]

    # build_condition_adapter('linear', img_half_dim, out_channels), main/wrist fused
    wam, bam = _init_linear(ks[6], img_half_dim, out_channels)
    waw, baw = _init_linear(ks[7], img_half_dim, out_channels)
    params["adaptor_w"] = block_diag(wam, waw)
    params["adaptor_b"] = jnp.concatenate([bam, baw])[None, :]

    # Unpacked copies kept only for the pure-JAX correctness reference.
    params["_raw"] = dict(pc=pc, dp=dp, w1=w1, b1=b1, w2=w2, b2=b2,
                          wem=wem, bem=bem, wew=wew, bew=bew,
                          wam=wam, bam=bam, waw=waw, baw=baw)
    return params


# ----------------------------------------------------------------------------
# ArmiDP3Encoder forward (wrapper)
# ----------------------------------------------------------------------------
def armi_dp3_encoder_forward(observations, params, *, num_points):
    points = observations["point_cloud"]   # (B, N_raw, 3)
    depth = observations["depth"]          # (B, N_raw, 3)
    assert points.ndim == 3 and depth.ndim == 3

    # TODO(synk): original uniform_sampling_torch draws random indices; a
    # deterministic uniform stride is used so the output is reproducible.
    stride = points.shape[1] // num_points
    idx = jnp.arange(num_points) * stride
    points = points[:, idx, :]
    # NOTE: the reference also downsamples `depth`, but depth_extractor is fed
    # `points` (PyTorch quirk, reproduced here), so the sampled depth is dead code.

    B, N, _ = points.shape
    pts2d = points.reshape(B * N, 3)
    kin = params["w_in"].shape[0]
    pts2d = jnp.pad(pts2d, ((0, 0), (0, kin - pts2d.shape[1])))

    state = observations["agent_pos"]      # (B, state_dim)
    kst = params["state_mlp_w1"].shape[0]
    state = jnp.pad(state, ((0, 0), (0, kst - state.shape[1])))

    # Stand-in image encoder front-end: NCHW -> global average pool over H, W.
    pooled_main = jnp.mean(observations["image_main"], axis=(2, 3))    # (B, 3)
    pooled_wrist = jnp.mean(observations["image_wrist"], axis=(2, 3))  # (B, 3)
    pmw = jnp.concatenate([pooled_main, pooled_wrist], axis=1)         # (B, 6)
    kimg = params["img_enc_w"].shape[0]
    pmw = jnp.pad(pmw, ((0, 0), (0, kimg - pmw.shape[1])))

    return fused_encoder(pts2d, state, pmw, params, batch=B, npts=N)


# ----------------------------------------------------------------------------
# Pure-JAX reference (unpacked params, mirrors the PyTorch module structure)
# ----------------------------------------------------------------------------
def _pointnet_ref(pts, raw):
    relu = lambda t: jnp.maximum(t, 0.0)
    num_layers = len(raw["wl"])
    y = relu(pts @ raw["w_in"] + raw["b_in"])
    feats = []
    for i in range(num_layers):
        y = relu(y @ raw["wl"][i] + raw["bl"][i])
        g = jnp.max(y, axis=1, keepdims=True)
        yc = jnp.concatenate([y, jnp.broadcast_to(g, y.shape)], axis=-1)
        wg = jnp.concatenate([raw["wgl"][i], raw["wgg"][i]], axis=0)
        y = relu(yc @ wg + raw["bg"][i])
        feats.append(y)
    x = jnp.concatenate(feats, axis=-1)
    w_out = raw["w_out"].reshape(-1, raw["w_out"].shape[-1])
    x = x @ w_out + raw["b_out"]
    return jnp.max(x, axis=1)


def reference_forward(observations, params, *, num_points):
    raw = params["_raw"]
    relu = lambda t: jnp.maximum(t, 0.0)
    points = observations["point_cloud"]
    stride = points.shape[1] // num_points
    idx = jnp.arange(num_points) * stride
    points = points[:, idx, :]
    pn_feat = _pointnet_ref(points, raw["pc"])
    depth_feat = _pointnet_ref(points, raw["dp"])
    state = observations["agent_pos"]
    state_feat = relu(state @ raw["w1"] + raw["b1"]) @ raw["w2"] + raw["b2"]
    pooled_main = jnp.mean(observations["image_main"], axis=(2, 3))
    pooled_wrist = jnp.mean(observations["image_wrist"], axis=(2, 3))
    img_main = (pooled_main @ raw["wem"] + raw["bem"]) @ raw["wam"] + raw["bam"]
    img_wrist = (pooled_wrist @ raw["wew"] + raw["bew"]) @ raw["waw"] + raw["baw"]
    return jnp.concatenate([depth_feat, img_main, pn_feat, img_wrist, state_feat],
                           axis=-1)


# ----------------------------------------------------------------------------
# Main
# ----------------------------------------------------------------------------
if __name__ == "__main__":
    key = jax.random.PRNGKey(0)
    k_obs, k_par = jax.random.split(key)

    # Small, module-consistent shapes.
    B = 2
    N_RAW = 256
    NUM_POINTS = 128          # pointcloud_encoder_cfg.num_points
    STATE_DIM = 8
    H, W = 16, 16
    H_DIM = 64                # MultiStagePointNet hidden dim
    OUT_CHANNELS = 64         # pointcloud_encoder_cfg.out_channels
    NUM_LAYERS = 4
    IMG_HALF_DIM = 64         # image_encoder.output_shape()[1] // 2

    ko = jax.random.split(k_obs, 5)
    observations = {
        "point_cloud": jax.random.normal(ko[0], (B, N_RAW, 3), jnp.float32),
        "depth": jax.random.normal(ko[1], (B, N_RAW, 3), jnp.float32),
        "agent_pos": jax.random.normal(ko[2], (B, STATE_DIM), jnp.float32),
        "image_main": jax.random.normal(ko[3], (B, 3, H, W), jnp.float32),   # NCHW
        "image_wrist": jax.random.normal(ko[4], (B, 3, H, W), jnp.float32),  # NCHW
    }

    params = build_encoder_params(
        k_par, state_dim=STATE_DIM, h_dim=H_DIM, out_channels=OUT_CHANNELS,
        num_layers=NUM_LAYERS, img_pool_dim=3, img_half_dim=IMG_HALF_DIM)

    out = armi_dp3_encoder_forward(observations, params, num_points=NUM_POINTS)
    out = jax.block_until_ready(out)

    # n_output_channels = out_channels*2 (pointnets) + 64 (state mlp) + out_channels*2 (img adaptors)
    expected_dim = OUT_CHANNELS * 2 + 64 + OUT_CHANNELS * 2
    assert out.shape == (B, expected_dim), out.shape
    assert out.dtype == jnp.float32

    ref = reference_forward(observations, params, num_points=NUM_POINTS)
    err = float(jnp.max(jnp.abs(out - ref)))
    assert err < 5e-2, f"max |kernel - reference| = {err}"

    print("KERNEL_OK")
</pallas_src>

<mosaic_0001>
module attributes {stable_mosaic.version = 11 : i64} {
  func.func @_encoder_kernel(%arg0: memref<256x8xf32, #tpu.memory_space<vmem>>, %arg1: memref<8x128xf32, #tpu.memory_space<vmem>>, %arg2: memref<1x128xf32, #tpu.memory_space<vmem>>, %arg3: memref<4x128x128xf32, #tpu.memory_space<vmem>>, %arg4: memref<4x1x128xf32, #tpu.memory_space<vmem>>, %arg5: memref<4x128x128xf32, #tpu.memory_space<vmem>>, %arg6: memref<4x128x128xf32, #tpu.memory_space<vmem>>, %arg7: memref<4x1x128xf32, #tpu.memory_space<vmem>>, %arg8: memref<4x128x128xf32, #tpu.memory_space<vmem>>, %arg9: memref<1x128xf32, #tpu.memory_space<vmem>>, %arg10: memref<2x8xf32, #tpu.memory_space<vmem>>, %arg11: memref<8x64xf32, #tpu.memory_space<vmem>>, %arg12: memref<1x64xf32, #tpu.memory_space<vmem>>, %arg13: memref<64x64xf32, #tpu.memory_space<vmem>>, %arg14: memref<1x64xf32, #tpu.memory_space<vmem>>, %arg15: memref<2x8xf32, #tpu.memory_space<vmem>>, %arg16: memref<8x128xf32, #tpu.memory_space<vmem>>, %arg17: memref<1x128xf32, #tpu.memory_space<vmem>>, %arg18: memref<128x128xf32, #tpu.memory_space<vmem>>, %arg19: memref<1x128xf32, #tpu.memory_space<vmem>>, %arg20: memref<2x320xf32, #tpu.memory_space<vmem>>, %arg21: memref<256x128xf32, #tpu.memory_space<vmem>>) attributes {dimension_semantics = [], scalar_prefetch = 0 : i64, scratch_operands = 1 : i64, tpu.core_type = #tpu.core_type<tc>} {
    %c0 = arith.constant 0 : index
    %c0_0 = arith.constant 0 : index
    %0 = vector.load %arg0[%c0, %c0_0] : memref<256x8xf32, #tpu.memory_space<vmem>>, vector<256x8xf32>
    %c0_1 = arith.constant 0 : index
    %c0_2 = arith.constant 0 : index
    %1 = vector.load %arg1[%c0_1, %c0_2] : memref<8x128xf32, #tpu.memory_space<vmem>>, vector<8x128xf32>
    %cst = arith.constant dense<0.000000e+00> : vector<256x128xf32>
    %2 = tpu.matmul %0, %1, %cst {dimension_numbers = #tpu.dot_dimension_numbers<[1], [0], [0], [1], [0, 0, 1, 1], [], []>} : vector<256x8xf32>, vector<8x128xf32>, vector<256x128xf32> -> vector<256x128xf32>
    %c0_3 = arith.constant 0 : index
    %c0_4 = arith.constant 0 : index
    %3 = vector.load %arg2[%c0_3, %c0_4] : memref<1x128xf32, #tpu.memory_space<vmem>>, vector<1x128xf32>
    %4 = vector.broadcast %3 : vector<1x128xf32> to vector<256x128xf32>
    %5 = arith.addf %2, %4 : vector<256x128xf32>
    %cst_5 = arith.constant 0.000000e+00 : f32
    %6 = vector.broadcast %cst_5 : f32 to vector<256x128xf32>
    %7 = arith.maximumf %5, %6 : vector<256x128xf32>
    %c0_6 = arith.constant 0 : index
    %c0_7 = arith.constant 0 : index
    %c0_8 = arith.constant 0 : index
    %8 = vector.load %arg3[%c0_6, %c0_7, %c0_8] : memref<4x128x128xf32, #tpu.memory_space<vmem>>, vector<1x128x128xf32>
    %9 = vector.shape_cast %8 : vector<1x128x128xf32> to vector<128x128xf32>
    %cst_9 = arith.constant dense<0.000000e+00> : vector<256x128xf32>
    %10 = tpu.matmul %7, %9, %cst_9 {dimension_numbers = #tpu.dot_dimension_numbers<[1], [0], [0], [1], [0, 0, 1, 1], [], []>} : vector<256x128xf32>, vector<128x128xf32>, vector<256x128xf32> -> vector<256x128xf32>
    %c0_10 = arith.constant 0 : index
    %c0_11 = arith.constant 0 : index
    %c0_12 = arith.constant 0 : index
    %11 = vector.load %arg4[%c0_10, %c0_11, %c0_12] : memref<4x1x128xf32, #tpu.memory_space<vmem>>, vector<1x1x128xf32>
    %12 = vector.shape_cast %11 : vector<1x1x128xf32> to vector<1x128xf32>
    %13 = vector.broadcast %12 : vector<1x128xf32> to vector<256x128xf32>
    %14 = arith.addf %10, %13 : vector<256x128xf32>
    %cst_13 = arith.constant 0.000000e+00 : f32
    %15 = vector.broadcast %cst_13 : f32 to vector<256x128xf32>
    %16 = arith.maximumf %14, %15 : vector<256x128xf32>
    %c0_14 = arith.constant 0 : index
    %c0_15 = arith.constant 0 : index
    %c0_16 = arith.constant 0 : index
    %17 = vector.load %arg5[%c0_14, %c0_15, %c0_16] : memref<4x128x128xf32, #tpu.memory_space<vmem>>, vector<1x128x128xf32>
    %18 = vector.shape_cast %17 : vector<1x128x128xf32> to vector<128x128xf32>
    %cst_17 = arith.constant dense<0.000000e+00> : vector<256x128xf32>
    %19 = tpu.matmul %16, %18, %cst_17 {dimension_numbers = #tpu.dot_dimension_numbers<[1], [0], [0], [1], [0, 0, 1, 1], [], []>} : vector<256x128xf32>, vector<128x128xf32>, vector<256x128xf32> -> vector<256x128xf32>
    %20 = vector.shape_cast %16 : vector<256x128xf32> to vector<2x128x128xf32>
    %cst_18 = arith.constant dense<0xFF800000> : vector<2x128xf32>
    %21 = vector.multi_reduction <maximumf>, %20, %cst_18 [1] : vector<2x128x128xf32> to vector<2x128xf32>
    %c0_19 = arith.constant 0 : index
    %c0_20 = arith.constant 0 : index
    %c0_21 = arith.constant 0 : index
    %22 = vector.load %arg6[%c0_19, %c0_20, %c0_21] : memref<4x128x128xf32, #tpu.memory_space<vmem>>, vector<1x128x128xf32>
    %23 = vector.shape_cast %22 : vector<1x128x128xf32> to vector<128x128xf32>
    %cst_22 = arith.constant dense<0.000000e+00> : vector<2x128xf32>
    %24 = tpu.matmul %21, %23, %cst_22 {dimension_numbers = #tpu.dot_dimension_numbers<[1], [0], [0], [1], [0, 0, 1, 1], [], []>} : vector<2x128xf32>, vector<128x128xf32>, vector<2x128xf32> -> vector<2x128xf32>
    %25 = vector.shape_cast %19 : vector<256x128xf32> to vector<2x128x128xf32>
    %26 = vector.shape_cast %24 : vector<2x128xf32> to vector<2x1x128xf32>
    %27 = vector.broadcast %26 : vector<2x1x128xf32> to vector<2x128x128xf32>
    %28 = arith.addf %25, %27 : vector<2x128x128xf32>
    %c0_23 = arith.constant 0 : index
    %c0_24 = arith.constant 0 : index
    %c0_25 = arith.constant 0 : index
    %29 = vector.load %arg7[%c0_23, %c0_24, %c0_25] : memref<4x1x128xf32, #tpu.memory_space<vmem>>, vector<1x1x128xf32>
    %30 = vector.shape_cast %29 : vector<1x1x128xf32> to vector<1x128xf32>
    %31 = vector.shape_cast %30 : vector<1x128xf32> to vector<1x1x128xf32>
    %32 = vector.broadcast %31 : vector<1x1x128xf32> to vector<2x128x128xf32>
    %33 = arith.addf %28, %32 : vector<2x128x128xf32>
    %34 = vector.shape_cast %33 : vector<2x128x128xf32> to vector<256x128xf32>
    %cst_26 = arith.constant 0.000000e+00 : f32
    %35 = vector.broadcast %cst_26 : f32 to vector<256x128xf32>
    %36 = arith.maximumf %34, %35 : vector<256x128xf32>
    %c0_27 = arith.constant 0 : index
    %c0_28 = arith.constant 0 : index
    %c0_29 = arith.constant 0 : index
    %37 = vector.load %arg8[%c0_27, %c0_28, %c0_29] : memref<4x128x128xf32, #tpu.memory_space<vmem>>, vector<1x128x128xf32>
    %38 = vector.shape_cast %37 : vector<1x128x128xf32> to vector<128x128xf32>
    %cst_30 = arith.constant dense<0.000000e+00> : vector<256x128xf32>
    %39 = tpu.matmul %36, %38, %cst_30 {dimension_numbers = #tpu.dot_dimension_numbers<[1], [0], [0], [1], [0, 0, 1, 1], [], []>} : vector<256x128xf32>, vector<128x128xf32>, vector<256x128xf32> -> vector<256x128xf32>
    %c0_31 = arith.constant 0 : index
    %c0_32 = arith.constant 0 : index
    %40 = vector.load %arg21[%c0_31, %c0_32] : memref<256x128xf32, #tpu.memory_space<vmem>>, vector<256x128xf32>
    tpu.vector_store %arg21[%c0_31, %c0_32], %39 {strides = array<i32>} : memref<256x128xf32, #tpu.memory_space<vmem>>, vector<256x128xf32>,
    %c1 = arith.constant 1 : index
    %c0_33 = arith.constant 0 : index
    %c0_34 = arith.constant 0 : index
    %41 = vector.load %arg3[%c1, %c0_33, %c0_34] : memref<4x128x128xf32, #tpu.memory_space<vmem>>, vector<1x128x128xf32>
    %42 = vector.shape_cast %41 : vector<1x128x128xf32> to vector<128x128xf32>
    %cst_35 = arith.constant dense<0.000000e+00> : vector<256x128xf32>
    %43 = tpu.matmul %36, %42, %cst_35 {dimension_numbers = #tpu.dot_dimension_numbers<[1], [0], [0], [1], [0, 0, 1, 1], [], []>} : vector<256x128xf32>, vector<128x128xf32>, vector<256x128xf32> -> vector<256x128xf32>
    %c1_36 = arith.constant 1 : index
    %c0_37 = arith.constant 0 : index
    %c0_38 = arith.constant 0 : index
    %44 = vector.load %arg4[%c1_36, %c0_37, %c0_38] : memref<4x1x128xf32, #tpu.memory_space<vmem>>, vector<1x1x128xf32>
    %45 = vector.shape_cast %44 : vector<1x1x128xf32> to vector<1x128xf32>
    %46 = vector.broadcast %45 : vector<1x128xf32> to vector<256x128xf32>
    %47 = arith.addf %43, %46 : vector<256x128xf32>
    %cst_39 = arith.constant 0.000000e+00 : f32
    %48 = vector.broadcast %cst_39 : f32 to vector<256x128xf32>
    %49 = arith.maximumf %47, %48 : vector<256x128xf32>
    %c1_40 = arith.constant 1 : index
    %c0_41 = arith.constant 0 : index
    %c0_42 = arith.constant 0 : index
    %50 = vector.load %arg5[%c1_40, %c0_41, %c0_42] : memref<4x128x128xf32, #tpu.memory_space<vmem>>, vector<1x128x128xf32>
    %51 = vector.shape_cast %50 : vector<1x128x128xf32> to vector<128x128xf32>
    %cst_43 = arith.constant dense<0.000000e+00> : vector<256x128xf32>
    %52 = tpu.matmul %49, %51, %cst_43 {dimension_numbers = #tpu.dot_dimension_numbers<[1], [0], [0], [1], [0, 0, 1, 1], [], []>} : vector<256x128xf32>, vector<128x128xf32>, vector<256x128xf32> -> vector<256x128xf32>
    %53 = vector.shape_cast %49 : vector<256x128xf32> to vector<2x128x128xf32>
    %cst_44 = arith.constant dense<0xFF800000> : vector<2x128xf32>
    %54 = vector.multi_reduction <maximumf>, %53, %cst_44 [1] : vector<2x128x128xf32> to vector<2x128xf32>
    %c1_45 = arith.constant 1 : index
    %c0_46 = arith.constant 0 : index
    %c0_47 = arith.constant 0 : index
    %55 = vector.load %arg6[%c1_45, %c0_46, %c0_47] : memref<4x128x128xf32, #tpu.memory_space<vmem>>, vector<1x128x128xf32>
    %56 = vector.shape_cast %55 : vector<1x128x128xf32> to vector<128x128xf32>
    %cst_48 = arith.constant dense<0.000000e+00> : vector<2x128xf32>
    %57 = tpu.matmul %54, %56, %cst_48 {dimension_numbers = #tpu.dot_dimension_numbers<[1], [0], [0], [1], [0, 0, 1, 1], [], []>} : vector<2x128xf32>, vector<128x128xf32>, vector<2x128xf32> -> vector<2x128xf32>
    %58 = vector.shape_cast %52 : vector<256x128xf32> to vector<2x128x128xf32>
    %59 = vector.shape_cast %57 : vector<2x128xf32> to vector<2x1x128xf32>
    %60 = vector.broadcast %59 : vector<2x1x128xf32> to vector<2x128x128xf32>
    %61 = arith.addf %58, %60 : vector<2x128x128xf32>
    %c1_49 = arith.constant 1 : index
    %c0_50 = arith.constant 0 : index
    %c0_51 = arith.constant 0 : index
    %62 = vector.load %arg7[%c1_49, %c0_50, %c0_51] : memref<4x1x128xf32, #tpu.memory_space<vmem>>, vector<1x1x128xf32>
    %63 = vector.shape_cast %62 : vector<1x1x128xf32> to vector<1x128xf32>
    %64 = vector.shape_cast %63 : vector<1x128xf32> to vector<1x1x128xf32>
    %65 = vector.broadcast %64 : vector<1x1x128xf32> to vector<2x128x128xf32>
    %66 = arith.addf %61, %65 : vector<2x128x128xf32>
    %67 = vector.shape_cast %66 : vector<2x128x128xf32> to vector<256x128xf32>
    %cst_52 = arith.constant 0.000000e+00 : f32
    %68 = vector.broadcast %cst_52 : f32 to vector<256x128xf32>
    %69 = arith.maximumf %67, %68 : vector<256x128xf32>
    %c1_53 = arith.constant 1 : index
    %c0_54 = arith.constant 0 : index
    %c0_55 = arith.constant 0 : index
    %70 = vector.load %arg8[%c1_53, %c0_54, %c0_55] : memref<4x128x128xf32, #tpu.memory_space<vmem>>, vector<1x128x128xf32>
    %71 = vector.shape_cast %70 : vector<1x128x128xf32> to vector<128x128xf32>
    %cst_56 = arith.constant dense<0.000000e+00> : vector<256x128xf32>
    %72 = tpu.matmul %69, %71, %cst_56 {dimension_numbers = #tpu.dot_dimension_numbers<[1], [0], [0], [1], [0, 0, 1, 1], [], []>} : vector<256x128xf32>, vector<128x128xf32>, vector<256x128xf32> -> vector<256x128xf32>
    %c0_57 = arith.constant 0 : index
    %c0_58 = arith.constant 0 : index
    %73 = vector.load %arg21[%c0_57, %c0_58] : memref<256x128xf32, #tpu.memory_space<vmem>>, vector<256x128xf32>
    %74 = arith.addf %73, %72 : vector<256x128xf32>
    %c0_59 = arith.constant 0 : index
    %c0_60 = arith.constant 0 : index
    %75 = vector.load %arg21[%c0_59, %c0_60] : memref<256x128xf32, #tpu.memory_space<vmem>>, vector<256x128xf32>
    tpu.vector_store %arg21[%c0_59, %c0_60], %74 {strides = array<i32>} : memref<256x128xf32, #tpu.memory_space<vmem>>, vector<256x128xf32>,
    %c2 = arith.constant 2 : index
    %c0_61 = arith.constant 0 : index
    %c0_62 = arith.constant 0 : index
    %76 = vector.load %arg3[%c2, %c0_61, %c0_62] : memref<4x128x128xf32, #tpu.memory_space<vmem>>, vector<1x128x128xf32>
    %77 = vector.shape_cast %76 : vector<1x128x128xf32> to vector<128x128xf32>
    %cst_63 = arith.constant dense<0.000000e+00> : vector<256x128xf32>
    %78 = tpu.matmul %69, %77, %cst_63 {dimension_numbers = #tpu.dot_dimension_numbers<[1], [0], [0], [1], [0, 0, 1, 1], [], []>} : vector<256x128xf32>, vector<128x128xf32>, vector<256x128xf32> -> vector<256x128xf32>
    %c2_64 = arith.constant 2 : index
    %c0_65 = arith.constant 0 : index
    %c0_66 = arith.constant 0 : index
    %79 = vector.load %arg4[%c2_64, %c0_65, %c0_66] : memref<4x1x128xf32, #tpu.memory_space<vmem>>, vector<1x1x128xf32>
    %80 = vector.shape_cast %79 : vector<1x1x128xf32> to vector<1x128xf32>
    %81 = vector.broadcast %80 : vector<1x128xf32> to vector<256x128xf32>
    %82 = arith.addf %78, %81 : vector<256x128xf32>
    %cst_67 = arith.constant 0.000000e+00 : f32
    %83 = vector.broadcast %cst_67 : f32 to vector<256x128xf32>
    %84 = arith.maximumf %82, %83 : vector<256x128xf32>
    %c2_68 = arith.constant 2 : index
    %c0_69 = arith.constant 0 : index
    %c0_70 = arith.constant 0 : index
    %85 = vector.load %arg5[%c2_68, %c0_69, %c0_70] : memref<4x128x128xf32, #tpu.memory_space<vmem>>, vector<1x128x128xf32>
    %86 = vector.shape_cast %85 : vector<1x128x128xf32> to vector<128x128xf32>
    %cst_71 = arith.constant dense<0.000000e+00> : vector<256x128xf32>
    %87 = tpu.matmul %84, %86, %cst_71 {dimension_numbers = #tpu.dot_dimension_numbers<[1], [0], [0], [1], [0, 0, 1, 1], [], []>} : vector<256x128xf32>, vector<128x128xf32>, vector<256x128xf32> -> vector<256x128xf32>
    %88 = vector.shape_cast %84 : vector<256x128xf32> to vector<2x128x128xf32>
    %cst_72 = arith.constant dense<0xFF800000> : vector<2x128xf32>
    %89 = vector.multi_reduction <maximumf>, %88, %cst_72 [1] : vector<2x128x128xf32> to vector<2x128xf32>
    %c2_73 = arith.constant 2 : index
    %c0_74 = arith.constant 0 : index
    %c0_75 = arith.constant 0 : index
    %90 = vector.load %arg6[%c2_73, %c0_74, %c0_75] : memref<4x128x128xf32, #tpu.memory_space<vmem>>, vector<1x128x128xf32>
    %91 = vector.shape_cast %90 : vector<1x128x128xf32> to vector<128x128xf32>
    %cst_76 = arith.constant dense<0.000000e+00> : vector<2x128xf32>
    %92 = tpu.matmul %89, %91, %cst_76 {dimension_numbers = #tpu.dot_dimension_numbers<[1], [0], [0], [1], [0, 0, 1, 1], [], []>} : vector<2x128xf32>, vector<128x128xf32>, vector<2x128xf32> -> vector<2x128xf32>
    %93 = vector.shape_cast %87 : vector<256x128xf32> to vector<2x128x128xf32>
    %94 = vector.shape_cast %92 : vector<2x128xf32> to vector<2x1x128xf32>
    %95 = vector.broadcast %94 : vector<2x1x128xf32> to vector<2x128x128xf32>
    %96 = arith.addf %93, %95 : vector<2x128x128xf32>
    %c2_77 = arith.constant 2 : index
    %c0_78 = arith.constant 0 : index
    %c0_79 = arith.constant 0 : index
    %97 = vector.load %arg7[%c2_77, %c0_78, %c0_79] : memref<4x1x128xf32, #tpu.memory_space<vmem>>, vector<1x1x128xf32>
    %98 = vector.shape_cast %97 : vector<1x1x128xf32> to vector<1x128xf32>
    %99 = vector.shape_cast %98 : vector<1x128xf32> to vector<1x1x128xf32>
    %100 = vector.broadcast %99 : vector<1x1x128xf32> to vector<2x128x128xf32>
    %101 = arith.addf %96, %100 : vector<2x128x128xf32>
    %102 = vector.shape_cast %101 : vector<2x128x128xf32> to vector<256x128xf32>
    %cst_80 = arith.constant 0.000000e+00 : f32
    %103 = vector.broadcast %cst_80 : f32 to vector<256x128xf32>
    %104 = arith.maximumf %102, %103 : vector<256x128xf32>
    %c2_81 = arith.constant 2 : index
    %c0_82 = arith.constant 0 : index
    %c0_83 = arith.constant 0 : index
    %105 = vector.load %arg8[%c2_81, %c0_82, %c0_83] : memref<4x128x128xf32, #tpu.memory_space<vmem>>, vector<1x128x128xf32>
    %106 = vector.shape_cast %105 : vector<1x128x128xf32> to vector<128x128xf32>
    %cst_84 = arith.constant dense<0.000000e+00> : vector<256x128xf32>
    %107 = tpu.matmul %104, %106, %cst_84 {dimension_numbers = #tpu.dot_dimension_numbers<[1], [0], [0], [1], [0, 0, 1, 1], [], []>} : vector<256x128xf32>, vector<128x128xf32>, vector<256x128xf32> -> vector<256x128xf32>
    %c0_85 = arith.constant 0 : index
    %c0_86 = arith.constant 0 : index
    %108 = vector.load %arg21[%c0_85, %c0_86] : memref<256x128xf32, #tpu.memory_space<vmem>>, vector<256x128xf32>
    %109 = arith.addf %108, %107 : vector<256x128xf32>
    %c0_87 = arith.constant 0 : index
    %c0_88 = arith.constant 0 : index
    %110 = vector.load %arg21[%c0_87, %c0_88] : memref<256x128xf32, #tpu.memory_space<vmem>>, vector<256x128xf32>
    tpu.vector_store %arg21[%c0_87, %c0_88], %109 {strides = array<i32>} : memref<256x128xf32, #tpu.memory_space<vmem>>, vector<256x128xf32>,
    %c3 = arith.constant 3 : index
    %c0_89 = arith.constant 0 : index
    %c0_90 = arith.constant 0 : index
    %111 = vector.load %arg3[%c3, %c0_89, %c0_90] : memref<4x128x128xf32, #tpu.memory_space<vmem>>, vector<1x128x128xf32>
    %112 = vector.shape_cast %111 : vector<1x128x128xf32> to vector<128x128xf32>
    %cst_91 = arith.constant dense<0.000000e+00> : vector<256x128xf32>
    %113 = tpu.matmul %104, %112, %cst_91 {dimension_numbers = #tpu.dot_dimension_numbers<[1], [0], [0], [1], [0, 0, 1, 1], [], []>} : vector<256x128xf32>, vector<128x128xf32>, vector<256x128xf32> -> vector<256x128xf32>
    %c3_92 = arith.constant 3 : index
    %c0_93 = arith.constant 0 : index
    %c0_94 = arith.constant 0 : index
    %114 = vector.load %arg4[%c3_92, %c0_93, %c0_94] : memref<4x1x128xf32, #tpu.memory_space<vmem>>, vector<1x1x128xf32>
    %115 = vector.shape_cast %114 : vector<1x1x128xf32> to vector<1x128xf32>
    %116 = vector.broadcast %115 : vector<1x128xf32> to vector<256x128xf32>
    %117 = arith.addf %113, %116 : vector<256x128xf32>
    %cst_95 = arith.constant 0.000000e+00 : f32
    %118 = vector.broadcast %cst_95 : f32 to vector<256x128xf32>
    %119 = arith.maximumf %117, %118 : vector<256x128xf32>
    %c3_96 = arith.constant 3 : index
    %c0_97 = arith.constant 0 : index
    %c0_98 = arith.constant 0 : index
    %120 = vector.load %arg5[%c3_96, %c0_97, %c0_98] : memref<4x128x128xf32, #tpu.memory_space<vmem>>, vector<1x128x128xf32>
    %121 = vector.shape_cast %120 : vector<1x128x128xf32> to vector<128x128xf32>
    %cst_99 = arith.constant dense<0.000000e+00> : vector<256x128xf32>
    %122 = tpu.matmul %119, %121, %cst_99 {dimension_numbers = #tpu.dot_dimension_numbers<[1], [0], [0], [1], [0, 0, 1, 1], [], []>} : vector<256x128xf32>, vector<128x128xf32>, vector<256x128xf32> -> vector<256x128xf32>
    %123 = vector.shape_cast %119 : vector<256x128xf32> to vector<2x128x128xf32>
    %cst_100 = arith.constant dense<0xFF800000> : vector<2x128xf32>
    %124 = vector.multi_reduction <maximumf>, %123, %cst_100 [1] : vector<2x128x128xf32> to vector<2x128xf32>
    %c3_101 = arith.constant 3 : index
    %c0_102 = arith.constant 0 : index
    %c0_103 = arith.constant 0 : index
    %125 = vector.load %arg6[%c3_101, %c0_102, %c0_103] : memref<4x128x128xf32, #tpu.memory_space<vmem>>, vector<1x128x128xf32>
    %126 = vector.shape_cast %125 : vector<1x128x128xf32> to vector<128x128xf32>
    %cst_104 = arith.constant dense<0.000000e+00> : vector<2x128xf32>
    %127 = tpu.matmul %124, %126, %cst_104 {dimension_numbers = #tpu.dot_dimension_numbers<[1], [0], [0], [1], [0, 0, 1, 1], [], []>} : vector<2x128xf32>, vector<128x128xf32>, vector<2x128xf32> -> vector<2x128xf32>
    %128 = vector.shape_cast %122 : vector<256x128xf32> to vector<2x128x128xf32>
    %129 = vector.shape_cast %127 : vector<2x128xf32> to vector<2x1x128xf32>
    %130 = vector.broadcast %129 : vector<2x1x128xf32> to vector<2x128x128xf32>
    %131 = arith.addf %128, %130 : vector<2x128x128xf32>
    %c3_105 = arith.constant 3 : index
    %c0_106 = arith.constant 0 : index
    %c0_107 = arith.constant 0 : index
    %132 = vector.load %arg7[%c3_105, %c0_106, %c0_107] : memref<4x1x128xf32, #tpu.memory_space<vmem>>, vector<1x1x128xf32>
    %133 = vector.shape_cast %132 : vector<1x1x128xf32> to vector<1x128xf32>
    %134 = vector.shape_cast %133 : vector<1x128xf32> to vector<1x1x128xf32>
    %135 = vector.broadcast %134 : vector<1x1x128xf32> to vector<2x128x128xf32>
    %136 = arith.addf %131, %135 : vector<2x128x128xf32>
    %137 = vector.shape_cast %136 : vector<2x128x128xf32> to vector<256x128xf32>
    %cst_108 = arith.constant 0.000000e+00 : f32
    %138 = vector.broadcast %cst_108 : f32 to vector<256x128xf32>
    %139 = arith.maximumf %137, %138 : vector<256x128xf32>
    %c3_109 = arith.constant 3 : index
    %c0_110 = arith.constant 0 : index
    %c0_111 = arith.constant 0 : index
    %140 = vector.load %arg8[%c3_109, %c0_110, %c0_111] : memref<4x128x128xf32, #tpu.memory_space<vmem>>, vector<1x128x128xf32>
    %141 = vector.shape_cast %140 : vector<1x128x128xf32> to vector<128x128xf32>
    %cst_112 = arith.constant dense<0.000000e+00> : vector<256x128xf32>
    %142 = tpu.matmul %139, %141, %cst_112 {dimension_numbers = #tpu.dot_dimension_numbers<[1], [0], [0], [1], [0, 0, 1, 1], [], []>} : vector<256x128xf32>, vector<128x128xf32>, vector<256x128xf32> -> vector<256x128xf32>
    %c0_113 = arith.constant 0 : index
    %c0_114 = arith.constant 0 : index
    %143 = vector.load %arg21[%c0_113, %c0_114] : memref<256x128xf32, #tpu.memory_space<vmem>>, vector<256x128xf32>
    %144 = arith.addf %143, %142 : vector<256x128xf32>
    %c0_115 = arith.constant 0 : index
    %c0_116 = arith.constant 0 : index
    %145 = vector.load %arg21[%c0_115, %c0_116] : memref<256x128xf32, #tpu.memory_space<vmem>>, vector<256x128xf32>
    tpu.vector_store %arg21[%c0_115, %c0_116], %144 {strides = array<i32>} : memref<256x128xf32, #tpu.memory_space<vmem>>, vector<256x128xf32>,
    %c0_117 = arith.constant 0 : index
    %c0_118 = arith.constant 0 : index
    %146 = vector.load %arg21[%c0_117, %c0_118] : memref<256x128xf32, #tpu.memory_space<vmem>>, vector<256x128xf32>
    %147 = vector.shape_cast %146 : vector<256x128xf32> to vector<2x128x128xf32>
    %cst_119 = arith.constant dense<0xFF800000> : vector<2x128xf32>
    %148 = vector.multi_reduction <maximumf>, %147, %cst_119 [1] : vector<2x128x128xf32> to vector<2x128xf32>
    %c0_120 = arith.constant 0 : index
    %c0_121 = arith.constant 0 : index
    %149 = vector.load %arg9[%c0_120, %c0_121] : memref<1x128xf32, #tpu.memory_space<vmem>>, vector<1x128xf32>
    %150 = vector.broadcast %149 : vector<1x128xf32> to vector<2x128xf32>
    %151 = arith.addf %148, %150 : vector<2x128xf32>
    %c0_122 = arith.constant 0 : index
    %c0_123 = arith.constant 0 : index
    %152 = vector.load %arg10[%c0_122, %c0_123] : memref<2x8xf32, #tpu.memory_space<vmem>>, vector<2x8xf32>
    %c0_124 = arith.constant 0 : index
    %c0_125 = arith.constant 0 : index
    %153 = vector.load %arg11[%c0_124, %c0_125] : memref<8x64xf32, #tpu.memory_space<vmem>>, vector<8x64xf32>
    %cst_126 = arith.constant dense<0.000000e+00> : vector<2x64xf32>
    %154 = tpu.matmul %152, %153, %cst_126 {dimension_numbers = #tpu.dot_dimension_numbers<[1], [0], [0], [1], [0, 0, 1, 1], [], []>} : vector<2x8xf32>, vector<8x64xf32>, vector<2x64xf32> -> vector<2x64xf32>
    %c0_127 = arith.constant 0 : index
    %c0_128 = arith.constant 0 : index
    %155 = vector.load %arg12[%c0_127, %c0_128] : memref<1x64xf32, #tpu.memory_space<vmem>>, vector<1x64xf32>
    %156 = vector.broadcast %155 : vector<1x64xf32> to vector<2x64xf32>
    %157 = arith.addf %154, %156 : vector<2x64xf32>
    %cst_129 = arith.constant 0.000000e+00 : f32
    %158 = vector.broadcast %cst_129 : f32 to vector<2x64xf32>
    %159 = arith.maximumf %157, %158 : vector<2x64xf32>
    %c0_130 = arith.constant 0 : index
    %c0_131 = arith.constant 0 : index
    %160 = vector.load %arg13[%c0_130, %c0_131] : memref<64x64xf32, #tpu.memory_space<vmem>>, vector<64x64xf32>
    %cst_132 = arith.constant dense<0.000000e+00> : vector<2x64xf32>
    %161 = tpu.matmul %159, %160, %cst_132 {dimension_numbers = #tpu.dot_dimension_numbers<[1], [0], [0], [1], [0, 0, 1, 1], [], []>} : vector<2x64xf32>, vector<64x64xf32>, vector<2x64xf32> -> vector<2x64xf32>
    %c0_133 = arith.constant 0 : index
    %c0_134 = arith.constant 0 : index
    %162 = vector.load %arg14[%c0_133, %c0_134] : memref<1x64xf32, #tpu.memory_space<vmem>>, vector<1x64xf32>
    %163 = vector.broadcast %162 : vector<1x64xf32> to vector<2x64xf32>
    %164 = arith.addf %161, %163 : vector<2x64xf32>
    %c0_135 = arith.constant 0 : index
    %c0_136 = arith.constant 0 : index
    %165 = vector.load %arg15[%c0_135, %c0_136] : memref<2x8xf32, #tpu.memory_space<vmem>>, vector<2x8xf32>
    %c0_137 = arith.constant 0 : index
    %c0_138 = arith.constant 0 : index
    %166 = vector.load %arg16[%c0_137, %c0_138] : memref<8x128xf32, #tpu.memory_space<vmem>>, vector<8x128xf32>
    %cst_139 = arith.constant dense<0.000000e+00> : vector<2x128xf32>
    %167 = tpu.matmul %165, %166, %cst_139 {dimension_numbers = #tpu.dot_dimension_numbers<[1], [0], [0], [1], [0, 0, 1, 1], [], []>} : vector<2x8xf32>, vector<8x128xf32>, vector<2x128xf32> -> vector<2x128xf32>
    %c0_140 = arith.constant 0 : index
    %c0_141 = arith.constant 0 : index
    %168 = vector.load %arg17[%c0_140, %c0_141] : memref<1x128xf32, #tpu.memory_space<vmem>>, vector<1x128xf32>
    %169 = vector.broadcast %168 : vector<1x128xf32> to vector<2x128xf32>
    %170 = arith.addf %167, %169 : vector<2x128xf32>
    %c0_142 = arith.constant 0 : index
    %c0_143 = arith.constant 0 : index
    %171 = vector.load %arg18[%c0_142, %c0_143] : memref<128x128xf32, #tpu.memory_space<vmem>>, vector<128x128xf32>
    %cst_144 = arith.constant dense<0.000000e+00> : vector<2x128xf32>
    %172 = tpu.matmul %170, %171, %cst_144 {dimension_numbers = #tpu.dot_dimension_numbers<[1], [0], [0], [1], [0, 0, 1, 1], [], []>} : vector<2x128xf32>, vector<128x128xf32>, vector<2x128xf32> -> vector<2x128xf32>
    %c0_145 = arith.constant 0 : index
    %c0_146 = arith.constant 0 : index
    %173 = vector.load %arg19[%c0_145, %c0_146] : memref<1x128xf32, #tpu.memory_space<vmem>>, vector<1x128xf32>
    %174 = vector.broadcast %173 : vector<1x128xf32> to vector<2x128xf32>
    %175 = arith.addf %172, %174 : vector<2x128xf32>
    %176 = vector.extract_strided_slice %151 {offsets = [0, 64], sizes = [2, 64], strides = [1, 1]} : vector<2x128xf32> to vector<2x64xf32>
    %c0_147 = arith.constant 0 : index
    %c0_148 = arith.constant 0 : index
    %177 = vector.load %arg20[%c0_147, %c0_148] : memref<2x320xf32, #tpu.memory_space<vmem>>, vector<2x64xf32>
    tpu.vector_store %arg20[%c0_147, %c0_148], %176 {strides = array<i32>} : memref<2x320xf32, #tpu.memory_space<vmem>>, vector<2x64xf32>,
    %178 = vector.extract_strided_slice %175 {offsets = [0, 0], sizes = [2, 64], strides = [1, 1]} : vector<2x128xf32> to vector<2x64xf32>
    %c0_149 = arith.constant 0 : index
    %c64 = arith.constant 64 : index
    %179 = vector.load %arg20[%c0_149, %c64] : memref<2x320xf32, #tpu.memory_space<vmem>>, vector<2x64xf32>
    tpu.vector_store %arg20[%c0_149, %c64], %178 {strides = array<i32>} : memref<2x320xf32, #tpu.memory_space<vmem>>, vector<2x64xf32>,
    %180 = vector.extract_strided_slice %151 {offsets = [0, 0], sizes = [2, 64], strides = [1, 1]} : vector<2x128xf32> to vector<2x64xf32>
    %c0_150 = arith.constant 0 : index
    %c128 = arith.constant 128 : index
    %181 = vector.load %arg20[%c0_150, %c128] : memref<2x320xf32, #tpu.memory_space<vmem>>, vector<2x64xf32>
    tpu.vector_store %arg20[%c0_150, %c128], %180 {strides = array<i32>} : memref<2x320xf32, #tpu.memory_space<vmem>>, vector<2x64xf32>,
    %182 = vector.extract_strided_slice %175 {offsets = [0, 64], sizes = [2, 64], strides = [1, 1]} : vector<2x128xf32> to vector<2x64xf32>
    %c0_151 = arith.constant 0 : index
    %c192 = arith.constant 192 : index
    %183 = vector.load %arg20[%c0_151, %c192] : memref<2x320xf32, #tpu.memory_space<vmem>>, vector<2x64xf32>
    tpu.vector_store %arg20[%c0_151, %c192], %182 {strides = array<i32>} : memref<2x320xf32, #tpu.memory_space<vmem>>, vector<2x64xf32>,
    %c0_152 = arith.constant 0 : index
    %c256 = arith.constant 256 : index
    %184 = vector.load %arg20[%c0_152, %c256] : memref<2x320xf32, #tpu.memory_space<vmem>>, vector<2x64xf32>
    tpu.vector_store %arg20[%c0_152, %c256], %164 {strides = array<i32>} : memref<2x320xf32, #tpu.memory_space<vmem>>, vector<2x64xf32>,
    return
  }
}

</mosaic_0001>

<bundles_post_ra>
// kernel: tpu_custom_call.1
= control target key start
LH: loop header
LB: loop body
LE: loop exit
PB: predicated region body
PF: predicated region fallthrough
CT: control target
= control target key end

     0   :  { %s9633_s0 = inlined_call_operand.vmem [shape: f32[256,8], index: 0, kind: input, shape index: {}]   ;;  %s9634_s1 = inlined_call_operand.vmem [shape: f32[8,128], index: 1, kind: input, shape index: {}]   ;;  %s9635_s2 = inlined_call_operand.vmem [shape: f32[1,128], index: 2, kind: input, shape index: {}]   ;;  %s9636_s3 = inlined_call_operand.hbm [shape: f32[4,128,128], index: 3, kind: input, shape index: {}]   ;;  %s9637_s4 = inlined_call_operand.vmem [shape: f32[4,1,128], index: 4, kind: input, shape index: {}]   ;;  %s9638_s5 = inlined_call_operand.hbm [shape: f32[4,128,128], index: 5, kind: input, shape index: {}]   ;;  %s9639_s6 = inlined_call_operand.hbm [shape: f32[4,128,128], index: 6, kind: input, shape index: {}]   ;;  %s9640_s7 = inlined_call_operand.vmem [shape: f32[4,1,128], index: 7, kind: input, shape index: {}]   ;;  %s9641_s8 = inlined_call_operand.hbm [shape: f32[4,128,128], index: 8, kind: input, shape index: {}]   ;;  %s9642_s9 = inlined_call_operand.vmem [shape: f32[1,128], index: 9, kind: input, shape index: {}]   ;;  %s9643_s10 = inlined_call_operand.vmem [shape: f32[2,8], index: 10, kind: input, shape index: {}]   ;;  %s9644_s11 = inlined_call_operand.vmem [shape: f32[8,64], index: 11, kind: input, shape index: {}]   ;;  %s9645_s12 = inlined_call_operand.vmem [shape: f32[1,64], index: 12, kind: input, shape index: {}]   ;;  %s9646_s13 = inlined_call_operand.vmem [shape: f32[64,64], index: 13, kind: input, shape index: {}]   ;;  %s9647_s14 = inlined_call_operand.vmem [shape: f32[1,64], index: 14, kind: input, shape index: {}]   ;;  %s9648_s15 = inlined_call_operand.vmem [shape: f32[2,8], index: 15, kind: input, shape index: {}]   ;;  %s9649_s16 = inlined_call_operand.vmem [shape: f32[8,128], index: 16, kind: input, shape index: {}]   ;;  %s9650_s17 = inlined_call_operand.vmem [shape: f32[1,128], index: 17, kind: input, shape index: {}]   ;;  %s9651_s18 = inlined_call_operand.vmem [shape: f32[128,128], index: 18, kind: input, shape index: {}]   ;;  %s9652_s19 = inlined_call_operand.vmem [shape: f32[1,128], index: 19, kind: input, shape index: {}]   ;;  %s9653_s20 = inlined_call_operand.hbm [shape: f32[2,320], index: 20, kind: output, shape index: {}]  }
   0x1   :  { %9658 = sst [smem:[#allocation16_spill]] %s9633_s0 }
   0x2   :  { %9659 = sst [smem:[#allocation17_spill]] %s9634_s1 }
   0x3   :  { %9660 = sst [smem:[#allocation18_spill]] %s9635_s2 }
   0x4   :  { %9661 = sst [smem:[#allocation19_spill]] %s9636_s3 }
   0x5   :  { %9662 = sst [smem:[#allocation20_spill]] %s9637_s4 }
   0x6   :  { %9663 = sst [smem:[#allocation21_spill]] %s9653_s20 }
   0x7   :  { %25 = vsyncpa [#allocation4], 0 }
   0x8   :  { %26 = vsyncpa [#allocation7], 0 }
   0x9   :  { %27 = vsyncpa [#allocation10], 0 }
   0xa   :  { %28 = vsyncpa [#allocation5], 0  ;;  %s8206_s1 = smov [#allocation6]   ;;  %s8207_s23 = smov [#allocation3]  }
   0xb   :  { %s54_s22 = sshll.u32 %s8206_s1, 4  ;;  %s40_s24 = sshll.u32 %s8207_s23, 4  ;;  %s55_s22 = int_to_ptr.vmem [resolvable:$true] %s54_s22  ;;  %s8324_s24 = int_to_ptr.vmem [resolvable:$true] %s40_s24 }
   0xc   :  { %s8088_s3 = scalar_lea.hbm %s9638_s5, 8192 }
   0xd   :  { %p8089_p0 = scmp.ne.s32.totalorder %s9638_s5, %s8088_s3  ;;  %p8092_p1 = scmp.lt.u32.totalorder %s8088_s3, %s9638_s5 }
   0xf   :  { %p8094_p2 = pnand %p8092_p1, %p8089_p0 }
  0x11   :  { %8097 = shalt.err (!%p8094_p2)
}
  0x12   :  { %s8098_s29 = scalar_lea.vmem %s55_s22, 8192  ;;  %p8103_p4 = scmp.lt.s32.totalorder %s55_s22, %s55_s22 }
  0x13   :  { %p8099_p3 = scmp.ne.s32.totalorder %s55_s22, %s8098_s29  ;;  %p8104_p5 = scmp.lt.s32.totalorder %s8098_s29, %s8098_s29 }
  0x15   :  { %p8105_p6 = por %p8104_p5, %p8103_p4 }
  0x17   :  { %p8106_p7 = pnand %p8105_p6, %p8099_p3 }
  0x19   :  { %8109 = shalt.err (!%p8106_p7)
}
  0x1a   :  { %s8208_s30 = smov 128   ;;  %s8209_s0 = smov 8  }
  0x1b   :  { %60 = dma.hbm_to_vmem [thread:$0]  %s9638_s5, 8192, %s55_s22, [#allocation7], %s8208_s30, %s8208_s30, %s8209_s0  }
  0x1c   :  { %s9664_s25 = sld [smem:[#allocation19_spill]] }
  0x22   :  { %s8110_s3 = scalar_lea.hbm %s9664_s25, 8192 }
  0x23   :  { %p8111_p8 = scmp.ne.s32.totalorder %s9664_s25, %s8110_s3  ;;  %p8114_p9 = scmp.lt.u32.totalorder %s8110_s3, %s9664_s25 }
  0x25   :  { %p8116_p10 = pnand %p8114_p9, %p8111_p8 }
  0x27   :  { %8119 = shalt.err (!%p8116_p10)
}
  0x28   :  { %s8120_s29 = scalar_lea.vmem %s8324_s24, 8192  ;;  %p8125_p12 = scmp.lt.s32.totalorder %s8324_s24, %s8324_s24 }
  0x29   :  { %p8121_p11 = scmp.ne.s32.totalorder %s8324_s24, %s8120_s29  ;;  %p8126_p13 = scmp.lt.s32.totalorder %s8120_s29, %s8120_s29 }
  0x2b   :  { %p8127_p0 = por %p8126_p13, %p8125_p12 }
  0x2d   :  { %p8128_p1 = pnand %p8127_p0, %p8121_p11 }
  0x2f   :  { %8131 = shalt.err (!%p8128_p1)
}
  0x30   :  { %46 = dma.hbm_to_vmem [thread:$0]  %s9664_s25, 8192, %s8324_s24, [#allocation4], %s8208_s30, %s8208_s30, %s8209_s0  }
  0x31   :  { %s8210_s21 = smov [#allocation8]   ;;  %s8211_s23 = smov [#allocation9]  }
  0x32   :  { %s66_s1 = sshll.u32 %s8210_s21, 4  ;;  %s80_s2 = sshll.u32 %s8211_s23, 4  ;;  %s67_s1 = int_to_ptr.vmem [resolvable:$true] %s66_s1  ;;  %s8361_s2 = int_to_ptr.vmem [resolvable:$true] %s80_s2 }
  0x33   :  { %s8132_s27 = scalar_lea.hbm %s9639_s6, 8192 }
  0x34   :  { %p8133_p2 = scmp.ne.s32.totalorder %s9639_s6, %s8132_s27  ;;  %p8136_p3 = scmp.lt.u32.totalorder %s8132_s27, %s9639_s6 }
  0x36   :  { %p8138_p4 = pnand %p8136_p3, %p8133_p2 }
  0x38   :  { %8141 = shalt.err (!%p8138_p4)
}
  0x39   :  { %s8142_s24 = scalar_lea.vmem %s67_s1, 8192  ;;  %p8147_p6 = scmp.lt.s32.totalorder %s67_s1, %s67_s1 }
  0x3a   :  { %p8143_p5 = scmp.ne.s32.totalorder %s67_s1, %s8142_s24  ;;  %p8148_p7 = scmp.lt.s32.totalorder %s8142_s24, %s8142_s24 }
  0x3c   :  { %p8149_p8 = por %p8148_p7, %p8147_p6 }
  0x3e   :  { %p8150_p9 = pnand %p8149_p8, %p8143_p5 }
  0x40   :  { %8153 = shalt.err (!%p8150_p9)
}
  0x41   :  { %72 = dma.hbm_to_vmem [thread:$0]  %s9639_s6, 8192, %s67_s1, [#allocation7], %s8208_s30, %s8208_s30, %s8209_s0  }
  0x42   :  { %s8154_s20 = scalar_lea.hbm %s9641_s8, 8192 }
  0x43   :  { %p8155_p10 = scmp.ne.s32.totalorder %s9641_s8, %s8154_s20  ;;  %p8158_p11 = scmp.lt.u32.totalorder %s8154_s20, %s9641_s8 }
  0x45   :  { %p8160_p12 = pnand %p8158_p11, %p8155_p10 }
  0x47   :  { %8163 = shalt.err (!%p8160_p12)
}
  0x48   :  { %s8164_s28 = scalar_lea.vmem %s8361_s2, 8192  ;;  %p8169_p0 = scmp.lt.s32.totalorder %s8361_s2, %s8361_s2 }
  0x49   :  { %p8165_p13 = scmp.ne.s32.totalorder %s8361_s2, %s8164_s28  ;;  %p8170_p1 = scmp.lt.s32.totalorder %s8164_s28, %s8164_s28 }
  0x4b   :  { %p8171_p2 = por %p8170_p1, %p8169_p0 }
  0x4d   :  { %p8172_p3 = pnand %p8171_p2, %p8165_p13 }
  0x4f   :  { %8175 = shalt.err (!%p8172_p3)
}
  0x50   :  { %86 = dma.hbm_to_vmem [thread:$0]  %s9641_s8, 8192, %s8361_s2, [#allocation10], %s8208_s30, %s8208_s30, %s8209_s0  }
  0x51   :  { %8198 = dma.done.wait [#allocation4], 8192  }
  0x52   :  { %8199 = vsyncadd [#allocation4], 4294959104 }
  0x53   :  { %8200 = dma.done.wait [#allocation7], 16384  }
  0x54   :  { %8201 = vsyncadd [#allocation7], 4294950912 }
  0x55   :  { %8202 = dma.done.wait [#allocation10], 8192  }
  0x56   :  { %8203 = vsyncadd [#allocation10], 4294959104  ;;  %vm161_vm0 = vcmask 64512   ;;  %s9665_s24 = sld [smem:[#allocation17_spill]]  ;;  %s9666_s22 = sld [smem:[#allocation16_spill]]  ;;  %v515_v8 = vld [vmem:[#allocation3] sm:$0xff] }
  0x57   :  { %v516_v9 = vld [vmem:[#allocation3 + $0x8] sm:$0xff]  ;;  %v517_v10 = vld [vmem:[#allocation3 + $0x10] sm:$0xff]  ;;  %v518_v13 = vld [vmem:[#allocation3 + $0x18] sm:$0xff]  ;;  %s9667_s28 = sld [smem:[#allocation18_spill]]  ;;  %vm8213_vm1 = vmmov 0   ;;  %s9668_s1 = sld [smem:[#allocation20_spill]] }
  0x58   :  { %v7447_v12 = vpack.c.bf16 %v516_v9, %v515_v8  ;;  %v7451_v15 = vpack.c.bf16 %v518_v13, %v517_v10  ;;  %v519_v16 = vld [vmem:[#allocation3 + $0x20] sm:$0xff]  ;;  %v520_v17 = vld [vmem:[#allocation3 + $0x28] sm:$0xff]  ;;  %v521_v21 = vld [vmem:[#allocation3 + $0x30] sm:$0xff]  ;;  %vm1096_vm2 = vcmask 1041409   ;;  %vm5155_vm3 = vcmask 523264   ;;  %s8218_s5 = smov [#allocation11]  }
  0x59   :  { %v7455_v20 = vpack.c.bf16 %v520_v17, %v519_v16  ;;  %v522_v22 = vld [vmem:[#allocation3 + $0x38] sm:$0xff]  ;;  %v523_v26 = vld [vmem:[#allocation3 + $0x40] sm:$0xff]  ;;  %v524_v27 = vld [vmem:[#allocation3 + $0x48] sm:$0xff]  ;;  %vm5435_vm4 = vcmask 517120   ;;  %vm5426_vm5 = vcmask 1043459   ;;  %vm5428_vm6 = vcmask 1045509  }
  0x5a   :  { %7963 = vmatprep.subr.bf16.mxu1 %v7447_v12  ;;  %v7459_v25 = vpack.c.bf16 %v522_v22, %v521_v21  ;;  %v7463_v30 = vpack.c.bf16 %v524_v27, %v523_v26  ;;  %v525_v31 = vld [vmem:[#allocation3 + $0x50] sm:$0xff]  ;;  %v526_v32 = vld [vmem:[#allocation3 + $0x58] sm:$0xff]  ;;  %v527_v36 = vld [vmem:[#allocation3 + $0x60] sm:$0xff]  ;;  %vm5430_vm7 = vcmask 1047559   ;;  %vm5448_vm8 = vcmask 1041920   ;;  %s5460_s21 = sshll.u32 %s8218_s5, 4  ;;  %s5461_s21 = int_to_ptr.vmem [resolvable:$true] %s5460_s21 }
  0x5b   :  { %7971 = vmatpush3.bf16.msra.mxu1 %v7447_v12  ;;  %v7467_v35 = vpack.c.bf16 %v526_v32, %v525_v31  ;;  %v528_v37 = vld [vmem:[#allocation3 + $0x68] sm:$0xff]  ;;  %v529_v54 = vld [vmem:[#allocation3 + $0x70] sm:$0xff]  ;;  %v530_v55 = vld [vmem:[#allocation3 + $0x78] sm:$0xff]  ;;  %s8176_s20 = scalar_lea.vmem %s5461_s21, 96  ;;  %p8181_p5 = scmp.lt.s32.totalorder %s5461_s21, %s5461_s21 }
  0x5c   :  { %v153_v0 = vld [vmem:[%s9665_s24] sm:$0xff]  ;;  %v122_v2 = vld [vmem:[%s9666_s22 + $0x8] sm:$0xff]  ;;  %v123_v3 = vld [vmem:[%s9666_s22 + $0x10] sm:$0xff]  ;;  %7964 = vmatprep.subr.bf16.mxu1 %v7451_v15  ;;  %v7471_v40 = vpack.c.bf16 %v528_v37, %v527_v36  ;;  %v7475_v56 = vpack.c.bf16 %v530_v55, %v529_v54  ;;  %p8177_p4 = scmp.ne.s32.totalorder %s5461_s21, %s8176_s20  ;;  %p8182_p6 = scmp.lt.s32.totalorder %s8176_s20, %s8176_s20 }
  0x5d   :  { %v121_v1 = vld [vmem:[%s9666_s22] sm:$0xff]  ;;  %6233 = vmatprep.subr.mxu0 %v153_v0  ;;  %v124_v4 = vld [vmem:[%s9666_s22 + $0x18] sm:$0xff]  ;;  %v126_v6 = vld [vmem:[%s9666_s22 + $0x28] sm:$0xff] }
  0x5e   :  { %6235 = vmatprep.mubr.msk.f32.mxu0 %vm161_vm0, %v121_v1  ;;  %6234 = vmatpush3.msra.mxu0 %v153_v0  ;;  %v125_v5 = vld [vmem:[%s9666_s22 + $0x20] sm:$0xff]  ;;  %v127_v7 = vld [vmem:[%s9666_s22 + $0x30] sm:$0xff]  ;;  %v128_v11 = vld [vmem:[%s9666_s22 + $0x38] sm:$0xff]  ;;  %p8183_p7 = por %p8182_p6, %p8181_p5 }
  0x5f   :  { %6236 = vmatmul.mubr.msk.f32.vlgmr.msra.gmra.mrb[0].mxu0 %vm161_vm0, %v122_v2  ;;  %v129_v14 = vld [vmem:[%s9666_s22 + $0x40] sm:$0xff]  ;;  %7448 = vmatprep.subr.bf16.mxu0 %v7447_v12  ;;  %v130_v18 = vld [vmem:[%s9666_s22 + $0x48] sm:$0xff]  ;;  %v131_v19 = vld [vmem:[%s9666_s22 + $0x50] sm:$0xff] }
  0x60   :  { %6238 = vmatprep.mubr.msk.f32.mxu0 %vm161_vm0, %v123_v3  ;;  %7450 = vmatpush3.bf16.msra.mxu0 %v7447_v12  ;;  %v132_v23 = vld [vmem:[%s9666_s22 + $0x58] sm:$0xff]  ;;  %v133_v24 = vld [vmem:[%s9666_s22 + $0x60] sm:$0xff]  ;;  %v134_v28 = vld [vmem:[%s9666_s22 + $0x68] sm:$0xff]  ;;  %p8184_p8 = pnand %p8183_p7, %p8177_p4 }
  0x61   :  { %7452 = vmatprep.subr.bf16.mxu0 %v7451_v15  ;;  %7972 = vmatpush3.bf16.msra.mxu1 %v7451_v15  ;;  %v135_v29 = vld [vmem:[%s9666_s22 + $0x70] sm:$0xff]  ;;  %v136_v33 = vld [vmem:[%s9666_s22 + $0x78] sm:$0xff]  ;;  %v137_v34 = vld [vmem:[%s9666_s22 + $0x80] sm:$0xff] }
  0x62   :  { %7965 = vmatprep.subr.bf16.mxu1 %v7455_v20  ;;  %v138_v38 = vld [vmem:[%s9666_s22 + $0x88] sm:$0xff]  ;;  %v139_v39 = vld [vmem:[%s9666_s22 + $0x90] sm:$0xff]  ;;  %v140_v41 = vld [vmem:[%s9666_s22 + $0x98] sm:$0xff] }
  0x63   :  { %6239 = vmatmul.mubr.msk.f32.gmra.mrb[2].mxu0 %vm161_vm0, %v124_v4  ;;  %v141_v42 = vld [vmem:[%s9666_s22 + $0xa0] sm:$0xff]  ;;  %v142_v43 = vld [vmem:[%s9666_s22 + $0xa8] sm:$0xff]  ;;  %v143_v44 = vld [vmem:[%s9666_s22 + $0xb0] sm:$0xff] }
  0x64   :  { %6241 = vmatprep.mubr.msk.f32.mxu0 %vm161_vm0, %v125_v5  ;;  %7454 = vmatpush3.bf16.msra.mxu0 %v7451_v15  ;;  %v144_v45 = vld [vmem:[%s9666_s22 + $0xb8] sm:$0xff]  ;;  %v145_v46 = vld [vmem:[%s9666_s22 + $0xc0] sm:$0xff]  ;;  %v146_v47 = vld [vmem:[%s9666_s22 + $0xc8] sm:$0xff] }
  0x65   :  { %7456 = vmatprep.subr.bf16.mxu0 %v7455_v20  ;;  %7973 = vmatpush3.bf16.msra.mxu1 %v7455_v20  ;;  %v147_v48 = vld [vmem:[%s9666_s22 + $0xd0] sm:$0xff]  ;;  %v148_v49 = vld [vmem:[%s9666_s22 + $0xd8] sm:$0xff]  ;;  %v149_v50 = vld [vmem:[%s9666_s22 + $0xe0] sm:$0xff] }
  0x66   :  { %7966 = vmatprep.subr.bf16.mxu1 %v7459_v25  ;;  %v150_v51 = vld [vmem:[%s9666_s22 + $0xe8] sm:$0xff]  ;;  %v151_v52 = vld [vmem:[%s9666_s22 + $0xf0] sm:$0xff]  ;;  %v152_v53 = vld [vmem:[%s9666_s22 + $0xf8] sm:$0xff] }
  0x67   :  { %6242 = vmatmul.mubr.msk.f32.gmra.mrb[4].mxu0 %vm161_vm0, %v126_v6  ;;  %v795_v57 = vld [vmem:[#allocation6] sm:$0xff]  ;;  %v796_v58 = vld [vmem:[#allocation6 + $0x8] sm:$0xff]  ;;  %v797_v1 = vld [vmem:[#allocation6 + $0x10] sm:$0xff] }
  0x68   :  { %6244 = vmatprep.mubr.msk.f32.mxu0 %vm161_vm0, %v127_v7  ;;  %7458 = vmatpush3.bf16.msra.mxu0 %v7455_v20  ;;  %v7479_v59 = vpack.c.bf16 %v796_v58, %v795_v57  ;;  %v8532_v60 = vld [vmem:[%s9667_s28] ss:$0 sm:$0xff]  ;;  %v798_v2 = vld [vmem:[#allocation6 + $0x18] sm:$0xff]  ;;  %v805_v37 = vld [vmem:[#allocation6 + $0x50] sm:$0xff] }
  0x69   :  { %7460 = vmatprep.subr.bf16.mxu0 %v7459_v25  ;;  %7974 = vmatpush3.bf16.msra.mxu1 %v7459_v25  ;;  %v7483_v8 = vpack.c.bf16 %v798_v2, %v797_v1  ;;  %v799_v10 = vld [vmem:[#allocation6 + $0x20] sm:$0xff]  ;;  %v802_v20 = vld [vmem:[#allocation6 + $0x38] sm:$0xff] }
  0x6a   :  { %7967 = vmatprep.subr.bf16.mxu1 %v7463_v30 }
  0x6b   :  { %6245 = vmatmul.mubr.msk.f32.gmra.mrb[6].mxu0 %vm161_vm0, %v128_v11  ;;  %v800_v11 = vld [vmem:[#allocation6 + $0x28] sm:$0xff] }
  0x6c   :  { %6247 = vmatprep.mubr.msk.f32.mxu0 %vm161_vm0, %v129_v14  ;;  %7462 = vmatpush3.bf16.msra.mxu0 %v7459_v25  ;;  %v7487_v17 = vpack.c.bf16 %v800_v11, %v799_v10 }
  0x6d   :  { %7464 = vmatprep.subr.bf16.mxu0 %v7463_v30  ;;  %7975 = vmatpush3.bf16.msra.mxu1 %v7463_v30 }
  0x6e   :  { %7968 = vmatprep.subr.bf16.mxu1 %v7467_v35 }
  0x6f   :  { %6248 = vmatmul.mubr.msk.f32.gmra.mrb[8].mxu0 %vm161_vm0, %v130_v18 }
  0x70   :  { %6250 = vmatprep.mubr.msk.f32.mxu0 %vm161_vm0, %v131_v19  ;;  %7466 = vmatpush3.bf16.msra.mxu0 %v7463_v30  ;;  %v801_v19 = vld [vmem:[#allocation6 + $0x30] sm:$0xff] }
  0x71   :  { %7468 = vmatprep.subr.bf16.mxu0 %v7467_v35  ;;  %7976 = vmatpush3.bf16.msra.mxu1 %v7467_v35  ;;  %v7491_v26 = vpack.c.bf16 %v802_v20, %v801_v19 }
  0x72   :  { %7969 = vmatprep.subr.bf16.mxu1 %v7471_v40 }
  0x73   :  { %6251 = vmatmul.mubr.msk.f32.gmra.mrb[10].mxu0 %vm161_vm0, %v132_v23 }
  0x74   :  { %6253 = vmatprep.mubr.msk.f32.mxu0 %vm161_vm0, %v133_v24  ;;  %7470 = vmatpush3.bf16.msra.mxu0 %v7467_v35 }
  0x75   :  { %7472 = vmatprep.subr.bf16.mxu0 %v7471_v40  ;;  %7977 = vmatpush3.bf16.msra.mxu1 %v7471_v40 }
  0x76   :  { %7970 = vmatprep.subr.bf16.mxu1 %v7475_v56 }
  0x77   :  { %6254 = vmatmul.mubr.msk.f32.gmra.mrb[12].mxu0 %vm161_vm0, %v134_v28  ;;  %v803_v28 = vld [vmem:[#allocation6 + $0x40] sm:$0xff] }
  0x78   :  { %6256 = vmatprep.mubr.msk.f32.mxu0 %vm161_vm0, %v135_v29  ;;  %7474 = vmatpush3.bf16.msra.mxu0 %v7471_v40  ;;  %v804_v29 = vld [vmem:[#allocation6 + $0x48] sm:$0xff] }
  0x79   :  { %7476 = vmatprep.subr.bf16.mxu0 %v7475_v56  ;;  %7978 = vmatpush3.bf16.msra.mxu1 %v7475_v56  ;;  %v7495_v35 = vpack.c.bf16 %v804_v29, %v803_v28 }
  0x7b   :  { %6257 = vmatmul.mubr.msk.f32.gmra.mrb[14].mxu0 %vm161_vm0, %v136_v33 }
  0x7c   :  { %6259 = vmatprep.mubr.msk.f32.mxu0 %vm161_vm0, %v137_v34  ;;  %7478 = vmatpush3.bf16.msra.mxu0 %v7475_v56 }
  0x7d   :  { %7480 = vmatprep.subr.bf16.mxu0 %v7479_v59 }
  0x7f   :  { %6260 = vmatmul.mubr.msk.f32.gmra.mrb[16].mxu0 %vm161_vm0, %v138_v38  ;;  %v806_v38 = vld [vmem:[#allocation6 + $0x58] sm:$0xff] }
  0x80   :  { %6262 = vmatprep.mubr.msk.f32.mxu0 %vm161_vm0, %v139_v39 }
  0x83   :  { %6263 = vmatmul.mubr.msk.f32.gmra.mrb[18].mxu0 %vm161_vm0, %v140_v41 }
  0x84   :  { %6265 = vmatprep.mubr.msk.f32.mxu0 %vm161_vm0, %v141_v42 }
  0x87   :  { %6266 = vmatmul.mubr.msk.f32.gmra.mrb[20].mxu0 %vm161_vm0, %v142_v43 }
  0x88   :  { %6268 = vmatprep.mubr.msk.f32.mxu0 %vm161_vm0, %v143_v44  ;;  %v7499_v44 = vpack.c.bf16 %v806_v38, %v805_v37 }
  0x8b   :  { %6269 = vmatmul.mubr.msk.f32.gmra.mrb[22].mxu0 %vm161_vm0, %v144_v45 }
  0x8c   :  { %6271 = vmatprep.mubr.msk.f32.mxu0 %vm161_vm0, %v145_v46  ;;  %v807_v46 = vld [vmem:[#allocation6 + $0x60] sm:$0xff] }
  0x8f   :  { %6272 = vmatmul.mubr.msk.f32.gmra.mrb[24].mxu0 %vm161_vm0, %v146_v47  ;;  %v808_v47 = vld [vmem:[#allocation6 + $0x68] sm:$0xff] }
  0x90   :  { %6274 = vmatprep.mubr.msk.f32.mxu0 %vm161_vm0, %v147_v48 }
  0x93   :  { %6275 = vmatmul.mubr.msk.f32.gmra.mrb[26].mxu0 %vm161_vm0, %v148_v49 }
  0x94   :  { %6277 = vmatprep.mubr.msk.f32.mxu0 %vm161_vm0, %v149_v50 }
  0x97   :  { %6278 = vmatmul.mubr.msk.f32.gmra.mrb[28].mxu0 %vm161_vm0, %v150_v51 }
  0x98   :  { %6280 = vmatprep.mubr.msk.f32.mxu0 %vm161_vm0, %v151_v52 }
  0x9b   :  { %6281 = vmatmul.mubr.msk.f32.gmra.mrb[30].mxu0 %vm161_vm0, %v152_v53  ;;  %v7503_v53 = vpack.c.bf16 %v808_v47, %v807_v46 }
 0x132   :  { %v6237_v61 = vpop.f32.mrb[0].mxu0 }
 0x133   :  { %v330_v62 = vadd.f32 %v6237_v61, %v8532_v60  ;;  %v324_v63 = vpop.f32.mrb[1].mxu0 }
 0x134   :  { %v325_v0 = vadd.f32 %v8532_v60, %v324_v63 }
 0x135   :  { %v484_v5 = vmax.f32 %v330_v62, 0.0 }
 0x136   :  { %v483_v3 = vmax.f32 %v325_v0, 0.0  ;;  %v6240_v4 = vpop.f32.mrb[2].mxu0 }
 0x137   :  { %v340_v6 = vadd.f32 %v6240_v4, %v8532_v60  ;;  %v334_v7 = vpop.f32.mrb[3].mxu0 }
 0x138   :  { %v335_v9 = vadd.f32 %v8532_v60, %v334_v7  ;;  %6315 = vmatprep.mubr.f32.mxu0 %v483_v3 }
 0x139   :  { %6316 = vmatmul.mubr.f32.vlgmr.msra.gmra.mrb[32].mxu0 %v484_v5  ;;  %v486_v14 = vmax.f32 %v340_v6, 0.0 }
 0x13a   :  { %v485_v12 = vmax.f32 %v335_v9, 0.0  ;;  %v6243_v13 = vpop.f32.mrb[4].mxu0  ;;  %7482 = vmatpush3.bf16.msra.mxu0 %v7479_v59 }
 0x13b   :  { %v350_v15 = vadd.f32 %v6243_v13, %v8532_v60  ;;  %v344_v16 = vpop.f32.mrb[5].mxu0  ;;  %7484 = vmatprep.subr.bf16.mxu0 %v7483_v8 }
 0x13c   :  { %v345_v18 = vadd.f32 %v8532_v60, %v344_v16  ;;  %6318 = vmatprep.mubr.f32.mxu0 %v485_v12 }
 0x13d   :  { %6319 = vmatmul.mubr.f32.gmra.mrb[34].mxu0 %v486_v14  ;;  %v488_v23 = vmax.f32 %v350_v15, 0.0 }
 0x13e   :  { %v487_v21 = vmax.f32 %v345_v18, 0.0  ;;  %v6246_v22 = vpop.f32.mrb[6].mxu0  ;;  %7486 = vmatpush3.bf16.msra.mxu0 %v7483_v8 }
 0x13f   :  { %v360_v24 = vadd.f32 %v6246_v22, %v8532_v60  ;;  %v354_v25 = vpop.f32.mrb[7].mxu0  ;;  %7488 = vmatprep.subr.bf16.mxu0 %v7487_v17 }
 0x140   :  { %v355_v27 = vadd.f32 %v8532_v60, %v354_v25  ;;  %6321 = vmatprep.mubr.f32.mxu0 %v487_v21 }
 0x141   :  { %6322 = vmatmul.mubr.f32.gmra.mrb[36].mxu0 %v488_v23  ;;  %v490_v32 = vmax.f32 %v360_v24, 0.0 }
 0x142   :  { %v489_v30 = vmax.f32 %v355_v27, 0.0  ;;  %v6249_v31 = vpop.f32.mrb[8].mxu0  ;;  %7490 = vmatpush3.bf16.msra.mxu0 %v7487_v17 }
 0x143   :  { %v370_v33 = vadd.f32 %v6249_v31, %v8532_v60  ;;  %v364_v34 = vpop.f32.mrb[9].mxu0  ;;  %7492 = vmatprep.subr.bf16.mxu0 %v7491_v26 }
 0x144   :  { %v365_v36 = vadd.f32 %v8532_v60, %v364_v34  ;;  %6324 = vmatprep.mubr.f32.mxu0 %v489_v30 }
 0x145   :  { %6325 = vmatmul.mubr.f32.gmra.mrb[38].mxu0 %v490_v32  ;;  %v492_v41 = vmax.f32 %v370_v33, 0.0 }
 0x146   :  { %v491_v39 = vmax.f32 %v365_v36, 0.0  ;;  %v6252_v40 = vpop.f32.mrb[10].mxu0  ;;  %7494 = vmatpush3.bf16.msra.mxu0 %v7491_v26 }
 0x147   :  { %v380_v42 = vadd.f32 %v6252_v40, %v8532_v60  ;;  %v374_v43 = vpop.f32.mrb[11].mxu0  ;;  %7496 = vmatprep.subr.bf16.mxu0 %v7495_v35 }
 0x148   :  { %v375_v45 = vadd.f32 %v8532_v60, %v374_v43  ;;  %6327 = vmatprep.mubr.f32.mxu0 %v491_v39 }
 0x149   :  { %6328 = vmatmul.mubr.f32.gmra.mrb[40].mxu0 %v492_v41  ;;  %v494_v50 = vmax.f32 %v380_v42, 0.0 }
 0x14a   :  { %v493_v48 = vmax.f32 %v375_v45, 0.0  ;;  %v6255_v49 = vpop.f32.mrb[12].mxu0  ;;  %7498 = vmatpush3.bf16.msra.mxu0 %v7495_v35 }
 0x14b   :  { %v390_v51 = vadd.f32 %v6255_v49, %v8532_v60  ;;  %v384_v52 = vpop.f32.mrb[13].mxu0  ;;  %7500 = vmatprep.subr.bf16.mxu0 %v7499_v44  ;;  %v810_v49 = vld [vmem:[#allocation6 + $0x78] sm:$0xff] }
 0x14c   :  { %v385_v54 = vadd.f32 %v8532_v60, %v384_v52  ;;  %6330 = vmatprep.mubr.f32.mxu0 %v493_v48  ;;  %v809_v48 = vld [vmem:[#allocation6 + $0x70] sm:$0xff]  ;;  %v1079_v52 = vld [vmem:[#allocation8 + $0x8] sm:$0xff] }
 0x14d   :  { %6331 = vmatmul.mubr.f32.gmra.mrb[42].mxu0 %v494_v50  ;;  %v496_v57 = vmax.f32 %v390_v51, 0.0  ;;  %v7507_v50 = vpack.c.bf16 %v810_v49, %v809_v48  ;;  %v1078_v51 = vld [vmem:[#allocation8] sm:$0xff] }
 0x14e   :  { %v495_v55 = vmax.f32 %v385_v54, 0.0  ;;  %v6258_v56 = vpop.f32.mrb[14].mxu0  ;;  %7502 = vmatpush3.bf16.msra.mxu0 %v7499_v44  ;;  %v8212_v54 = vmov 0.0|0.0  }
 0x14f   :  { %v400_v58 = vadd.f32 %v6258_v56, %v8532_v60  ;;  %v394_v59 = vpop.f32.mrb[15].mxu0  ;;  %7504 = vmatprep.subr.bf16.mxu0 %v7503_v53  ;;  %7511 = vmatprep.subr.bf16.mxu1 %v8212_v54 }
 0x150   :  { %v395_v61 = vadd.f32 %v8532_v60, %v394_v59  ;;  %6333 = vmatprep.mubr.f32.mxu0 %v495_v55  ;;  %v1081_v55 = vld [vmem:[#allocation8 + $0x18] sm:$0xff] }
 0x151   :  { %6334 = vmatmul.mubr.f32.gmra.mrb[44].mxu0 %v496_v57  ;;  %v498_v0 = vmax.f32 %v400_v58, 0.0  ;;  %v1082_v57 = vld [vmem:[#allocation8 + $0x20] sm:$0xff]  ;;  %v1083_v58 = vld [vmem:[#allocation8 + $0x28] sm:$0xff] }
 0x152   :  { %v497_v62 = vmax.f32 %v395_v61, 0.0  ;;  %v6261_v63 = vpop.f32.mrb[16].mxu0  ;;  %7506 = vmatpush3.bf16.msra.mxu0 %v7503_v53  ;;  %v7512_v53 = vpack.c.bf16 %v1079_v52, %v1078_v51  ;;  %v7518_v59 = vpack.c.bf16 %v1083_v58, %v1082_v57  ;;  %v1084_v61 = vld [vmem:[#allocation8 + $0x30] sm:$0xff] }
 0x153   :  { %v410_v1 = vadd.f32 %v6261_v63, %v8532_v60  ;;  %v404_v2 = vpop.f32.mrb[17].mxu0  ;;  %7508 = vmatprep.subr.bf16.mxu0 %v7507_v50 }
 0x154   :  { %6336 = vmatprep.mubr.f32.mxu0 %v497_v62  ;;  %v405_v3 = vadd.f32 %v8532_v60, %v404_v2  ;;  %v1085_v62 = vld [vmem:[#allocation8 + $0x38] sm:$0xff] }
 0x155   :  { %6337 = vmatmul.mubr.f32.gmra.mrb[46].mxu0 %v498_v0  ;;  %v500_v6 = vmax.f32 %v410_v1, 0.0  ;;  %v7521_v63 = vpack.c.bf16 %v1085_v62, %v1084_v61  ;;  %v1086_v0 = vld [vmem:[#allocation8 + $0x40] sm:$0xff]  ;;  %v1087_v1 = vld [vmem:[#allocation8 + $0x48] sm:$0xff] }
 0x156   :  { %v6264_v4 = vpop.f32.mrb[18].mxu0  ;;  %v499_v5 = vmax.f32 %v405_v3, 0.0  ;;  %7510 = vmatpush3.bf16.msra.mxu0 %v7507_v50  ;;  %v7524_v2 = vpack.c.bf16 %v1087_v1, %v1086_v0  ;;  %v1088_v3 = vld [vmem:[#allocation8 + $0x50] sm:$0xff] }
 0x157   :  { %v420_v7 = vadd.f32 %v6264_v4, %v8532_v60  ;;  %v414_v8 = vpop.f32.mrb[19].mxu0  ;;  %v1089_v4 = vld [vmem:[#allocation8 + $0x58] sm:$0xff] }
 0x158   :  { %v415_v9 = vadd.f32 %v8532_v60, %v414_v8  ;;  %6339 = vmatprep.mubr.f32.mxu1 %v499_v5  ;;  %v7527_v5 = vpack.c.bf16 %v1089_v4, %v1088_v3 }
 0x159   :  { %6340 = vmatmul.mubr.f32.vlgmr.msra.gmra.mrb[0].mxu1 %v500_v6  ;;  %v502_v12 = vmax.f32 %v420_v7, 0.0  ;;  %v1090_v6 = vld [vmem:[#allocation8 + $0x60] sm:$0xff]  ;;  %v1091_v7 = vld [vmem:[#allocation8 + $0x68] sm:$0xff] }
 0x15a   :  { %v501_v10 = vmax.f32 %v415_v9, 0.0  ;;  %v6267_v11 = vpop.f32.mrb[20].mxu0  ;;  %7513 = vmatpush3.bf16.msra.mxu1 %v7512_v53  ;;  %v7530_v8 = vpack.c.bf16 %v1091_v7, %v1090_v6  ;;  %v1092_v9 = vld [vmem:[#allocation8 + $0x70] sm:$0xff] }
 0x15b   :  { %v430_v13 = vadd.f32 %v6267_v11, %v8532_v60  ;;  %v424_v14 = vpop.f32.mrb[21].mxu0  ;;  %7514 = vmatprep.subr.bf16.mxu1 %v8212_v54 }
 0x15c   :  { %v425_v15 = vadd.f32 %v8532_v60, %v424_v14  ;;  %6342 = vmatprep.mubr.f32.mxu1 %v501_v10  ;;  %v1093_v10 = vld [vmem:[#allocation8 + $0x78] sm:$0xff] }
 0x15d   :  { %6343 = vmatmul.mubr.f32.gmra.mrb[2].mxu1 %v502_v12  ;;  %v504_v18 = vmax.f32 %v430_v13, 0.0  ;;  %v7533_v11 = vpack.c.bf16 %v1093_v10, %v1092_v9  ;;  %v8214_v12 = vmov 0.0   ;;  %v8579_v13 = vld [vmem:[%s9668_s1] ss:$0 sm:$0xff] }
 0x15e   :  { %v503_v16 = vmax.f32 %v425_v15, 0.0  ;;  %v6270_v17 = vpop.f32.mrb[22].mxu0 }
 0x15f   :  { %v440_v19 = vadd.f32 %v6270_v17, %v8532_v60  ;;  %v434_v20 = vpop.f32.mrb[23].mxu0 }
 0x160   :  { %v435_v21 = vadd.f32 %v8532_v60, %v434_v20  ;;  %6345 = vmatprep.mubr.f32.mxu1 %v503_v16 }
 0x161   :  { %6346 = vmatmul.mubr.f32.gmra.mrb[4].mxu1 %v504_v18  ;;  %v506_v24 = vmax.f32 %v440_v19, 0.0 }
 0x162   :  { %v505_v22 = vmax.f32 %v435_v21, 0.0  ;;  %v6273_v23 = vpop.f32.mrb[24].mxu0 }
 0x163   :  { %v450_v25 = vadd.f32 %v6273_v23, %v8532_v60  ;;  %v444_v26 = vpop.f32.mrb[25].mxu0 }
 0x164   :  { %v445_v27 = vadd.f32 %v8532_v60, %v444_v26  ;;  %6348 = vmatprep.mubr.f32.mxu1 %v505_v22 }
 0x165   :  { %6349 = vmatmul.mubr.f32.gmra.mrb[6].mxu1 %v506_v24  ;;  %v508_v30 = vmax.f32 %v450_v25, 0.0 }
 0x166   :  { %v507_v28 = vmax.f32 %v445_v27, 0.0  ;;  %v6276_v29 = vpop.f32.mrb[26].mxu0 }
 0x167   :  { %v460_v31 = vadd.f32 %v6276_v29, %v8532_v60  ;;  %v454_v32 = vpop.f32.mrb[27].mxu0 }
 0x168   :  { %v455_v33 = vadd.f32 %v8532_v60, %v454_v32  ;;  %6351 = vmatprep.mubr.f32.mxu1 %v507_v28 }
 0x169   :  { %6352 = vmatmul.mubr.f32.gmra.mrb[8].mxu1 %v508_v30  ;;  %v510_v36 = vmax.f32 %v460_v31, 0.0 }
 0x16a   :  { %v509_v34 = vmax.f32 %v455_v33, 0.0  ;;  %v6279_v35 = vpop.f32.mrb[28].mxu0 }
 0x16b   :  { %v470_v37 = vadd.f32 %v6279_v35, %v8532_v60  ;;  %v464_v38 = vpop.f32.mrb[29].mxu0 }
 0x16c   :  { %v465_v39 = vadd.f32 %v8532_v60, %v464_v38  ;;  %6354 = vmatprep.mubr.f32.mxu1 %v509_v34 }
 0x16d   :  { %6355 = vmatmul.mubr.f32.gmra.mrb[10].mxu1 %v510_v36  ;;  %v512_v42 = vmax.f32 %v470_v37, 0.0 }
 0x16e   :  { %v511_v40 = vmax.f32 %v465_v39, 0.0  ;;  %v6282_v41 = vpop.f32.mrb[30].mxu0 }
 0x16f   :  { %v480_v43 = vadd.f32 %v6282_v41, %v8532_v60  ;;  %v474_v44 = vpop.f32.mrb[31].mxu0 }
 0x170   :  { %v475_v45 = vadd.f32 %v8532_v60, %v474_v44  ;;  %6357 = vmatprep.mubr.f32.mxu1 %v511_v40  ;;  %v1080_v60 = vld [vmem:[#allocation8 + $0x10] sm:$0xff] }
 0x171   :  { %6358 = vmatmul.mubr.f32.gmra.mrb[12].mxu1 %v512_v42  ;;  %v514_v47 = vmax.f32 %v480_v43, 0.0  ;;  %v7515_v56 = vpack.c.bf16 %v1081_v55, %v1080_v60 }
 0x172   :  { %v513_v46 = vmax.f32 %v475_v45, 0.0 }
 0x173   :  { %7516 = vmatpush3.bf16.msra.mxu1 %v7515_v56 }
 0x174   :  { %6360 = vmatprep.mubr.f32.mxu1 %v513_v46  ;;  %7517 = vmatprep.subr.bf16.mxu1 %v8212_v54 }
 0x175   :  { %6361 = vmatmul.mubr.f32.gmra.mrb[14].mxu1 %v514_v47 }
 0x176   :  { %6475 = vmatprep.mubr.msk.f32.mxu1 %vm8213_vm1, %v8214_v12 }
 0x177   :  { %7519 = vmatpush3.bf16.msra.mxu1 %v7518_v59 }
 0x178   :  { %7520 = vmatprep.subr.bf16.mxu1 %v8212_v54 }
 0x17b   :  { %7522 = vmatpush3.bf16.msra.mxu1 %v7521_v63 }
 0x17c   :  { %7523 = vmatprep.subr.bf16.mxu1 %v8212_v54 }
 0x17f   :  { %7525 = vmatpush3.bf16.msra.mxu1 %v7524_v2 }
 0x180   :  { %7526 = vmatprep.subr.bf16.mxu1 %v8212_v54 }
 0x183   :  { %7528 = vmatpush3.bf16.msra.mxu1 %v7527_v5 }
 0x184   :  { %7529 = vmatprep.subr.bf16.mxu1 %v8212_v54 }
 0x187   :  { %7531 = vmatpush3.bf16.msra.mxu1 %v7530_v8 }
 0x188   :  { %7532 = vmatprep.subr.bf16.mxu1 %v8212_v54 }
 0x18b   :  { %7534 = vmatpush3.bf16.msra.mxu1 %v7533_v11 }
 0x20c   :  { %v6317_v14 = vpop.f32.mrb[32].mxu0 }
 0x20d   :  { %v610_v15 = vadd.f32 %v6317_v14, %v8579_v13  ;;  %v604_v16 = vpop.f32.mrb[33].mxu0 }
 0x20e   :  { %v605_v17 = vadd.f32 %v8579_v13, %v604_v16 }
 0x20f   :  { %v764_v20 = vmax.f32 %v610_v15, 0.0 }
 0x210   :  { %v763_v18 = vmax.f32 %v605_v17, 0.0  ;;  %v6320_v19 = vpop.f32.mrb[34].mxu0 }
 0x211   :  { %v620_v21 = vadd.f32 %v6320_v19, %v8579_v13  ;;  %v614_v22 = vpop.f32.mrb[35].mxu0 }
 0x212   :  { %v615_v23 = vadd.f32 %v8579_v13, %v614_v22  ;;  %6395 = vmatprep.mubr.f32.mxu0 %v763_v18 }
 0x213   :  { %v766_v24 = vmax.f32 %v620_v21, 0.0  ;;  %6396 = vmatmul.mubr.f32.vlgmr.msra.gmra.mrb[48].mxu0 %v764_v20 }
 0x214   :  { %v765_v25 = vmax.f32 %v615_v23, 0.0  ;;  %v6323_v26 = vpop.f32.mrb[36].mxu0 }
 0x215   :  { %v1037_v27 = vmax.f32 %v764_v20, %v766_v24  ;;  %v630_v28 = vadd.f32 %v6323_v26, %v8579_v13  ;;  %v624_v29 = vpop.f32.mrb[37].mxu0 }
 0x216   :  { %v1036_v30 = vmax.f32 %v763_v18, %v765_v25  ;;  %v625_v31 = vadd.f32 %v8579_v13, %v624_v29  ;;  %6398 = vmatprep.mubr.f32.mxu0 %v765_v25 }
 0x217   :  { %v768_v32 = vmax.f32 %v630_v28, 0.0  ;;  %6399 = vmatmul.mubr.f32.gmra.mrb[50].mxu0 %v766_v24 }
 0x218   :  { %v767_v33 = vmax.f32 %v625_v31, 0.0  ;;  %v6326_v34 = vpop.f32.mrb[38].mxu0 }
 0x219   :  { %v1039_v35 = vmax.f32 %v1037_v27, %v768_v32  ;;  %v640_v36 = vadd.f32 %v6326_v34, %v8579_v13  ;;  %v634_v37 = vpop.f32.mrb[39].mxu0 }
 0x21a   :  { %v1038_v38 = vmax.f32 %v1036_v30, %v767_v33  ;;  %v635_v39 = vadd.f32 %v8579_v13, %v634_v37  ;;  %6401 = vmatprep.mubr.f32.mxu0 %v767_v33 }
 0x21b   :  { %v770_v40 = vmax.f32 %v640_v36, 0.0  ;;  %6402 = vmatmul.mubr.f32.gmra.mrb[52].mxu0 %v768_v32 }
 0x21c   :  { %v769_v41 = vmax.f32 %v635_v39, 0.0  ;;  %v6329_v42 = vpop.f32.mrb[40].mxu0 }
 0x21d   :  { %v1041_v43 = vmax.f32 %v1039_v35, %v770_v40  ;;  %v650_v44 = vadd.f32 %v6329_v42, %v8579_v13  ;;  %v644_v45 = vpop.f32.mrb[41].mxu0 }
 0x21e   :  { %v1040_v46 = vmax.f32 %v1038_v38, %v769_v41  ;;  %v645_v47 = vadd.f32 %v8579_v13, %v644_v45  ;;  %6404 = vmatprep.mubr.f32.mxu0 %v769_v41 }
 0x21f   :  { %v772_v48 = vmax.f32 %v650_v44, 0.0  ;;  %6405 = vmatmul.mubr.f32.gmra.mrb[54].mxu0 %v770_v40 }
 0x220   :  { %v771_v49 = vmax.f32 %v645_v47, 0.0  ;;  %v6332_v50 = vpop.f32.mrb[42].mxu0 }
 0x221   :  { %v1043_v51 = vmax.f32 %v1041_v43, %v772_v48  ;;  %v660_v52 = vadd.f32 %v6332_v50, %v8579_v13  ;;  %v654_v53 = vpop.f32.mrb[43].mxu0 }
 0x222   :  { %v1042_v60 = vmax.f32 %v1040_v46, %v771_v49  ;;  %v655_v55 = vadd.f32 %v8579_v13, %v654_v53  ;;  %6407 = vmatprep.mubr.f32.mxu0 %v771_v49 }
 0x223   :  { %v774_v56 = vmax.f32 %v660_v52, 0.0  ;;  %6408 = vmatmul.mubr.f32.gmra.mrb[56].mxu0 %v772_v48 }
 0x224   :  { %v773_v57 = vmax.f32 %v655_v55, 0.0  ;;  %v6335_v58 = vpop.f32.mrb[44].mxu0 }
 0x225   :  { %v1045_v59 = vmax.f32 %v1043_v51, %v774_v56  ;;  %v670_v61 = vadd.f32 %v6335_v58, %v8579_v13  ;;  %v664_v62 = vpop.f32.mrb[45].mxu0 }
 0x226   :  { %v1044_v63 = vmax.f32 %v1042_v60, %v773_v57  ;;  %v665_v0 = vadd.f32 %v8579_v13, %v664_v62  ;;  %6410 = vmatprep.mubr.f32.mxu0 %v773_v57 }
 0x227   :  { %v776_v1 = vmax.f32 %v670_v61, 0.0  ;;  %6411 = vmatmul.mubr.f32.gmra.mrb[58].mxu0 %v774_v56 }
 0x228   :  { %v775_v2 = vmax.f32 %v665_v0, 0.0  ;;  %v6338_v3 = vpop.f32.mrb[46].mxu0 }
 0x229   :  { %v1047_v4 = vmax.f32 %v1045_v59, %v776_v1  ;;  %v680_v5 = vadd.f32 %v6338_v3, %v8579_v13  ;;  %v674_v6 = vpop.f32.mrb[47].mxu0 }
 0x22a   :  { %v1046_v7 = vmax.f32 %v1044_v63, %v775_v2  ;;  %v675_v8 = vadd.f32 %v8579_v13, %v674_v6  ;;  %6413 = vmatprep.mubr.f32.mxu0 %v775_v2 }
 0x22b   :  { %v778_v9 = vmax.f32 %v680_v5, 0.0  ;;  %6414 = vmatmul.mubr.f32.gmra.mrb[60].mxu0 %v776_v1 }
 0x22c   :  { %v777_v10 = vmax.f32 %v675_v8, 0.0  ;;  %v6341_v11 = vpop.f32.mrb[0].mxu1 }
 0x22d   :  { %v1049_v14 = vmax.f32 %v1047_v4, %v778_v9  ;;  %v690_v15 = vadd.f32 %v6341_v11, %v8579_v13  ;;  %v684_v16 = vpop.f32.mrb[1].mxu1 }
 0x22e   :  { %v1048_v17 = vmax.f32 %v1046_v7, %v777_v10  ;;  %v685_v18 = vadd.f32 %v8579_v13, %v684_v16  ;;  %6416 = vmatprep.mubr.f32.mxu0 %v777_v10 }
 0x22f   :  { %6417 = vmatmul.mubr.f32.gmra.mrb[62].mxu0 %v778_v9  ;;  %v780_v22 = vmax.f32 %v690_v15, 0.0 }
 0x230   :  { %v8599_v19 = vmax.f32 %v1048_v17, %v1049_v14  ;;  %v779_v20 = vmax.f32 %v685_v18, 0.0  ;;  %v6344_v21 = vpop.f32.mrb[2].mxu1 }
 0x231   :  { %v700_v23 = vadd.f32 %v6344_v21, %v8579_v13  ;;  %v694_v24 = vpop.f32.mrb[3].mxu1 }
 0x232   :  { %v695_v25 = vadd.f32 %v8579_v13, %v694_v24  ;;  %6419 = vmatprep.mubr.f32.mxu0 %v779_v20  ;;  %v1051_v4 = vrot.slane %v8599_v19, 4 }
 0x233   :  { %v782_v26 = vmax.f32 %v700_v23, 0.0  ;;  %6420 = vmatmul.mubr.f32.gmra.mrb[64].mxu0 %v780_v22 }
 0x234   :  { %v781_v27 = vmax.f32 %v695_v25, 0.0  ;;  %v6347_v28 = vpop.f32.mrb[4].mxu1  ;;  %v1052_v15 = vmax.f32 %v8599_v19, %v1051_v4  ;;  %v1579_v19 = vld [vmem:[#allocation3 + $0x80] sm:$0xff]  ;;  %v1316_v4 = vld [vmem:[#allocation9 + $0x58] sm:$0xff] }
 0x235   :  { %v1058_v29 = vmax.f32 %v780_v22, %v782_v26  ;;  %v710_v30 = vadd.f32 %v6347_v28, %v8579_v13  ;;  %v704_v31 = vpop.f32.mrb[5].mxu1 }
 0x236   :  { %v1057_v32 = vmax.f32 %v779_v20, %v781_v27  ;;  %v705_v33 = vadd.f32 %v8579_v13, %v704_v31  ;;  %6422 = vmatprep.mubr.f32.mxu0 %v781_v27  ;;  %v1053_v20 = vrot.slane %v1052_v15, 2  ;;  %v1580_v31 = vld [vmem:[#allocation3 + $0x88] sm:$0xff] }
 0x237   :  { %v784_v34 = vmax.f32 %v710_v30, 0.0  ;;  %6423 = vmatmul.mubr.f32.gmra.mrb[66].mxu0 %v782_v26 }
 0x238   :  { %v783_v35 = vmax.f32 %v705_v33, 0.0  ;;  %v6350_v36 = vpop.f32.mrb[6].mxu1  ;;  %v1054_v23 = vmax.f32 %v1052_v15, %v1053_v20  ;;  %v1581_v33 = vld [vmem:[#allocation3 + $0x90] sm:$0xff]  ;;  %v1320_v15 = vld [vmem:[#allocation9 + $0x78] sm:$0xff] }
 0x239   :  { %v1060_v37 = vmax.f32 %v1058_v29, %v784_v34  ;;  %v720_v38 = vadd.f32 %v6350_v36, %v8579_v13  ;;  %v714_v39 = vpop.f32.mrb[7].mxu1  ;;  %v1583_v36 = vld [vmem:[#allocation3 + $0xa0] sm:$0xff] }
 0x23a   :  { %v1059_v40 = vmax.f32 %v1057_v32, %v783_v35  ;;  %v715_v41 = vadd.f32 %v8579_v13, %v714_v39  ;;  %6425 = vmatprep.mubr.f32.mxu0 %v783_v35  ;;  %v1055_v26 = vrot.slane %v1054_v23, 1  ;;  %v7567_v32 = vpack.c.bf16 %v1580_v31, %v1579_v19  ;;  %v1585_v39 = vld [vmem:[#allocation3 + $0xb0] sm:$0xff] }
 0x23b   :  { %v786_v42 = vmax.f32 %v720_v38, 0.0  ;;  %6426 = vmatmul.mubr.f32.gmra.mrb[68].mxu0 %v784_v34  ;;  %v1582_v34 = vld [vmem:[#allocation3 + $0x98] sm:$0xff] }
 0x23c   :  { %v785_v43 = vmax.f32 %v715_v41, 0.0  ;;  %v6353_v44 = vpop.f32.mrb[8].mxu1  ;;  %7568 = vmatprep.subr.bf16.mxu0 %v7567_v32  ;;  %v7571_v35 = vpack.c.bf16 %v1582_v34, %v1581_v33 }
 0x23d   :  { %v1062_v45 = vmax.f32 %v1060_v37, %v786_v42  ;;  %v730_v46 = vadd.f32 %v6353_v44, %v8579_v13  ;;  %v724_v47 = vpop.f32.mrb[9].mxu1  ;;  %7570 = vmatpush3.bf16.msra.mxu0 %v7567_v32  ;;  %v1584_v37 = vld [vmem:[#allocation3 + $0xa8] sm:$0xff] }
 0x23e   :  { %v1061_v48 = vmax.f32 %v1059_v40, %v785_v43  ;;  %v725_v49 = vadd.f32 %v8579_v13, %v724_v47  ;;  %6428 = vmatprep.mubr.f32.mxu0 %v785_v43  ;;  %7572 = vmatprep.subr.bf16.mxu0 %v7571_v35  ;;  %v7575_v38 = vpack.c.bf16 %v1584_v37, %v1583_v36  ;;  %v1586_v40 = vld [vmem:[#allocation3 + $0xb8] sm:$0xff]  ;;  %v1306_v43 = vld [vmem:[#allocation9 + $0x8] sm:$0xff] }
 0x23f   :  { %v788_v50 = vmax.f32 %v730_v46, 0.0  ;;  %6429 = vmatmul.mubr.f32.gmra.mrb[70].mxu0 %v786_v42  ;;  %v7579_v41 = vpack.c.bf16 %v1586_v40, %v1585_v39  ;;  %v1305_v42 = vld [vmem:[#allocation9] sm:$0xff]  ;;  %v1588_v46 = vld [vmem:[#allocation3 + $0xc8] sm:$0xff] }
 0x240   :  { %v787_v51 = vmax.f32 %v725_v49, 0.0  ;;  %v6356_v52 = vpop.f32.mrb[10].mxu1  ;;  %v7535_v44 = vpack.c.bf16 %v1306_v43, %v1305_v42  ;;  %v1308_v49 = vld [vmem:[#allocation9 + $0x18] sm:$0xff] }
 0x241   :  { %v1064_v53 = vmax.f32 %v1062_v45, %v788_v50  ;;  %v740_v60 = vadd.f32 %v6356_v52, %v8579_v13  ;;  %v734_v55 = vpop.f32.mrb[11].mxu1  ;;  %7574 = vmatpush3.bf16.msra.mxu0 %v7571_v35  ;;  %v1587_v45 = vld [vmem:[#allocation3 + $0xc0] sm:$0xff]  ;;  %v1590_v52 = vld [vmem:[#allocation3 + $0xd8] sm:$0xff] }
 0x242   :  { %v1063_v56 = vmax.f32 %v1061_v48, %v787_v51  ;;  %v735_v57 = vadd.f32 %v8579_v13, %v734_v55  ;;  %6431 = vmatprep.mubr.f32.mxu0 %v787_v51  ;;  %7576 = vmatprep.subr.bf16.mxu0 %v7575_v38  ;;  %v7583_v47 = vpack.c.bf16 %v1588_v46, %v1587_v45  ;;  %v1307_v48 = vld [vmem:[#allocation9 + $0x10] sm:$0xff]  ;;  %v1310_v55 = vld [vmem:[#allocation9 + $0x28] sm:$0xff] }
 0x243   :  { %v790_v58 = vmax.f32 %v740_v60, 0.0  ;;  %6432 = vmatmul.mubr.f32.gmra.mrb[72].mxu0 %v788_v50  ;;  %7536 = vmatprep.subr.bf16.mxu1 %v7535_v44  ;;  %v7539_v50 = vpack.c.bf16 %v1308_v49, %v1307_v48  ;;  %v1589_v51 = vld [vmem:[#allocation3 + $0xd0] sm:$0xff] }
 0x244   :  { %v789_v59 = vmax.f32 %v735_v57, 0.0  ;;  %v6359_v61 = vpop.f32.mrb[12].mxu1  ;;  %v7587_v60 = vpack.c.bf16 %v1590_v52, %v1589_v51  ;;  %v1312_v57 = vld [vmem:[#allocation9 + $0x38] sm:$0xff]  ;;  %v8215_v51 = vmov 1966171168  }
 0x245   :  { %v1066_v62 = vmax.f32 %v1064_v53, %v790_v58  ;;  %v750_v63 = vadd.f32 %v6359_v61, %v8579_v13  ;;  %v744_v0 = vpop.f32.mrb[13].mxu1  ;;  %7578 = vmatpush3.bf16.msra.mxu0 %v7575_v38  ;;  %v1309_v53 = vld [vmem:[#allocation9 + $0x20] sm:$0xff]  ;;  %v1592_v61 = vld [vmem:[#allocation3 + $0xe8] sm:$0xff]  ;;  %v1171_v52 = vunpack.c.l.s4 %v8215_v51 }
 0x246   :  { %v1065_v1 = vmax.f32 %v1063_v56, %v789_v59  ;;  %v745_v2 = vadd.f32 %v8579_v13, %v744_v0  ;;  %6434 = vmatprep.mubr.f32.mxu0 %v789_v59  ;;  %7580 = vmatprep.subr.bf16.mxu0 %v7579_v41  ;;  %v1311_v56 = vld [vmem:[#allocation9 + $0x30] sm:$0xff]  ;;  %v1591_v59 = vld [vmem:[#allocation3 + $0xe0] sm:$0xff] }
 0x247   :  { %v792_v3 = vmax.f32 %v750_v63, 0.0  ;;  %6435 = vmatmul.mubr.f32.gmra.mrb[74].mxu0 %v790_v58  ;;  %v7543_v58 = vpack.c.bf16 %v1310_v55, %v1309_v53  ;;  %v7591_v63 = vpack.c.bf16 %v1592_v61, %v1591_v59  ;;  %v1313_v0 = vld [vmem:[#allocation9 + $0x40] sm:$0xff]  ;;  %v1173_v53 = vlaneseq }
 0x248   :  { %v791_v5 = vmax.f32 %v745_v2, 0.0  ;;  %v6362_v6 = vpop.f32.mrb[14].mxu1 }
 0x249   :  { %v1068_v7 = vmax.f32 %v1066_v62, %v792_v3  ;;  %v760_v8 = vadd.f32 %v6362_v6, %v8579_v13  ;;  %v754_v9 = vpop.f32.mrb[15].mxu1  ;;  %7582 = vmatpush3.bf16.msra.mxu0 %v7579_v41  ;;  %v7547_v62 = vpack.c.bf16 %v1312_v57, %v1311_v56  ;;  %v1317_v6 = vld [vmem:[#allocation9 + $0x60] sm:$0xff]  ;;  %v8668_v55 = vshrl.u32 %v1173_v53, 7 }
 0x24a   :  { %v1067_v10 = vmax.f32 %v1065_v1, %v791_v5  ;;  %v755_v11 = vadd.f32 %v8579_v13, %v754_v9  ;;  %6437 = vmatprep.mubr.f32.mxu0 %v791_v5  ;;  %v1056_v13 = vmax.f32 %v1054_v23, %v1055_v26  ;;  %7584 = vmatprep.subr.bf16.mxu0 %v7583_v47  ;;  %v1314_v1 = vld [vmem:[#allocation9 + $0x48] sm:$0xff]  ;;  %v1593_v9 = vld [vmem:[#allocation3 + $0xf0] sm:$0xff] }
 0x24b   :  { %v794_v14 = vmax.f32 %v760_v8, 0.0  ;;  %6438 = vmatmul.mubr.f32.gmra.mrb[76].mxu0 %v792_v3  ;;  %v7551_v2 = vpack.c.bf16 %v1314_v1, %v1313_v0  ;;  %v1315_v3 = vld [vmem:[#allocation9 + $0x50] sm:$0xff]  ;;  %v8675_v59 = vsub.s32 0, %v8668_v55  ;;  %v8682_v0 = vld [vmem:[%s9640_s7] ss:$0 sm:$0xff] }
 0x24c   :  { %v793_v16 = vmax.f32 %v755_v11, 0.0  ;;  %v7555_v5 = vpack.c.bf16 %v1316_v4, %v1315_v3  ;;  %v1319_v11 = vld [vmem:[#allocation9 + $0x70] sm:$0xff] }
 0x24d   :  { %v1070_v17 = vmax.f32 %v1068_v7, %v794_v14  ;;  %7586 = vmatpush3.bf16.msra.mxu0 %v7583_v47  ;;  %v1318_v7 = vld [vmem:[#allocation9 + $0x68] sm:$0xff] }
 0x24e   :  { %v1069_v18 = vmax.f32 %v1067_v10, %v793_v16  ;;  %6440 = vmatprep.mubr.f32.mxu0 %v793_v16  ;;  %7588 = vmatprep.subr.bf16.mxu0 %v7587_v60  ;;  %v7559_v8 = vpack.c.bf16 %v1318_v7, %v1317_v6  ;;  %v1594_v10 = vld [vmem:[#allocation3 + $0xf8] sm:$0xff]  ;;  %v7563_v16 = vpack.c.bf16 %v1320_v15, %v1319_v11  ;;  %v1863_v15 = vld [vmem:[#allocation6 + $0x90] sm:$0xff] }
 0x24f   :  { %6441 = vmatmul.mubr.f32.gmra.mrb[78].mxu0 %v794_v14  ;;  %v7595_v14 = vpack.c.bf16 %v1594_v10, %v1593_v9 }
 0x250   :  { %v1071_v21 = vmax.f32 %v1069_v18, %v1070_v17 }
 0x251   :  { %7590 = vmatpush3.bf16.msra.mxu0 %v7587_v60  ;;  %v1172_v60 = vunpack.c.0.s8 %v1171_v52 }
 0x252   :  { %v1072_v22 = vrot.slane %v1071_v21, 4  ;;  %7592 = vmatprep.subr.bf16.mxu0 %v7591_v63 }
 0x253   :  { %v8671_v56 = vsub.s32 %v1172_v60, %v8668_v55  ;;  %v1865_v60 = vld [vmem:[#allocation6 + $0xa0] sm:$0xff] }
 0x254   :  { %v1073_v24 = vmax.f32 %v1071_v21, %v1072_v22 }
 0x255   :  { %7594 = vmatpush3.bf16.msra.mxu0 %v7591_v63 }
 0x256   :  { %v1074_v25 = vrot.slane %v1073_v24, 2  ;;  %7596 = vmatprep.subr.bf16.mxu0 %v7595_v14 }
 0x258   :  { %v1075_v27 = vmax.f32 %v1073_v24, %v1074_v25 }
 0x259   :  { %7598 = vmatpush3.bf16.msra.mxu0 %v7595_v14 }
 0x25a   :  { %v1076_v28 = vrot.slane %v1075_v27, 1  ;;  %7631 = vmatprep.subr.bf16.mxu0 %v8212_v54 }
 0x25c   :  { %v1077_v29 = vmax.f32 %v1075_v27, %v1076_v28 }
 0x25e   :  { %v1097_v30 = vsel %vm1096_vm2, %v1077_v29, %v1056_v13  ;;  %v1861_v29 = vld [vmem:[#allocation6 + $0x80] sm:$0xff] }
 0x25f   :  { %6476 = vmatmul.mubr.f32.vlgmr.msra.gmra.mrb[16].mxu1 %v1097_v30  ;;  %v1862_v30 = vld [vmem:[#allocation6 + $0x88] sm:$0xff] }
 0x260   :  { %7538 = vmatpush3.bf16.msra.mxu1 %v7535_v44  ;;  %v8627_v19 = vpack.c.bf16 %v1862_v30, %v1861_v29 }
 0x261   :  { %7540 = vmatprep.subr.bf16.mxu1 %v7539_v50 }
 0x264   :  { %7542 = vmatpush3.bf16.msra.mxu1 %v7539_v50 }
 0x265   :  { %7544 = vmatprep.subr.bf16.mxu1 %v7543_v58 }
 0x268   :  { %7546 = vmatpush3.bf16.msra.mxu1 %v7543_v58 }
 0x269   :  { %7548 = vmatprep.subr.bf16.mxu1 %v7547_v62 }
 0x26c   :  { %7550 = vmatpush3.bf16.msra.mxu1 %v7547_v62 }
 0x26d   :  { %7552 = vmatprep.subr.bf16.mxu1 %v7551_v2 }
 0x270   :  { %7554 = vmatpush3.bf16.msra.mxu1 %v7551_v2 }
 0x271   :  { %7556 = vmatprep.subr.bf16.mxu1 %v7555_v5 }
 0x274   :  { %7558 = vmatpush3.bf16.msra.mxu1 %v7555_v5 }
 0x275   :  { %7560 = vmatprep.subr.bf16.mxu1 %v7559_v8 }
 0x278   :  { %7562 = vmatpush3.bf16.msra.mxu1 %v7559_v8 }
 0x279   :  { %7564 = vmatprep.subr.bf16.mxu1 %v7563_v16 }
 0x27c   :  { %7566 = vmatpush3.bf16.msra.mxu1 %v7563_v16  ;;  %v1864_v16 = vld [vmem:[#allocation6 + $0x98] sm:$0xff] }
 0x27d   :  { %7600 = vmatprep.subr.bf16.mxu1 %v8627_v19 }
 0x2e6   :  { %v6397_v17 = vpop.f32.mrb[48].mxu0 }
 0x2e7   :  { %v877_v18 = vpop.f32.mrb[49].mxu0 }
 0x2ea   :  { %v6400_v20 = vpop.f32.mrb[50].mxu0 }
 0x2eb   :  { %v887_v21 = vpop.f32.mrb[51].mxu0 }
 0x2ee   :  { %v6403_v22 = vpop.f32.mrb[52].mxu0 }
 0x2ef   :  { %v897_v23 = vpop.f32.mrb[53].mxu0 }
 0x2f2   :  { %v6406_v24 = vpop.f32.mrb[54].mxu0 }
 0x2f3   :  { %v907_v25 = vpop.f32.mrb[55].mxu0 }
 0x2f6   :  { %v8619_v26 = vpop.f32.mrb[56].mxu0 }
 0x2f7   :  { %v8621_v27 = vpop.f32.mrb[57].mxu0 }
 0x2fa   :  { %v8623_v28 = vpop.f32.mrb[58].mxu0 }
 0x2fb   :  { %v8625_v13 = vpop.f32.mrb[59].mxu0 }
 0x2fe   :  { %v8629_v31 = vpop.f32.mrb[60].mxu0 }
 0x2ff   :  { %v937_v32 = vpop.f32.mrb[61].mxu0 }
 0x302   :  { %v8632_v33 = vpop.f32.mrb[62].mxu0 }
 0x303   :  { %v8634_v34 = vpop.f32.mrb[63].mxu0 }
 0x306   :  { %v8636_v35 = vpop.f32.mrb[64].mxu0 }
 0x307   :  { %v8638_v36 = vpop.f32.mrb[65].mxu0 }
 0x30a   :  { %v8640_v37 = vpop.f32.mrb[66].mxu0 }
 0x30b   :  { %v8642_v38 = vpop.f32.mrb[67].mxu0 }
 0x30e   :  { %v8644_v39 = vpop.f32.mrb[68].mxu0 }
 0x30f   :  { %v8646_v40 = vpop.f32.mrb[69].mxu0 }
 0x312   :  { %v8648_v41 = vpop.f32.mrb[70].mxu0 }
 0x313   :  { %v8650_v42 = vpop.f32.mrb[71].mxu0 }
 0x316   :  { %v8652_v43 = vpop.f32.mrb[72].mxu0 }
 0x317   :  { %v8654_v44 = vpop.f32.mrb[73].mxu0 }
 0x31a   :  { %v8656_v45 = vpop.f32.mrb[74].mxu0 }
 0x31b   :  { %v8658_v46 = vpop.f32.mrb[75].mxu0 }
 0x31e   :  { %v8660_v47 = vpop.f32.mrb[76].mxu0 }
 0x31f   :  { %v8662_v48 = vpop.f32.mrb[77].mxu0 }
 0x322   :  { %v8664_v49 = vpop.f32.mrb[78].mxu0 }
 0x323   :  { %v8666_v50 = vpop.f32.mrb[79].mxu0 }
 0x332   :  { %v1165_v57 = vpop.f32.mrb[16].mxu1 }
 0x333   :  { %v1176_v58 = vrot.slane %v1165_v57, %v8671_v56  ;;  %v6477_v61 = vpop.f32.mrb[17].mxu1  ;;  %v1866_v57 = vld [vmem:[#allocation6 + $0xa8] sm:$0xff] }
 0x334   :  { %v7607_v61 = vpack.c.bf16 %v1866_v57, %v1865_v60 }
 0x335   :  { %v1184_v62 = vrot.slane %v1176_v58, %v8671_v56  ;;  %v1177_v1 = vcombine.high %v1176_v58, %v1176_v58 }
 0x337   :  { %v1195_v63 = vrot.slane %v1184_v62, %v8675_v59  ;;  %v1191_v29 = vrot.slane %v1177_v1, %v8671_v56  ;;  %v1867_v62 = vld [vmem:[#allocation6 + $0xb0] sm:$0xff]  ;;  %v1868_v1 = vld [vmem:[#allocation6 + $0xb8] sm:$0xff] }
 0x339   :  { %v1202_v2 = vadd.f32 %v1195_v63, %v877_v18  ;;  %v1203_v3 = vadd.f32 %v6397_v17, %v1195_v63  ;;  %v1204_v4 = vadd.f32 %v1195_v63, %v887_v21  ;;  %v1205_v5 = vadd.f32 %v6400_v20, %v1195_v63 }
 0x33a   :  { %v1206_v6 = vadd.f32 %v1195_v63, %v897_v23  ;;  %v1207_v7 = vadd.f32 %v6403_v22, %v1195_v63  ;;  %v1208_v8 = vadd.f32 %v1195_v63, %v907_v25  ;;  %v1209_v14 = vadd.f32 %v6406_v24, %v1195_v63 }
 0x33b   :  { %v1241_v9 = vadd.f32 %v8682_v0, %v1202_v2  ;;  %v1242_v10 = vadd.f32 %v8682_v0, %v1203_v3  ;;  %v1243_v11 = vadd.f32 %v8682_v0, %v1204_v4  ;;  %v1244_v17 = vadd.f32 %v8682_v0, %v1205_v5 }
 0x33c   :  { %v1245_v18 = vadd.f32 %v8682_v0, %v1206_v6  ;;  %v7603_v20 = vpack.c.bf16 %v1864_v16, %v1863_v15  ;;  %v1210_v22 = vadd.f32 %v1195_v63, %v8621_v27  ;;  %v1211_v23 = vadd.f32 %v8619_v26, %v1195_v63  ;;  %v1871_v16 = vld [vmem:[#allocation6 + $0xd0] sm:$0xff] }
 0x33d   :  { %v1273_v30 = vmax.f32 %v1241_v9, 0.0  ;;  %v1274_v51 = vmax.f32 %v1242_v10, 0.0  ;;  %v1275_v21 = vmax.f32 %v1243_v11, 0.0  ;;  %v1212_v24 = vadd.f32 %v1195_v63, %v8625_v13 }
 0x33e   :  { %v8694_v25 = vadd.f32 %v8623_v28, %v1195_v63  ;;  %v8696_v52 = vadd.f32 %v1195_v63, %v937_v32  ;;  %v8699_v53 = vadd.f32 %v8629_v31, %v1195_v63  ;;  %v8702_v58 = vrot.slane %v1191_v29, %v8675_v59  ;;  %v1872_v29 = vld [vmem:[#allocation6 + $0xd8] sm:$0xff] }
 0x33f   :  { %6510 = vmatprep.mubr.f32.mxu1 %v1273_v30  ;;  %6590 = vmatprep.mubr.f32.mxu0 %v1273_v30  ;;  %v1276_v26 = vmax.f32 %v1244_v17, 0.0  ;;  %v1246_v27 = vadd.f32 %v8682_v0, %v1207_v7  ;;  %v8706_v13 = vadd.f32 %v1195_v63, %v8634_v34  ;;  %v1277_v28 = vmax.f32 %v1245_v18, 0.0  ;;  %v1870_v7 = vld [vmem:[#allocation6 + $0xc8] sm:$0xff] }
 0x340   :  { %6511 = vmatmul.mubr.f32.vlgmr.msra.gmra.mrb[18].mxu1 %v1274_v51  ;;  %6591 = vmatmul.mubr.f32.vlgmr.msra.gmra.mrb[80].mxu0 %v1274_v51  ;;  %v1247_v32 = vadd.f32 %v8682_v0, %v1208_v8  ;;  %v8711_v31 = vadd.f32 %v8632_v33, %v1195_v63  ;;  %v1248_v2 = vadd.f32 %v8682_v0, %v1209_v14 }
 0x341   :  { %6513 = vmatprep.mubr.f32.mxu1 %v1275_v21  ;;  %6593 = vmatprep.mubr.f32.mxu0 %v1275_v21  ;;  %v8716_v34 = vadd.f32 %v8702_v58, %v8638_v36  ;;  %v1278_v33 = vmax.f32 %v1246_v27, 0.0  ;;  %v8724_v63 = vadd.f32 %v8702_v58, %v8642_v38  ;;  %v8728_v3 = vadd.f32 %v8640_v37, %v8702_v58  ;;  %v1869_v38 = vld [vmem:[#allocation6 + $0xc0] sm:$0xff] }
 0x342   :  { %7602 = vmatpush3.bf16.msra.mxu1 %v8627_v19  ;;  %v8720_v19 = vadd.f32 %v8636_v35, %v8702_v58  ;;  %v8732_v4 = vadd.f32 %v8702_v58, %v8646_v40  ;;  %v1279_v36 = vmax.f32 %v1247_v32, 0.0  ;;  %v1249_v5 = vadd.f32 %v8682_v0, %v1210_v22 }
 0x343   :  { %7604 = vmatprep.subr.bf16.mxu1 %v7603_v20  ;;  %v8737_v35 = vadd.f32 %v8644_v39, %v8702_v58  ;;  %v7611_v6 = vpack.c.bf16 %v1868_v1, %v1867_v62  ;;  %v8741_v37 = vadd.f32 %v8702_v58, %v8650_v42  ;;  %v1280_v40 = vmax.f32 %v1248_v2, 0.0 }
 0x344   :  { %6514 = vmatmul.mubr.f32.gmra.mrb[20].mxu1 %v1276_v26  ;;  %6594 = vmatmul.mubr.f32.gmra.mrb[82].mxu0 %v1276_v26  ;;  %v1250_v8 = vadd.f32 %v8682_v0, %v1211_v23  ;;  %v8746_v9 = vadd.f32 %v8648_v41, %v8702_v58  ;;  %v7615_v39 = vpack.c.bf16 %v1870_v7, %v1869_v38  ;;  %v1281_v10 = vmax.f32 %v1249_v5, 0.0 }
 0x345   :  { %6516 = vmatprep.mubr.f32.mxu1 %v1277_v28  ;;  %6596 = vmatprep.mubr.f32.mxu0 %v1277_v28  ;;  %v1251_v11 = vadd.f32 %v8682_v0, %v1212_v24  ;;  %v8751_v14 = vadd.f32 %v8702_v58, %v8654_v44  ;;  %v8755_v42 = vadd.f32 %v8652_v43, %v8702_v58 }
 0x346   :  { %7606 = vmatpush3.bf16.msra.mxu1 %v7603_v20  ;;  %v8759_v41 = vadd.f32 %v8702_v58, %v8658_v46  ;;  %v8763_v15 = vadd.f32 %v8656_v45, %v8702_v58  ;;  %v8767_v44 = vadd.f32 %v8702_v58, %v8662_v48  ;;  %v1282_v43 = vmax.f32 %v1250_v8, 0.0  ;;  %v1873_v20 = vld [vmem:[#allocation6 + $0xe0] sm:$0xff] }
 0x347   :  { %7608 = vmatprep.subr.bf16.mxu1 %v7607_v61  ;;  %v1252_v30 = vadd.f32 %v8682_v0, %v8694_v25  ;;  %v8773_v46 = vadd.f32 %v8660_v47, %v8702_v58  ;;  %v1283_v51 = vmax.f32 %v1251_v11, 0.0  ;;  %v1253_v45 = vadd.f32 %v8682_v0, %v8696_v52  ;;  %v1874_v47 = vld [vmem:[#allocation6 + $0xe8] sm:$0xff] }
 0x348   :  { %6517 = vmatmul.mubr.f32.gmra.mrb[22].mxu1 %v1278_v33  ;;  %6597 = vmatmul.mubr.f32.gmra.mrb[84].mxu0 %v1278_v33  ;;  %v8779_v17 = vadd.f32 %v8702_v58, %v8666_v50  ;;  %v7619_v48 = vpack.c.bf16 %v1872_v29, %v1871_v16  ;;  %v8783_v18 = vadd.f32 %v8664_v49, %v8702_v58  ;;  %v2146_v16 = vld [vmem:[#allocation8 + $0x88] sm:$0xff] }
 0x349   :  { %6519 = vmatprep.mubr.f32.mxu1 %v1279_v36  ;;  %6599 = vmatprep.mubr.f32.mxu0 %v1279_v36  ;;  %v1284_v21 = vmax.f32 %v1252_v30, 0.0  ;;  %v1254_v22 = vadd.f32 %v8682_v0, %v8699_v53  ;;  %v1285_v23 = vmax.f32 %v1253_v45, 0.0  ;;  %v1255_v50 = vadd.f32 %v8682_v0, %v8706_v13  ;;  %v2149_v30 = vld [vmem:[#allocation8 + $0xa0] sm:$0xff] }
 0x34a   :  { %7610 = vmatpush3.bf16.msra.mxu1 %v7607_v61  ;;  %v7623_v24 = vpack.c.bf16 %v1874_v47, %v1873_v20  ;;  %v1256_v25 = vadd.f32 %v8682_v0, %v8711_v31  ;;  %v1257_v53 = vadd.f32 %v8682_v0, %v8716_v34  ;;  %v1258_v57 = vadd.f32 %v8682_v0, %v8720_v19  ;;  %v2154_v20 = vld [vmem:[#allocation8 + $0xc8] sm:$0xff] }
 0x34b   :  { %7612 = vmatprep.subr.bf16.mxu1 %v7611_v6  ;;  %v1286_v49 = vmax.f32 %v1254_v22, 0.0  ;;  %v1287_v52 = vmax.f32 %v1255_v50, 0.0  ;;  %v1259_v26 = vadd.f32 %v8682_v0, %v8724_v63  ;;  %v1260_v13 = vadd.f32 %v8682_v0, %v8728_v3  ;;  %v2156_v22 = vld [vmem:[#allocation8 + $0xd8] sm:$0xff]  ;;  %v2157_v50 = vld [vmem:[#allocation8 + $0xe0] sm:$0xff] }
 0x34c   :  { %6520 = vmatmul.mubr.f32.gmra.mrb[24].mxu1 %v1280_v40  ;;  %6600 = vmatmul.mubr.f32.gmra.mrb[86].mxu0 %v1280_v40  ;;  %v1288_v60 = vmax.f32 %v1256_v25, 0.0  ;;  %v1289_v58 = vmax.f32 %v1257_v53, 0.0  ;;  %v1290_v27 = vmax.f32 %v1258_v57, 0.0  ;;  %v1261_v32 = vadd.f32 %v8682_v0, %v8732_v4 }
 0x34d   :  { %6522 = vmatprep.mubr.f32.mxu1 %v1281_v10  ;;  %6602 = vmatprep.mubr.f32.mxu0 %v1281_v10  ;;  %v1291_v28 = vmax.f32 %v1259_v26, 0.0  ;;  %v1292_v31 = vmax.f32 %v1260_v13, 0.0  ;;  %v1262_v61 = vadd.f32 %v8682_v0, %v8737_v35  ;;  %v1263_v1 = vadd.f32 %v8682_v0, %v8741_v37 }
 0x34e   :  { %7614 = vmatpush3.bf16.msra.mxu1 %v7611_v6  ;;  %v1293_v62 = vmax.f32 %v1261_v32, 0.0  ;;  %v1264_v34 = vadd.f32 %v8682_v0, %v8746_v9  ;;  %v1265_v33 = vadd.f32 %v8682_v0, %v8751_v14  ;;  %v1266_v3 = vadd.f32 %v8682_v0, %v8755_v42  ;;  %v1875_v14 = vld [vmem:[#allocation6 + $0xf0] sm:$0xff]  ;;  %v1876_v42 = vld [vmem:[#allocation6 + $0xf8] sm:$0xff] }
 0x34f   :  { %7616 = vmatprep.subr.bf16.mxu1 %v7615_v39  ;;  %v1294_v2 = vmax.f32 %v1262_v61, 0.0  ;;  %v1295_v19 = vmax.f32 %v1263_v1, 0.0  ;;  %v1267_v36 = vadd.f32 %v8682_v0, %v8759_v41  ;;  %v1268_v35 = vadd.f32 %v8682_v0, %v8763_v15  ;;  %v2145_v15 = vld [vmem:[#allocation8 + $0x80] sm:$0xff] }
 0x350   :  { %6523 = vmatmul.mubr.f32.gmra.mrb[26].mxu1 %v1282_v43  ;;  %6603 = vmatmul.mubr.f32.gmra.mrb[88].mxu0 %v1282_v43  ;;  %v1296_v63 = vmax.f32 %v1264_v34, 0.0  ;;  %v1297_v4 = vmax.f32 %v1265_v33, 0.0  ;;  %v1298_v5 = vmax.f32 %v1266_v3, 0.0  ;;  %v1269_v38 = vadd.f32 %v8682_v0, %v8767_v44  ;;  %v2148_v44 = vld [vmem:[#allocation8 + $0x98] sm:$0xff] }
 0x351   :  { %6525 = vmatprep.mubr.f32.mxu1 %v1283_v51  ;;  %6605 = vmatprep.mubr.f32.mxu0 %v1283_v51  ;;  %v1299_v6 = vmax.f32 %v1267_v36, 0.0  ;;  %v1300_v7 = vmax.f32 %v1268_v35, 0.0  ;;  %v1270_v37 = vadd.f32 %v8682_v0, %v8773_v46  ;;  %v1271_v8 = vadd.f32 %v8682_v0, %v8779_v17  ;;  %v2150_v46 = vld [vmem:[#allocation8 + $0xa8] sm:$0xff]  ;;  %v2151_v51 = vld [vmem:[#allocation8 + $0xb0] sm:$0xff]  ;;  %v2152_v17 = vld [vmem:[#allocation8 + $0xb8] sm:$0xff] }
 0x352   :  { %7618 = vmatpush3.bf16.msra.mxu1 %v7615_v39  ;;  %v1301_v40 = vmax.f32 %v1269_v38, 0.0  ;;  %v1272_v39 = vadd.f32 %v8682_v0, %v8783_v18  ;;  %v7627_v41 = vpack.c.bf16 %v1876_v42, %v1875_v14  ;;  %v7632_v29 = vpack.c.bf16 %v2146_v16, %v2145_v15  ;;  %v2147_v0 = vld [vmem:[#allocation8 + $0x90] sm:$0xff]  ;;  %v2153_v18 = vld [vmem:[#allocation8 + $0xc0] sm:$0xff] }
 0x353   :  { %7620 = vmatprep.subr.bf16.mxu1 %v7619_v48  ;;  %v1302_v9 = vmax.f32 %v1270_v37, 0.0  ;;  %v1303_v10 = vmax.f32 %v1271_v8, 0.0  ;;  %v7635_v43 = vpack.c.bf16 %v2148_v44, %v2147_v0  ;;  %v7638_v45 = vpack.c.bf16 %v2150_v46, %v2149_v30 }
 0x354   :  { %6526 = vmatmul.mubr.f32.gmra.mrb[28].mxu1 %v1284_v21  ;;  %6606 = vmatmul.mubr.f32.gmra.mrb[90].mxu0 %v1284_v21  ;;  %v1304_v11 = vmax.f32 %v1272_v39, 0.0  ;;  %v7644_v47 = vpack.c.bf16 %v2154_v20, %v2153_v18  ;;  %v2155_v21 = vld [vmem:[#allocation8 + $0xd0] sm:$0xff] }
 0x355   :  { %6528 = vmatprep.mubr.f32.mxu1 %v1285_v23  ;;  %6608 = vmatprep.mubr.f32.mxu0 %v1285_v23  ;;  %v7647_v23 = vpack.c.bf16 %v2156_v22, %v2155_v21 }
 0x356   :  { %7622 = vmatpush3.bf16.msra.mxu1 %v7619_v48  ;;  %7633 = vmatpush3.bf16.msra.mxu0 %v7632_v29  ;;  %v7641_v48 = vpack.c.bf16 %v2152_v17, %v2151_v51 }
 0x357   :  { %7624 = vmatprep.subr.bf16.mxu1 %v7623_v24  ;;  %7634 = vmatprep.subr.bf16.mxu0 %v8212_v54 }
 0x358   :  { %6529 = vmatmul.mubr.f32.gmra.mrb[30].mxu1 %v1286_v49  ;;  %6609 = vmatmul.mubr.f32.gmra.mrb[92].mxu0 %v1286_v49  ;;  %v2159_v49 = vld [vmem:[#allocation8 + $0xf0] sm:$0xff] }
 0x359   :  { %6531 = vmatprep.mubr.f32.mxu1 %v1287_v52  ;;  %6611 = vmatprep.mubr.f32.mxu0 %v1287_v52  ;;  %v2160_v52 = vld [vmem:[#allocation8 + $0xf8] sm:$0xff] }
 0x35a   :  { %7626 = vmatpush3.bf16.msra.mxu1 %v7623_v24  ;;  %7636 = vmatpush3.bf16.msra.mxu0 %v7635_v43  ;;  %v2158_v24 = vld [vmem:[#allocation8 + $0xe8] sm:$0xff]  ;;  %v7653_v53 = vpack.c.bf16 %v2160_v52, %v2159_v49 }
 0x35b   :  { %7628 = vmatprep.subr.bf16.mxu1 %v7627_v41  ;;  %7637 = vmatprep.subr.bf16.mxu0 %v8212_v54  ;;  %v7650_v25 = vpack.c.bf16 %v2158_v24, %v2157_v50 }
 0x35c   :  { %6532 = vmatmul.mubr.f32.gmra.mrb[32].mxu1 %v1288_v60  ;;  %6612 = vmatmul.mubr.f32.gmra.mrb[94].mxu0 %v1288_v60  ;;  %v8835_v60 = vld [vmem:[%s9668_s1 + $0x1] ss:$0 sm:$0xff] }
 0x35d   :  { %6534 = vmatprep.mubr.f32.mxu1 %v1289_v58  ;;  %6614 = vmatprep.mubr.f32.mxu0 %v1289_v58 }
 0x35e   :  { %7630 = vmatpush3.bf16.msra.mxu1 %v7627_v41  ;;  %7639 = vmatpush3.bf16.msra.mxu0 %v7638_v45 }
 0x35f   :  { %7640 = vmatprep.subr.bf16.mxu0 %v8212_v54 }
 0x360   :  { %6535 = vmatmul.mubr.f32.gmra.mrb[34].mxu1 %v1290_v27  ;;  %6615 = vmatmul.mubr.f32.gmra.mrb[96].mxu0 %v1290_v27 }
 0x361   :  { %6537 = vmatprep.mubr.f32.mxu1 %v1291_v28  ;;  %6617 = vmatprep.mubr.f32.mxu0 %v1291_v28 }
 0x362   :  { %7642 = vmatpush3.bf16.msra.mxu0 %v7641_v48 }
 0x363   :  { %7643 = vmatprep.subr.bf16.mxu0 %v8212_v54 }
 0x364   :  { %6538 = vmatmul.mubr.f32.gmra.mrb[36].mxu1 %v1292_v31  ;;  %6618 = vmatmul.mubr.f32.gmra.mrb[98].mxu0 %v1292_v31 }
 0x365   :  { %6540 = vmatprep.mubr.f32.mxu1 %v1293_v62  ;;  %6620 = vmatprep.mubr.f32.mxu0 %v1293_v62 }
 0x366   :  { %7645 = vmatpush3.bf16.msra.mxu0 %v7644_v47 }
 0x367   :  { %7646 = vmatprep.subr.bf16.mxu0 %v8212_v54 }
 0x368   :  { %6541 = vmatmul.mubr.f32.gmra.mrb[38].mxu1 %v1294_v2  ;;  %6621 = vmatmul.mubr.f32.gmra.mrb[100].mxu0 %v1294_v2 }
 0x369   :  { %6543 = vmatprep.mubr.f32.mxu1 %v1295_v19  ;;  %6623 = vmatprep.mubr.f32.mxu0 %v1295_v19 }
 0x36a   :  { %7648 = vmatpush3.bf16.msra.mxu0 %v7647_v23 }
 0x36b   :  { %7649 = vmatprep.subr.bf16.mxu0 %v8212_v54 }
 0x36c   :  { %6544 = vmatmul.mubr.f32.gmra.mrb[40].mxu1 %v1296_v63  ;;  %6624 = vmatmul.mubr.f32.gmra.mrb[102].mxu0 %v1296_v63 }
 0x36d   :  { %6546 = vmatprep.mubr.f32.mxu1 %v1297_v4  ;;  %6626 = vmatprep.mubr.f32.mxu0 %v1297_v4 }
 0x36e   :  { %7651 = vmatpush3.bf16.msra.mxu0 %v7650_v25 }
 0x36f   :  { %7652 = vmatprep.subr.bf16.mxu0 %v8212_v54 }
 0x370   :  { %6547 = vmatmul.mubr.f32.gmra.mrb[42].mxu1 %v1298_v5  ;;  %6627 = vmatmul.mubr.f32.gmra.mrb[104].mxu0 %v1298_v5 }
 0x371   :  { %6549 = vmatprep.mubr.f32.mxu1 %v1299_v6  ;;  %6629 = vmatprep.mubr.f32.mxu0 %v1299_v6 }
 0x372   :  { %7654 = vmatpush3.bf16.msra.mxu0 %v7653_v53 }
 0x374   :  { %6550 = vmatmul.mubr.f32.gmra.mrb[44].mxu1 %v1300_v7  ;;  %6630 = vmatmul.mubr.f32.gmra.mrb[106].mxu0 %v1300_v7 }
 0x375   :  { %6552 = vmatprep.mubr.f32.mxu1 %v1301_v40  ;;  %6632 = vmatprep.mubr.f32.mxu0 %v1301_v40 }
 0x378   :  { %6553 = vmatmul.mubr.f32.gmra.mrb[46].mxu1 %v1302_v9  ;;  %6633 = vmatmul.mubr.f32.gmra.mrb[108].mxu0 %v1302_v9 }
 0x379   :  { %6555 = vmatprep.mubr.f32.mxu1 %v1303_v10  ;;  %6635 = vmatprep.mubr.f32.mxu0 %v1303_v10 }
 0x37c   :  { %6556 = vmatmul.mubr.f32.gmra.mrb[48].mxu1 %v1304_v11  ;;  %6636 = vmatmul.mubr.f32.gmra.mrb[110].mxu0 %v1304_v11 }
 0x37d   :  { %6750 = vmatprep.mubr.msk.f32.mxu0 %vm8213_vm1, %v8214_v12 }
 0x413   :  { %v6592_v57 = vpop.f32.mrb[80].mxu0 }
 0x414   :  { %v1675_v58 = vadd.f32 %v6592_v57, %v8835_v60  ;;  %v1669_v26 = vpop.f32.mrb[81].mxu0 }
 0x415   :  { %v1670_v27 = vadd.f32 %v8835_v60, %v1669_v26 }
 0x416   :  { %v1829_v32 = vmax.f32 %v1675_v58, 0.0 }
 0x417   :  { %v1828_v13 = vmax.f32 %v1670_v27, 0.0  ;;  %v6595_v28 = vpop.f32.mrb[82].mxu0 }
 0x418   :  { %v1685_v31 = vadd.f32 %v6595_v28, %v8835_v60  ;;  %v1679_v61 = vpop.f32.mrb[83].mxu0 }
 0x419   :  { %v1680_v62 = vadd.f32 %v8835_v60, %v1679_v61  ;;  %6670 = vmatprep.mubr.f32.mxu1 %v1828_v13 }
 0x41a   :  { %v1831_v1 = vmax.f32 %v1685_v31, 0.0  ;;  %6671 = vmatmul.mubr.f32.vlgmr.msra.gmra.mrb[50].mxu1 %v1829_v32 }
 0x41b   :  { %v1830_v2 = vmax.f32 %v1680_v62, 0.0  ;;  %v6598_v34 = vpop.f32.mrb[84].mxu0 }
 0x41c   :  { %v2103_v19 = vmax.f32 %v1829_v32, %v1831_v1  ;;  %v1695_v33 = vadd.f32 %v6598_v34, %v8835_v60  ;;  %v1689_v63 = vpop.f32.mrb[85].mxu0 }
 0x41d   :  { %v2102_v3 = vmax.f32 %v1828_v13, %v1830_v2  ;;  %v1690_v4 = vadd.f32 %v8835_v60, %v1689_v63  ;;  %6673 = vmatprep.mubr.f32.mxu1 %v1830_v2 }
 0x41e   :  { %v1833_v36 = vmax.f32 %v1695_v33, 0.0  ;;  %6674 = vmatmul.mubr.f32.gmra.mrb[52].mxu1 %v1831_v1 }
 0x41f   :  { %v1832_v5 = vmax.f32 %v1690_v4, 0.0  ;;  %v6601_v35 = vpop.f32.mrb[86].mxu0 }
 0x420   :  { %v2105_v6 = vmax.f32 %v2103_v19, %v1833_v36  ;;  %v1705_v38 = vadd.f32 %v6601_v35, %v8835_v60  ;;  %v1699_v7 = vpop.f32.mrb[87].mxu0 }
 0x421   :  { %v2104_v37 = vmax.f32 %v2102_v3, %v1832_v5  ;;  %v1700_v40 = vadd.f32 %v8835_v60, %v1699_v7  ;;  %6676 = vmatprep.mubr.f32.mxu1 %v1832_v5 }
 0x422   :  { %v1835_v8 = vmax.f32 %v1705_v38, 0.0  ;;  %6677 = vmatmul.mubr.f32.gmra.mrb[54].mxu1 %v1833_v36 }
 0x423   :  { %v1834_v9 = vmax.f32 %v1700_v40, 0.0  ;;  %v6604_v39 = vpop.f32.mrb[88].mxu0 }
 0x424   :  { %v2107_v10 = vmax.f32 %v2105_v6, %v1835_v8  ;;  %v1715_v11 = vadd.f32 %v6604_v39, %v8835_v60  ;;  %v1709_v14 = vpop.f32.mrb[89].mxu0 }
 0x425   :  { %v2106_v42 = vmax.f32 %v2104_v37, %v1834_v9  ;;  %v1710_v41 = vadd.f32 %v8835_v60, %v1709_v14  ;;  %6679 = vmatprep.mubr.f32.mxu1 %v1834_v9 }
 0x426   :  { %v1837_v15 = vmax.f32 %v1715_v11, 0.0  ;;  %6680 = vmatmul.mubr.f32.gmra.mrb[56].mxu1 %v1835_v8 }
 0x427   :  { %v1836_v16 = vmax.f32 %v1710_v41, 0.0  ;;  %v6607_v29 = vpop.f32.mrb[90].mxu0 }
 0x428   :  { %v2109_v0 = vmax.f32 %v2107_v10, %v1837_v15  ;;  %v1725_v44 = vadd.f32 %v6607_v29, %v8835_v60  ;;  %v1719_v43 = vpop.f32.mrb[91].mxu0 }
 0x429   :  { %v2108_v30 = vmax.f32 %v2106_v42, %v1836_v16  ;;  %v1720_v46 = vadd.f32 %v8835_v60, %v1719_v43  ;;  %6682 = vmatprep.mubr.f32.mxu1 %v1836_v16 }
 0x42a   :  { %v1839_v51 = vmax.f32 %v1725_v44, 0.0  ;;  %6683 = vmatmul.mubr.f32.gmra.mrb[58].mxu1 %v1837_v15 }
 0x42b   :  { %v1838_v45 = vmax.f32 %v1720_v46, 0.0  ;;  %v6610_v17 = vpop.f32.mrb[92].mxu0 }
 0x42c   :  { %v2111_v48 = vmax.f32 %v2109_v0, %v1839_v51  ;;  %v1735_v18 = vadd.f32 %v6610_v17, %v8835_v60  ;;  %v1729_v20 = vpop.f32.mrb[93].mxu0 }
 0x42d   :  { %v2110_v47 = vmax.f32 %v2108_v30, %v1838_v45  ;;  %v1730_v21 = vadd.f32 %v8835_v60, %v1729_v20  ;;  %6685 = vmatprep.mubr.f32.mxu1 %v1838_v45 }
 0x42e   :  { %v1841_v22 = vmax.f32 %v1735_v18, 0.0  ;;  %6686 = vmatmul.mubr.f32.gmra.mrb[60].mxu1 %v1839_v51 }
 0x42f   :  { %v1840_v23 = vmax.f32 %v1730_v21, 0.0  ;;  %v6613_v50 = vpop.f32.mrb[94].mxu0 }
 0x430   :  { %v2113_v24 = vmax.f32 %v2111_v48, %v1841_v22  ;;  %v1745_v49 = vadd.f32 %v6613_v50, %v8835_v60  ;;  %v1739_v25 = vpop.f32.mrb[95].mxu0 }
 0x431   :  { %v2112_v52 = vmax.f32 %v2110_v47, %v1840_v23  ;;  %v1740_v53 = vadd.f32 %v8835_v60, %v1739_v25  ;;  %6688 = vmatprep.mubr.f32.mxu1 %v1840_v23 }
 0x432   :  { %v1843_v57 = vmax.f32 %v1745_v49, 0.0  ;;  %6689 = vmatmul.mubr.f32.gmra.mrb[62].mxu1 %v1841_v22 }
 0x433   :  { %v1842_v58 = vmax.f32 %v1740_v53, 0.0  ;;  %v6616_v26 = vpop.f32.mrb[96].mxu0 }
 0x434   :  { %v2115_v27 = vmax.f32 %v2113_v24, %v1843_v57  ;;  %v1755_v13 = vadd.f32 %v6616_v26, %v8835_v60  ;;  %v1749_v28 = vpop.f32.mrb[97].mxu0 }
 0x435   :  { %v2114_v32 = vmax.f32 %v2112_v52, %v1842_v58  ;;  %v1750_v31 = vadd.f32 %v8835_v60, %v1749_v28  ;;  %6691 = vmatprep.mubr.f32.mxu1 %v1842_v58 }
 0x436   :  { %6692 = vmatmul.mubr.f32.gmra.mrb[64].mxu1 %v1843_v57  ;;  %v1845_v2 = vmax.f32 %v1755_v13, 0.0 }
 0x437   :  { %v8855_v61 = vmax.f32 %v2114_v32, %v2115_v27  ;;  %v1844_v62 = vmax.f32 %v1750_v31, 0.0  ;;  %v6619_v1 = vpop.f32.mrb[98].mxu0 }
 0x438   :  { %v1765_v34 = vadd.f32 %v6619_v1, %v8835_v60  ;;  %v1759_v19 = vpop.f32.mrb[99].mxu0 }
 0x439   :  { %v1760_v33 = vadd.f32 %v8835_v60, %v1759_v19  ;;  %6694 = vmatprep.mubr.f32.mxu1 %v1844_v62  ;;  %v2117_v52 = vrot.slane %v8855_v61, 4 }
 0x43a   :  { %v1847_v63 = vmax.f32 %v1765_v34, 0.0  ;;  %6695 = vmatmul.mubr.f32.gmra.mrb[66].mxu1 %v1845_v2 }
 0x43b   :  { %v1846_v3 = vmax.f32 %v1760_v33, 0.0  ;;  %v6622_v4 = vpop.f32.mrb[100].mxu0  ;;  %v2118_v31 = vmax.f32 %v8855_v61, %v2117_v52  ;;  %v2373_v61 = vld [vmem:[#allocation9 + $0x80] sm:$0xff]  ;;  %v2722_v52 = vld [vmem:[#allocation3 + $0x158] sm:$0xff] }
 0x43c   :  { %v2124_v36 = vmax.f32 %v1845_v2, %v1847_v63  ;;  %v1775_v5 = vadd.f32 %v6622_v4, %v8835_v60  ;;  %v1769_v35 = vpop.f32.mrb[101].mxu0 }
 0x43d   :  { %v2123_v6 = vmax.f32 %v1844_v62, %v1846_v3  ;;  %v1770_v38 = vadd.f32 %v8835_v60, %v1769_v35  ;;  %6697 = vmatprep.mubr.f32.mxu1 %v1846_v3  ;;  %v2119_v34 = vrot.slane %v2118_v31, 2 }
 0x43e   :  { %v1849_v7 = vmax.f32 %v1775_v5, 0.0  ;;  %6698 = vmatmul.mubr.f32.gmra.mrb[68].mxu1 %v1847_v63 }
 0x43f   :  { %v1848_v37 = vmax.f32 %v1770_v38, 0.0  ;;  %v6625_v40 = vpop.f32.mrb[102].mxu0  ;;  %v2120_v63 = vmax.f32 %v2118_v31, %v2119_v34  ;;  %v2388_v31 = vld [vmem:[#allocation9 + $0xf8] sm:$0xff] }
 0x440   :  { %v2126_v8 = vmax.f32 %v2124_v36, %v1849_v7  ;;  %v1785_v9 = vadd.f32 %v6625_v40, %v8835_v60  ;;  %v1779_v39 = vpop.f32.mrb[103].mxu0 }
 0x441   :  { %v2125_v10 = vmax.f32 %v2123_v6, %v1848_v37  ;;  %v1780_v11 = vadd.f32 %v8835_v60, %v1779_v39  ;;  %6700 = vmatprep.mubr.f32.mxu1 %v1848_v37  ;;  %v2121_v36 = vrot.slane %v2120_v63, 1  ;;  %v2711_v37 = vld [vmem:[#allocation3 + $0x100] sm:$0xff]  ;;  %v2375_v39 = vld [vmem:[#allocation9 + $0x90] sm:$0xff] }
 0x442   :  { %v1851_v14 = vmax.f32 %v1785_v9, 0.0  ;;  %6701 = vmatmul.mubr.f32.gmra.mrb[70].mxu1 %v1849_v7  ;;  %v2374_v7 = vld [vmem:[#allocation9 + $0x88] sm:$0xff] }
 0x443   :  { %v1850_v42 = vmax.f32 %v1780_v11, 0.0  ;;  %v6628_v41 = vpop.f32.mrb[104].mxu0  ;;  %v7655_v40 = vpack.c.bf16 %v2374_v7, %v2373_v61  ;;  %v2713_v11 = vld [vmem:[#allocation3 + $0x110] sm:$0xff]  ;;  %v2993_v7 = vld [vmem:[#allocation6 + $0x100] sm:$0xff] }
 0x444   :  { %v2128_v15 = vmax.f32 %v2126_v8, %v1851_v14  ;;  %v1795_v16 = vadd.f32 %v6628_v41, %v8835_v60  ;;  %v1789_v29 = vpop.f32.mrb[105].mxu0  ;;  %v2712_v8 = vld [vmem:[#allocation3 + $0x108] sm:$0xff]  ;;  %v2377_v41 = vld [vmem:[#allocation9 + $0xa0] sm:$0xff] }
 0x445   :  { %v2127_v0 = vmax.f32 %v2125_v10, %v1850_v42  ;;  %v1790_v44 = vadd.f32 %v8835_v60, %v1789_v29  ;;  %6703 = vmatprep.mubr.f32.mxu1 %v1850_v42  ;;  %v7687_v9 = vpack.c.bf16 %v2712_v8, %v2711_v37  ;;  %7656 = vmatprep.subr.bf16.mxu1 %v7655_v40  ;;  %v2376_v10 = vld [vmem:[#allocation9 + $0x98] sm:$0xff]  ;;  %v2994_v37 = vld [vmem:[#allocation6 + $0x108] sm:$0xff] }
 0x446   :  { %v1853_v43 = vmax.f32 %v1795_v16, 0.0  ;;  %6704 = vmatmul.mubr.f32.gmra.mrb[72].mxu1 %v1851_v14  ;;  %v7659_v14 = vpack.c.bf16 %v2376_v10, %v2375_v39  ;;  %v2714_v42 = vld [vmem:[#allocation3 + $0x118] sm:$0xff] }
 0x447   :  { %v1852_v30 = vmax.f32 %v1790_v44, 0.0  ;;  %v6631_v46 = vpop.f32.mrb[106].mxu0  ;;  %7688 = vmatprep.subr.bf16.mxu0 %v7687_v9  ;;  %7658 = vmatpush3.bf16.msra.mxu1 %v7655_v40  ;;  %v7691_v16 = vpack.c.bf16 %v2714_v42, %v2713_v11  ;;  %v2716_v44 = vld [vmem:[#allocation3 + $0x128] sm:$0xff]  ;;  %v8875_v40 = vpack.c.bf16 %v2994_v37, %v2993_v7  ;;  %v2997_v37 = vld [vmem:[#allocation6 + $0x120] sm:$0xff] }
 0x448   :  { %v2130_v51 = vmax.f32 %v2128_v15, %v1853_v43  ;;  %v1805_v45 = vadd.f32 %v6631_v46, %v8835_v60  ;;  %v1799_v17 = vpop.f32.mrb[107].mxu0  ;;  %v2378_v15 = vld [vmem:[#allocation9 + $0xa8] sm:$0xff]  ;;  %7660 = vmatprep.subr.bf16.mxu1 %v7659_v14  ;;  %v2380_v46 = vld [vmem:[#allocation9 + $0xb8] sm:$0xff] }
 0x449   :  { %v2129_v48 = vmax.f32 %v2127_v0, %v1852_v30  ;;  %v1800_v18 = vadd.f32 %v8835_v60, %v1799_v17  ;;  %6706 = vmatprep.mubr.f32.mxu1 %v1852_v30  ;;  %v7663_v29 = vpack.c.bf16 %v2378_v15, %v2377_v41  ;;  %v2715_v0 = vld [vmem:[#allocation3 + $0x120] sm:$0xff] }
 0x44a   :  { %v1855_v20 = vmax.f32 %v1805_v45, 0.0  ;;  %6707 = vmatmul.mubr.f32.gmra.mrb[74].mxu1 %v1853_v43  ;;  %v2379_v43 = vld [vmem:[#allocation9 + $0xb0] sm:$0xff]  ;;  %v7695_v30 = vpack.c.bf16 %v2716_v44, %v2715_v0  ;;  %v2718_v45 = vld [vmem:[#allocation3 + $0x138] sm:$0xff] }
 0x44b   :  { %v1854_v47 = vmax.f32 %v1800_v18, 0.0  ;;  %v6634_v21 = vpop.f32.mrb[108].mxu0  ;;  %7662 = vmatpush3.bf16.msra.mxu1 %v7659_v14  ;;  %v7667_v17 = vpack.c.bf16 %v2380_v46, %v2379_v43  ;;  %v2381_v18 = vld [vmem:[#allocation9 + $0xc0] sm:$0xff] }
 0x44c   :  { %v2132_v22 = vmax.f32 %v2130_v51, %v1855_v20  ;;  %v1815_v23 = vadd.f32 %v6634_v21, %v8835_v60  ;;  %v1809_v50 = vpop.f32.mrb[109].mxu0  ;;  %v2717_v51 = vld [vmem:[#allocation3 + $0x130] sm:$0xff]  ;;  %7664 = vmatprep.subr.bf16.mxu1 %v7663_v29  ;;  %v2720_v21 = vld [vmem:[#allocation3 + $0x148] sm:$0xff] }
 0x44d   :  { %v2131_v24 = vmax.f32 %v2129_v48, %v1854_v47  ;;  %v1810_v49 = vadd.f32 %v8835_v60, %v1809_v50  ;;  %6709 = vmatprep.mubr.f32.mxu1 %v1854_v47  ;;  %v7699_v48 = vpack.c.bf16 %v2718_v45, %v2717_v51  ;;  %v2719_v47 = vld [vmem:[#allocation3 + $0x140] sm:$0xff]  ;;  %v2383_v50 = vld [vmem:[#allocation9 + $0xd0] sm:$0xff] }
 0x44e   :  { %v1857_v25 = vmax.f32 %v1815_v23, 0.0  ;;  %6710 = vmatmul.mubr.f32.gmra.mrb[76].mxu1 %v1855_v20  ;;  %v2382_v20 = vld [vmem:[#allocation9 + $0xc8] sm:$0xff]  ;;  %v7703_v23 = vpack.c.bf16 %v2720_v21, %v2719_v47 }
 0x44f   :  { %v1856_v53 = vmax.f32 %v1810_v49, 0.0  ;;  %v6637_v57 = vpop.f32.mrb[110].mxu0  ;;  %7666 = vmatpush3.bf16.msra.mxu1 %v7663_v29  ;;  %v2721_v49 = vld [vmem:[#allocation3 + $0x150] sm:$0xff] }
 0x450   :  { %v2134_v58 = vmax.f32 %v2132_v22, %v1857_v25  ;;  %v1825_v26 = vadd.f32 %v6637_v57, %v8835_v60  ;;  %v1819_v27 = vpop.f32.mrb[111].mxu0  ;;  %7668 = vmatprep.subr.bf16.mxu1 %v7667_v17  ;;  %v7671_v22 = vpack.c.bf16 %v2382_v20, %v2381_v18  ;;  %v2386_v57 = vld [vmem:[#allocation9 + $0xe8] sm:$0xff] }
 0x451   :  { %v2133_v13 = vmax.f32 %v2131_v24, %v1856_v53  ;;  %v1820_v28 = vadd.f32 %v8835_v60, %v1819_v27  ;;  %6712 = vmatprep.mubr.f32.mxu1 %v1856_v53  ;;  %v2122_v60 = vmax.f32 %v2120_v63, %v2121_v36  ;;  %v2384_v24 = vld [vmem:[#allocation9 + $0xd8] sm:$0xff]  ;;  %v2385_v53 = vld [vmem:[#allocation9 + $0xe0] sm:$0xff] }
 0x452   :  { %v1859_v32 = vmax.f32 %v1825_v26, 0.0  ;;  %6713 = vmatmul.mubr.f32.gmra.mrb[78].mxu1 %v1857_v25  ;;  %v7675_v25 = vpack.c.bf16 %v2384_v24, %v2383_v50  ;;  %v7679_v26 = vpack.c.bf16 %v2386_v57, %v2385_v53  ;;  %v2723_v27 = vld [vmem:[#allocation3 + $0x160] sm:$0xff] }
 0x453   :  { %v1858_v62 = vmax.f32 %v1820_v28, 0.0  ;;  %7670 = vmatpush3.bf16.msra.mxu1 %v7667_v17  ;;  %v2387_v28 = vld [vmem:[#allocation9 + $0xf0] sm:$0xff] }
 0x454   :  { %v2136_v1 = vmax.f32 %v2134_v58, %v1859_v32  ;;  %7672 = vmatprep.subr.bf16.mxu1 %v7671_v22  ;;  %v7707_v58 = vpack.c.bf16 %v2722_v52, %v2721_v49 }
 0x455   :  { %v2135_v2 = vmax.f32 %v2133_v13, %v1858_v62  ;;  %6715 = vmatprep.mubr.f32.mxu1 %v1858_v62  ;;  %v2724_v13 = vld [vmem:[#allocation3 + $0x168] sm:$0xff]  ;;  %v2725_v62 = vld [vmem:[#allocation3 + $0x170] sm:$0xff] }
 0x456   :  { %6716 = vmatmul.mubr.f32.gmra.mrb[80].mxu1 %v1859_v32  ;;  %v7711_v32 = vpack.c.bf16 %v2724_v13, %v2723_v27 }
 0x457   :  { %v2137_v19 = vmax.f32 %v2135_v2, %v2136_v1  ;;  %7674 = vmatpush3.bf16.msra.mxu1 %v7671_v22  ;;  %v2726_v1 = vld [vmem:[#allocation3 + $0x178] sm:$0xff]  ;;  %v7683_v2 = vpack.c.bf16 %v2388_v31, %v2387_v28 }
 0x458   :  { %7676 = vmatprep.subr.bf16.mxu1 %v7675_v25  ;;  %v7715_v34 = vpack.c.bf16 %v2726_v1, %v2725_v62  ;;  %v2996_v31 = vld [vmem:[#allocation6 + $0x118] sm:$0xff] }
 0x459   :  { %v2138_v33 = vrot.slane %v2137_v19, 4 }
 0x45b   :  { %v2139_v3 = vmax.f32 %v2137_v19, %v2138_v33  ;;  %7678 = vmatpush3.bf16.msra.mxu1 %v7675_v25 }
 0x45c   :  { %7680 = vmatprep.subr.bf16.mxu1 %v7679_v26 }
 0x45d   :  { %v2140_v4 = vrot.slane %v2139_v3, 2 }
 0x45f   :  { %v2141_v5 = vmax.f32 %v2139_v3, %v2140_v4  ;;  %7682 = vmatpush3.bf16.msra.mxu1 %v7679_v26 }
 0x460   :  { %7684 = vmatprep.subr.bf16.mxu1 %v7683_v2 }
 0x461   :  { %v2142_v35 = vrot.slane %v2141_v5, 1 }
 0x463   :  { %v2143_v6 = vmax.f32 %v2141_v5, %v2142_v35  ;;  %7686 = vmatpush3.bf16.msra.mxu1 %v7683_v2 }
 0x464   :  { %7751 = vmatprep.subr.bf16.mxu1 %v8212_v54 }
 0x465   :  { %v2163_v38 = vsel %vm1096_vm2, %v2143_v6, %v2122_v60 }
 0x466   :  { %6751 = vmatmul.mubr.f32.vlgmr.msra.gmra.mrb[112].mxu0 %v2163_v38 }
 0x467   :  { %7690 = vmatpush3.bf16.msra.mxu0 %v7687_v9 }
 0x468   :  { %7692 = vmatprep.subr.bf16.mxu0 %v7691_v16 }
 0x46b   :  { %7694 = vmatpush3.bf16.msra.mxu0 %v7691_v16 }
 0x46c   :  { %7696 = vmatprep.subr.bf16.mxu0 %v7695_v30 }
 0x46f   :  { %7698 = vmatpush3.bf16.msra.mxu0 %v7695_v30 }
 0x470   :  { %7700 = vmatprep.subr.bf16.mxu0 %v7699_v48 }
 0x473   :  { %7702 = vmatpush3.bf16.msra.mxu0 %v7699_v48 }
 0x474   :  { %7704 = vmatprep.subr.bf16.mxu0 %v7703_v23 }
 0x477   :  { %7706 = vmatpush3.bf16.msra.mxu0 %v7703_v23  ;;  %v8918_v23 = vld [vmem:[%s9640_s7 + $0x1] ss:$0 sm:$0xff] }
 0x478   :  { %7708 = vmatprep.subr.bf16.mxu0 %v7707_v58 }
 0x47b   :  { %7710 = vmatpush3.bf16.msra.mxu0 %v7707_v58 }
 0x47c   :  { %7712 = vmatprep.subr.bf16.mxu0 %v7711_v32 }
 0x47f   :  { %7714 = vmatpush3.bf16.msra.mxu0 %v7711_v32  ;;  %v2995_v32 = vld [vmem:[#allocation6 + $0x110] sm:$0xff] }
 0x480   :  { %7716 = vmatprep.subr.bf16.mxu0 %v7715_v34 }
 0x483   :  { %7718 = vmatpush3.bf16.msra.mxu0 %v7715_v34 }
 0x484   :  { %7720 = vmatprep.subr.bf16.mxu0 %v8875_v40 }
 0x4ed   :  { %v6672_v19 = vpop.f32.mrb[50].mxu1 }
 0x4ee   :  { %v1943_v33 = vpop.f32.mrb[51].mxu1 }
 0x4f1   :  { %v6675_v63 = vpop.f32.mrb[52].mxu1 }
 0x4f2   :  { %v1953_v3 = vpop.f32.mrb[53].mxu1 }
 0x4f5   :  { %v6678_v4 = vpop.f32.mrb[54].mxu1 }
 0x4f6   :  { %v1963_v36 = vpop.f32.mrb[55].mxu1 }
 0x4f9   :  { %v6681_v5 = vpop.f32.mrb[56].mxu1 }
 0x4fa   :  { %v1973_v35 = vpop.f32.mrb[57].mxu1 }
 0x4fd   :  { %v6684_v60 = vpop.f32.mrb[58].mxu1 }
 0x4fe   :  { %v1983_v6 = vpop.f32.mrb[59].mxu1 }
 0x501   :  { %v6687_v38 = vpop.f32.mrb[60].mxu1 }
 0x502   :  { %v1993_v61 = vpop.f32.mrb[61].mxu1 }
 0x505   :  { %v6690_v8 = vpop.f32.mrb[62].mxu1 }
 0x506   :  { %v2003_v9 = vpop.f32.mrb[63].mxu1 }
 0x509   :  { %v8878_v39 = vpop.f32.mrb[64].mxu1 }
 0x50a   :  { %v2013_v10 = vpop.f32.mrb[65].mxu1 }
 0x50d   :  { %v8880_v11 = vpop.f32.mrb[66].mxu1 }
 0x50e   :  { %v8882_v14 = vpop.f32.mrb[67].mxu1 }
 0x511   :  { %v8884_v42 = vpop.f32.mrb[68].mxu1 }
 0x512   :  { %v8886_v41 = vpop.f32.mrb[69].mxu1 }
 0x515   :  { %v8888_v15 = vpop.f32.mrb[70].mxu1 }
 0x516   :  { %v8890_v16 = vpop.f32.mrb[71].mxu1 }
 0x519   :  { %v8892_v29 = vpop.f32.mrb[72].mxu1 }
 0x51a   :  { %v8894_v0 = vpop.f32.mrb[73].mxu1 }
 0x51d   :  { %v8896_v44 = vpop.f32.mrb[74].mxu1 }
 0x51e   :  { %v8898_v43 = vpop.f32.mrb[75].mxu1 }
 0x521   :  { %v8900_v30 = vpop.f32.mrb[76].mxu1 }
 0x522   :  { %v8902_v46 = vpop.f32.mrb[77].mxu1 }
 0x525   :  { %v8904_v51 = vpop.f32.mrb[78].mxu1 }
 0x526   :  { %v8906_v45 = vpop.f32.mrb[79].mxu1 }
 0x529   :  { %v8908_v17 = vpop.f32.mrb[80].mxu1 }
 0x52a   :  { %v8910_v48 = vpop.f32.mrb[81].mxu1 }
 0x539   :  { %v2231_v18 = vpop.f32.mrb[112].mxu0 }
 0x53a   :  { %v2242_v20 = vrot.slane %v2231_v18, %v8671_v56  ;;  %v6752_v47 = vpop.f32.mrb[113].mxu0  ;;  %v2998_v18 = vld [vmem:[#allocation6 + $0x128] sm:$0xff] }
 0x53c   :  { %v2250_v21 = vrot.slane %v2242_v20, %v8671_v56  ;;  %v2243_v50 = vcombine.high %v2242_v20, %v2242_v20 }
 0x53e   :  { %v2261_v22 = vrot.slane %v2250_v21, %v8675_v59  ;;  %v2257_v62 = vrot.slane %v2243_v50, %v8671_v56  ;;  %v2999_v21 = vld [vmem:[#allocation6 + $0x130] sm:$0xff]  ;;  %v3000_v50 = vld [vmem:[#allocation6 + $0x138] sm:$0xff] }
 0x540   :  { %v2268_v24 = vadd.f32 %v2261_v22, %v1943_v33  ;;  %v2269_v49 = vadd.f32 %v6672_v19, %v2261_v22  ;;  %v2270_v25 = vadd.f32 %v2261_v22, %v1953_v3  ;;  %v2271_v52 = vadd.f32 %v6675_v63, %v2261_v22 }
 0x541   :  { %v2272_v53 = vadd.f32 %v2261_v22, %v1963_v36  ;;  %v2273_v57 = vadd.f32 %v6678_v4, %v2261_v22  ;;  %v2274_v58 = vadd.f32 %v2261_v22, %v1973_v35  ;;  %v2275_v28 = vadd.f32 %v6681_v5, %v2261_v22 }
 0x542   :  { %v2308_v26 = vadd.f32 %v8918_v23, %v2268_v24  ;;  %v2309_v27 = vadd.f32 %v8918_v23, %v2269_v49  ;;  %v2310_v13 = vadd.f32 %v8918_v23, %v2270_v25  ;;  %v2311_v34 = vadd.f32 %v8918_v23, %v2271_v52 }
 0x543   :  { %v2312_v19 = vadd.f32 %v8918_v23, %v2272_v53  ;;  %v7723_v33 = vpack.c.bf16 %v2996_v31, %v2995_v32  ;;  %v2276_v3 = vadd.f32 %v2261_v22, %v1983_v6  ;;  %v2277_v4 = vadd.f32 %v6684_v60, %v2261_v22  ;;  %v3003_v31 = vld [vmem:[#allocation6 + $0x150] sm:$0xff] }
 0x544   :  { %v2340_v1 = vmax.f32 %v2308_v26, 0.0  ;;  %v2341_v2 = vmax.f32 %v2309_v27, 0.0  ;;  %v2342_v63 = vmax.f32 %v2310_v13, 0.0  ;;  %v2278_v36 = vadd.f32 %v2261_v22, %v1993_v61 }
 0x545   :  { %v8926_v5 = vadd.f32 %v6687_v38, %v2261_v22  ;;  %v8928_v35 = vadd.f32 %v2261_v22, %v2003_v9  ;;  %v8930_v7 = vadd.f32 %v6690_v8, %v2261_v22  ;;  %v8933_v20 = vrot.slane %v2257_v62, %v8675_v59  ;;  %v3004_v62 = vld [vmem:[#allocation6 + $0x158] sm:$0xff] }
 0x546   :  { %6785 = vmatprep.mubr.f32.mxu1 %v2340_v1  ;;  %6865 = vmatprep.mubr.f32.mxu0 %v2340_v1  ;;  %v2343_v47 = vmax.f32 %v2311_v34, 0.0  ;;  %v2313_v6 = vadd.f32 %v8918_v23, %v2273_v57  ;;  %v8936_v60 = vadd.f32 %v2261_v22, %v2013_v10  ;;  %v2344_v38 = vmax.f32 %v2312_v19, 0.0  ;;  %v3002_v57 = vld [vmem:[#allocation6 + $0x148] sm:$0xff] }
 0x547   :  { %6786 = vmatmul.mubr.f32.vlgmr.msra.gmra.mrb[18].mxu1 %v2341_v2  ;;  %6866 = vmatmul.mubr.f32.vlgmr.msra.gmra.mrb[114].mxu0 %v2341_v2  ;;  %v2314_v61 = vadd.f32 %v8918_v23, %v2274_v58  ;;  %v8941_v8 = vadd.f32 %v8878_v39, %v2261_v22  ;;  %v7727_v9 = vpack.c.bf16 %v2998_v18, %v2997_v37 }
 0x548   :  { %6788 = vmatprep.mubr.f32.mxu1 %v2342_v63  ;;  %6868 = vmatprep.mubr.f32.mxu0 %v2342_v63  ;;  %v2315_v24 = vadd.f32 %v8918_v23, %v2275_v28  ;;  %v8946_v10 = vadd.f32 %v8933_v20, %v8882_v14  ;;  %v2345_v39 = vmax.f32 %v2313_v6, 0.0  ;;  %v8954_v22 = vadd.f32 %v8933_v20, %v8886_v41  ;;  %v3001_v41 = vld [vmem:[#allocation6 + $0x140] sm:$0xff] }
 0x549   :  { %7722 = vmatpush3.bf16.msra.mxu0 %v8875_v40  ;;  %v8950_v40 = vadd.f32 %v8880_v11, %v8933_v20  ;;  %v8958_v49 = vadd.f32 %v8884_v42, %v8933_v20  ;;  %v8962_v25 = vadd.f32 %v8933_v20, %v8890_v16  ;;  %v2346_v14 = vmax.f32 %v2314_v61, 0.0 }
 0x54a   :  { %7724 = vmatprep.subr.bf16.mxu0 %v7723_v33  ;;  %v2316_v52 = vadd.f32 %v8918_v23, %v2276_v3  ;;  %v8967_v11 = vadd.f32 %v8888_v15, %v8933_v20  ;;  %v7731_v53 = vpack.c.bf16 %v3000_v50, %v2999_v21  ;;  %v8971_v42 = vadd.f32 %v8933_v20, %v8894_v0 }
 0x54b   :  { %6789 = vmatmul.mubr.f32.gmra.mrb[20].mxu1 %v2343_v47  ;;  %6869 = vmatmul.mubr.f32.gmra.mrb[116].mxu0 %v2343_v47  ;;  %v2347_v16 = vmax.f32 %v2315_v24, 0.0  ;;  %v2317_v58 = vadd.f32 %v8918_v23, %v2277_v4  ;;  %v8976_v26 = vadd.f32 %v8892_v29, %v8933_v20  ;;  %v7735_v15 = vpack.c.bf16 %v3002_v57, %v3001_v41 }
 0x54c   :  { %6791 = vmatprep.mubr.f32.mxu1 %v2344_v38  ;;  %6871 = vmatprep.mubr.f32.mxu0 %v2344_v38  ;;  %v2348_v27 = vmax.f32 %v2316_v52, 0.0  ;;  %v2318_v13 = vadd.f32 %v8918_v23, %v2278_v36  ;;  %v8981_v28 = vadd.f32 %v8933_v20, %v8898_v43  ;;  %v8985_v0 = vadd.f32 %v8896_v44, %v8933_v20 }
 0x54d   :  { %7726 = vmatpush3.bf16.msra.mxu0 %v7723_v33  ;;  %v8989_v29 = vadd.f32 %v8933_v20, %v8902_v46  ;;  %v8993_v32 = vadd.f32 %v8900_v30, %v8933_v20  ;;  %v8997_v43 = vadd.f32 %v8933_v20, %v8906_v45  ;;  %v2349_v44 = vmax.f32 %v2317_v58, 0.0  ;;  %v3005_v33 = vld [vmem:[#allocation6 + $0x160] sm:$0xff] }
 0x54e   :  { %7728 = vmatprep.subr.bf16.mxu0 %v7727_v9  ;;  %v2319_v1 = vadd.f32 %v8918_v23, %v8926_v5  ;;  %v9003_v46 = vadd.f32 %v8904_v51, %v8933_v20  ;;  %v2350_v2 = vmax.f32 %v2318_v13, 0.0  ;;  %v2320_v30 = vadd.f32 %v8918_v23, %v8928_v35  ;;  %v3006_v51 = vld [vmem:[#allocation6 + $0x168] sm:$0xff] }
 0x54f   :  { %6792 = vmatmul.mubr.f32.gmra.mrb[22].mxu1 %v2345_v39  ;;  %6872 = vmatmul.mubr.f32.gmra.mrb[118].mxu0 %v2345_v39  ;;  %v9009_v34 = vadd.f32 %v8933_v20, %v8910_v48  ;;  %v7739_v45 = vpack.c.bf16 %v3004_v62, %v3003_v31  ;;  %v9013_v19 = vadd.f32 %v8908_v17, %v8933_v20  ;;  %v3278_v31 = vld [vmem:[#allocation8 + $0x108] sm:$0xff] }
 0x550   :  { %6794 = vmatprep.mubr.f32.mxu1 %v2346_v14  ;;  %6874 = vmatprep.mubr.f32.mxu0 %v2346_v14  ;;  %v2351_v63 = vmax.f32 %v2319_v1, 0.0  ;;  %v2321_v3 = vadd.f32 %v8918_v23, %v8930_v7  ;;  %v2352_v4 = vmax.f32 %v2320_v30, 0.0  ;;  %v2322_v48 = vadd.f32 %v8918_v23, %v8936_v60  ;;  %v3281_v1 = vld [vmem:[#allocation8 + $0x120] sm:$0xff] }
 0x551   :  { %7730 = vmatpush3.bf16.msra.mxu0 %v7727_v9  ;;  %v7743_v36 = vpack.c.bf16 %v3006_v51, %v3005_v33  ;;  %v2323_v5 = vadd.f32 %v8918_v23, %v8941_v8  ;;  %v2324_v7 = vadd.f32 %v8918_v23, %v8946_v10  ;;  %v2325_v18 = vadd.f32 %v8918_v23, %v8950_v40  ;;  %v3286_v33 = vld [vmem:[#allocation8 + $0x148] sm:$0xff] }
 0x552   :  { %7732 = vmatprep.subr.bf16.mxu0 %v7731_v53  ;;  %v2353_v17 = vmax.f32 %v2321_v3, 0.0  ;;  %v2354_v35 = vmax.f32 %v2322_v48, 0.0  ;;  %v2326_v47 = vadd.f32 %v8918_v23, %v8954_v22  ;;  %v2327_v60 = vadd.f32 %v8918_v23, %v8958_v49  ;;  %v3288_v3 = vld [vmem:[#allocation8 + $0x158] sm:$0xff]  ;;  %v3289_v48 = vld [vmem:[#allocation8 + $0x160] sm:$0xff] }
 0x553   :  { %6795 = vmatmul.mubr.f32.gmra.mrb[24].mxu1 %v2347_v16  ;;  %6875 = vmatmul.mubr.f32.gmra.mrb[120].mxu0 %v2347_v16  ;;  %v2355_v37 = vmax.f32 %v2323_v5, 0.0  ;;  %v2356_v20 = vmax.f32 %v2324_v7, 0.0  ;;  %v2357_v6 = vmax.f32 %v2325_v18, 0.0  ;;  %v2328_v61 = vadd.f32 %v8918_v23, %v8962_v25 }
 0x554   :  { %6797 = vmatprep.mubr.f32.mxu1 %v2348_v27  ;;  %6877 = vmatprep.mubr.f32.mxu0 %v2348_v27  ;;  %v2358_v38 = vmax.f32 %v2326_v47, 0.0  ;;  %v2359_v8 = vmax.f32 %v2327_v60, 0.0  ;;  %v2329_v9 = vadd.f32 %v8918_v23, %v8967_v11  ;;  %v2330_v50 = vadd.f32 %v8918_v23, %v8971_v42 }
 0x555   :  { %7734 = vmatpush3.bf16.msra.mxu0 %v7731_v53  ;;  %v2360_v21 = vmax.f32 %v2328_v61, 0.0  ;;  %v2331_v10 = vadd.f32 %v8918_v23, %v8976_v26  ;;  %v2332_v39 = vadd.f32 %v8918_v23, %v8981_v28  ;;  %v2333_v49 = vadd.f32 %v8918_v23, %v8985_v0  ;;  %v3007_v28 = vld [vmem:[#allocation6 + $0x170] sm:$0xff]  ;;  %v3008_v0 = vld [vmem:[#allocation6 + $0x178] sm:$0xff] }
 0x556   :  { %7736 = vmatprep.subr.bf16.mxu0 %v7735_v15  ;;  %v2361_v24 = vmax.f32 %v2329_v9, 0.0  ;;  %v2362_v40 = vmax.f32 %v2330_v50, 0.0  ;;  %v2334_v14 = vadd.f32 %v8918_v23, %v8989_v29  ;;  %v2335_v11 = vadd.f32 %v8918_v23, %v8993_v32  ;;  %v3277_v32 = vld [vmem:[#allocation8 + $0x100] sm:$0xff] }
 0x557   :  { %6798 = vmatmul.mubr.f32.gmra.mrb[26].mxu1 %v2349_v44  ;;  %6878 = vmatmul.mubr.f32.gmra.mrb[122].mxu0 %v2349_v44  ;;  %v2363_v22 = vmax.f32 %v2331_v10, 0.0  ;;  %v2364_v25 = vmax.f32 %v2332_v39, 0.0  ;;  %v2365_v52 = vmax.f32 %v2333_v49, 0.0  ;;  %v2336_v41 = vadd.f32 %v8918_v23, %v8997_v43  ;;  %v3280_v43 = vld [vmem:[#allocation8 + $0x118] sm:$0xff] }
 0x558   :  { %6800 = vmatprep.mubr.f32.mxu1 %v2350_v2  ;;  %6880 = vmatprep.mubr.f32.mxu0 %v2350_v2  ;;  %v2366_v53 = vmax.f32 %v2334_v14, 0.0  ;;  %v2367_v57 = vmax.f32 %v2335_v11, 0.0  ;;  %v2337_v42 = vadd.f32 %v8918_v23, %v9003_v46  ;;  %v2338_v58 = vadd.f32 %v8918_v23, %v9009_v34  ;;  %v3282_v46 = vld [vmem:[#allocation8 + $0x128] sm:$0xff]  ;;  %v3283_v2 = vld [vmem:[#allocation8 + $0x130] sm:$0xff]  ;;  %v3284_v34 = vld [vmem:[#allocation8 + $0x138] sm:$0xff] }
 0x559   :  { %7738 = vmatpush3.bf16.msra.mxu0 %v7735_v15  ;;  %v2368_v16 = vmax.f32 %v2336_v41, 0.0  ;;  %v2339_v15 = vadd.f32 %v8918_v23, %v9013_v19  ;;  %v7747_v29 = vpack.c.bf16 %v3008_v0, %v3007_v28  ;;  %v7752_v62 = vpack.c.bf16 %v3278_v31, %v3277_v32  ;;  %v3279_v23 = vld [vmem:[#allocation8 + $0x110] sm:$0xff]  ;;  %v3285_v19 = vld [vmem:[#allocation8 + $0x140] sm:$0xff] }
 0x55a   :  { %7740 = vmatprep.subr.bf16.mxu0 %v7739_v45  ;;  %v2369_v26 = vmax.f32 %v2337_v42, 0.0  ;;  %v2370_v27 = vmax.f32 %v2338_v58, 0.0  ;;  %v7755_v44 = vpack.c.bf16 %v3280_v43, %v3279_v23  ;;  %v7758_v30 = vpack.c.bf16 %v3282_v46, %v3281_v1 }
 0x55b   :  { %6801 = vmatmul.mubr.f32.gmra.mrb[28].mxu1 %v2351_v63  ;;  %6881 = vmatmul.mubr.f32.gmra.mrb[124].mxu0 %v2351_v63  ;;  %v2371_v13 = vmax.f32 %v2339_v15, 0.0  ;;  %v7764_v51 = vpack.c.bf16 %v3286_v33, %v3285_v19  ;;  %v3287_v63 = vld [vmem:[#allocation8 + $0x150] sm:$0xff] }
 0x55c   :  { %6803 = vmatprep.mubr.f32.mxu1 %v2352_v4  ;;  %6883 = vmatprep.mubr.f32.mxu0 %v2352_v4  ;;  %v7767_v4 = vpack.c.bf16 %v3288_v3, %v3287_v63 }
 0x55d   :  { %7742 = vmatpush3.bf16.msra.mxu0 %v7739_v45  ;;  %7753 = vmatpush3.bf16.msra.mxu1 %v7752_v62  ;;  %v7761_v45 = vpack.c.bf16 %v3284_v34, %v3283_v2 }
 0x55e   :  { %7744 = vmatprep.subr.bf16.mxu0 %v7743_v36  ;;  %7754 = vmatprep.subr.bf16.mxu1 %v8212_v54 }
 0x55f   :  { %6804 = vmatmul.mubr.f32.gmra.mrb[30].mxu1 %v2353_v17  ;;  %6884 = vmatmul.mubr.f32.gmra.mrb[126].mxu0 %v2353_v17  ;;  %v3291_v17 = vld [vmem:[#allocation8 + $0x170] sm:$0xff] }
 0x560   :  { %6806 = vmatprep.mubr.f32.mxu1 %v2354_v35  ;;  %6886 = vmatprep.mubr.f32.mxu0 %v2354_v35  ;;  %v3292_v35 = vld [vmem:[#allocation8 + $0x178] sm:$0xff] }
 0x561   :  { %7746 = vmatpush3.bf16.msra.mxu0 %v7743_v36  ;;  %7756 = vmatpush3.bf16.msra.mxu1 %v7755_v44  ;;  %v3290_v36 = vld [vmem:[#allocation8 + $0x168] sm:$0xff]  ;;  %v7773_v7 = vpack.c.bf16 %v3292_v35, %v3291_v17 }
 0x562   :  { %7748 = vmatprep.subr.bf16.mxu0 %v7747_v29  ;;  %7757 = vmatprep.subr.bf16.mxu1 %v8212_v54  ;;  %v7770_v5 = vpack.c.bf16 %v3290_v36, %v3289_v48 }
 0x563   :  { %6807 = vmatmul.mubr.f32.gmra.mrb[32].mxu1 %v2355_v37  ;;  %6887 = vmatmul.mubr.f32.gmra.mrb[128].mxu0 %v2355_v37  ;;  %v9065_v37 = vld [vmem:[%s9668_s1 + $0x2] ss:$0 sm:$0xff] }
 0x564   :  { %6809 = vmatprep.mubr.f32.mxu1 %v2356_v20  ;;  %6889 = vmatprep.mubr.f32.mxu0 %v2356_v20 }
 0x565   :  { %7750 = vmatpush3.bf16.msra.mxu0 %v7747_v29  ;;  %7759 = vmatpush3.bf16.msra.mxu1 %v7758_v30 }
 0x566   :  { %7760 = vmatprep.subr.bf16.mxu1 %v8212_v54 }
 0x567   :  { %6810 = vmatmul.mubr.f32.gmra.mrb[34].mxu1 %v2357_v6  ;;  %6890 = vmatmul.mubr.f32.gmra.mrb[130].mxu0 %v2357_v6 }
 0x568   :  { %6812 = vmatprep.mubr.f32.mxu1 %v2358_v38  ;;  %6892 = vmatprep.mubr.f32.mxu0 %v2358_v38 }
 0x569   :  { %7762 = vmatpush3.bf16.msra.mxu1 %v7761_v45 }
 0x56a   :  { %7763 = vmatprep.subr.bf16.mxu1 %v8212_v54 }
 0x56b   :  { %6813 = vmatmul.mubr.f32.gmra.mrb[36].mxu1 %v2359_v8  ;;  %6893 = vmatmul.mubr.f32.gmra.mrb[132].mxu0 %v2359_v8 }
 0x56c   :  { %6815 = vmatprep.mubr.f32.mxu1 %v2360_v21  ;;  %6895 = vmatprep.mubr.f32.mxu0 %v2360_v21 }
 0x56d   :  { %7765 = vmatpush3.bf16.msra.mxu1 %v7764_v51 }
 0x56e   :  { %7766 = vmatprep.subr.bf16.mxu1 %v8212_v54 }
 0x56f   :  { %6816 = vmatmul.mubr.f32.gmra.mrb[38].mxu1 %v2361_v24  ;;  %6896 = vmatmul.mubr.f32.gmra.mrb[134].mxu0 %v2361_v24 }
 0x570   :  { %6818 = vmatprep.mubr.f32.mxu1 %v2362_v40  ;;  %6898 = vmatprep.mubr.f32.mxu0 %v2362_v40 }
 0x571   :  { %7768 = vmatpush3.bf16.msra.mxu1 %v7767_v4 }
 0x572   :  { %7769 = vmatprep.subr.bf16.mxu1 %v8212_v54 }
 0x573   :  { %6819 = vmatmul.mubr.f32.gmra.mrb[40].mxu1 %v2363_v22  ;;  %6899 = vmatmul.mubr.f32.gmra.mrb[136].mxu0 %v2363_v22 }
 0x574   :  { %6821 = vmatprep.mubr.f32.mxu1 %v2364_v25  ;;  %6901 = vmatprep.mubr.f32.mxu0 %v2364_v25 }
 0x575   :  { %7771 = vmatpush3.bf16.msra.mxu1 %v7770_v5 }
 0x576   :  { %7772 = vmatprep.subr.bf16.mxu1 %v8212_v54 }
 0x577   :  { %6822 = vmatmul.mubr.f32.gmra.mrb[42].mxu1 %v2365_v52  ;;  %6902 = vmatmul.mubr.f32.gmra.mrb[138].mxu0 %v2365_v52 }
 0x578   :  { %6824 = vmatprep.mubr.f32.mxu1 %v2366_v53  ;;  %6904 = vmatprep.mubr.f32.mxu0 %v2366_v53 }
 0x579   :  { %7774 = vmatpush3.bf16.msra.mxu1 %v7773_v7 }
 0x57b   :  { %6825 = vmatmul.mubr.f32.gmra.mrb[44].mxu1 %v2367_v57  ;;  %6905 = vmatmul.mubr.f32.gmra.mrb[140].mxu0 %v2367_v57 }
 0x57c   :  { %6827 = vmatprep.mubr.f32.mxu1 %v2368_v16  ;;  %6907 = vmatprep.mubr.f32.mxu0 %v2368_v16 }
 0x57f   :  { %6828 = vmatmul.mubr.f32.gmra.mrb[46].mxu1 %v2369_v26  ;;  %6908 = vmatmul.mubr.f32.gmra.mrb[142].mxu0 %v2369_v26 }
 0x580   :  { %6830 = vmatprep.mubr.f32.mxu1 %v2370_v27  ;;  %6910 = vmatprep.mubr.f32.mxu0 %v2370_v27 }
 0x583   :  { %6831 = vmatmul.mubr.f32.gmra.mrb[48].mxu1 %v2371_v13  ;;  %6911 = vmatmul.mubr.f32.gmra.mrb[144].mxu0 %v2371_v13 }
 0x584   :  { %7025 = vmatprep.mubr.msk.f32.mxu1 %vm8213_vm1, %v8214_v12 }
 0x61a   :  { %v6867_v18 = vpop.f32.mrb[114].mxu0 }
 0x61b   :  { %v2807_v20 = vadd.f32 %v6867_v18, %v9065_v37  ;;  %v2801_v47 = vpop.f32.mrb[115].mxu0 }
 0x61c   :  { %v2802_v6 = vadd.f32 %v9065_v37, %v2801_v47 }
 0x61d   :  { %v2961_v61 = vmax.f32 %v2807_v20, 0.0 }
 0x61e   :  { %v2960_v60 = vmax.f32 %v2802_v6, 0.0  ;;  %v6870_v38 = vpop.f32.mrb[116].mxu0 }
 0x61f   :  { %v2817_v8 = vadd.f32 %v6870_v38, %v9065_v37  ;;  %v2811_v9 = vpop.f32.mrb[117].mxu0 }
 0x620   :  { %v2812_v21 = vadd.f32 %v9065_v37, %v2811_v9  ;;  %6945 = vmatprep.mubr.f32.mxu0 %v2960_v60 }
 0x621   :  { %v2963_v50 = vmax.f32 %v2817_v8, 0.0  ;;  %6946 = vmatmul.mubr.f32.vlgmr.msra.gmra.mrb[146].mxu0 %v2961_v61 }
 0x622   :  { %v2962_v24 = vmax.f32 %v2812_v21, 0.0  ;;  %v6873_v10 = vpop.f32.mrb[118].mxu0 }
 0x623   :  { %v3235_v40 = vmax.f32 %v2961_v61, %v2963_v50  ;;  %v2827_v39 = vadd.f32 %v6873_v10, %v9065_v37  ;;  %v2821_v22 = vpop.f32.mrb[119].mxu0 }
 0x624   :  { %v3234_v49 = vmax.f32 %v2960_v60, %v2962_v24  ;;  %v2822_v25 = vadd.f32 %v9065_v37, %v2821_v22  ;;  %6948 = vmatprep.mubr.f32.mxu0 %v2962_v24 }
 0x625   :  { %v2965_v14 = vmax.f32 %v2827_v39, 0.0  ;;  %6949 = vmatmul.mubr.f32.gmra.mrb[148].mxu0 %v2963_v50 }
 0x626   :  { %v2964_v52 = vmax.f32 %v2822_v25, 0.0  ;;  %v6876_v11 = vpop.f32.mrb[120].mxu0 }
 0x627   :  { %v3237_v53 = vmax.f32 %v3235_v40, %v2965_v14  ;;  %v2837_v41 = vadd.f32 %v6876_v11, %v9065_v37  ;;  %v2831_v57 = vpop.f32.mrb[121].mxu0 }
 0x628   :  { %v3236_v42 = vmax.f32 %v3234_v49, %v2964_v52  ;;  %v2832_v16 = vadd.f32 %v9065_v37, %v2831_v57  ;;  %6951 = vmatprep.mubr.f32.mxu0 %v2964_v52 }
 0x629   :  { %v2967_v58 = vmax.f32 %v2837_v41, 0.0  ;;  %6952 = vmatmul.mubr.f32.gmra.mrb[150].mxu0 %v2965_v14 }
 0x62a   :  { %v2966_v26 = vmax.f32 %v2832_v16, 0.0  ;;  %v6879_v15 = vpop.f32.mrb[122].mxu0 }
 0x62b   :  { %v3239_v27 = vmax.f32 %v3237_v53, %v2967_v58  ;;  %v2847_v13 = vadd.f32 %v6879_v15, %v9065_v37  ;;  %v2841_v28 = vpop.f32.mrb[123].mxu0 }
 0x62c   :  { %v3238_v0 = vmax.f32 %v3236_v42, %v2966_v26  ;;  %v2842_v29 = vadd.f32 %v9065_v37, %v2841_v28  ;;  %6954 = vmatprep.mubr.f32.mxu0 %v2966_v26 }
 0x62d   :  { %v2969_v32 = vmax.f32 %v2847_v13, 0.0  ;;  %6955 = vmatmul.mubr.f32.gmra.mrb[152].mxu0 %v2967_v58 }
 0x62e   :  { %v2968_v31 = vmax.f32 %v2842_v29, 0.0  ;;  %v6882_v62 = vpop.f32.mrb[124].mxu0 }
 0x62f   :  { %v3241_v23 = vmax.f32 %v3239_v27, %v2969_v32  ;;  %v2857_v43 = vadd.f32 %v6882_v62, %v9065_v37  ;;  %v2851_v44 = vpop.f32.mrb[125].mxu0 }
 0x630   :  { %v3240_v1 = vmax.f32 %v3238_v0, %v2968_v31  ;;  %v2852_v46 = vadd.f32 %v9065_v37, %v2851_v44  ;;  %6957 = vmatprep.mubr.f32.mxu0 %v2968_v31 }
 0x631   :  { %v2971_v2 = vmax.f32 %v2857_v43, 0.0  ;;  %6958 = vmatmul.mubr.f32.gmra.mrb[154].mxu0 %v2969_v32 }
 0x632   :  { %v2970_v30 = vmax.f32 %v2852_v46, 0.0  ;;  %v6885_v34 = vpop.f32.mrb[126].mxu0 }
 0x633   :  { %v3243_v45 = vmax.f32 %v3241_v23, %v2971_v2  ;;  %v2867_v19 = vadd.f32 %v6885_v34, %v9065_v37  ;;  %v2861_v33 = vpop.f32.mrb[127].mxu0 }
 0x634   :  { %v3242_v51 = vmax.f32 %v3240_v1, %v2970_v30  ;;  %v2862_v63 = vadd.f32 %v9065_v37, %v2861_v33  ;;  %6960 = vmatprep.mubr.f32.mxu0 %v2970_v30 }
 0x635   :  { %v2973_v3 = vmax.f32 %v2867_v19, 0.0  ;;  %6961 = vmatmul.mubr.f32.gmra.mrb[156].mxu0 %v2971_v2 }
 0x636   :  { %v2972_v4 = vmax.f32 %v2862_v63, 0.0  ;;  %v6888_v48 = vpop.f32.mrb[128].mxu0 }
 0x637   :  { %v3245_v36 = vmax.f32 %v3243_v45, %v2973_v3  ;;  %v2877_v17 = vadd.f32 %v6888_v48, %v9065_v37  ;;  %v2871_v5 = vpop.f32.mrb[129].mxu0 }
 0x638   :  { %v3244_v35 = vmax.f32 %v3242_v51, %v2972_v4  ;;  %v2872_v7 = vadd.f32 %v9065_v37, %v2871_v5  ;;  %6963 = vmatprep.mubr.f32.mxu0 %v2972_v4 }
 0x639   :  { %v2975_v18 = vmax.f32 %v2877_v17, 0.0  ;;  %6964 = vmatmul.mubr.f32.gmra.mrb[158].mxu0 %v2973_v3 }
 0x63a   :  { %v2974_v20 = vmax.f32 %v2872_v7, 0.0  ;;  %v6891_v47 = vpop.f32.mrb[130].mxu0 }
 0x63b   :  { %v3247_v6 = vmax.f32 %v3245_v36, %v2975_v18  ;;  %v2887_v60 = vadd.f32 %v6891_v47, %v9065_v37  ;;  %v2881_v38 = vpop.f32.mrb[131].mxu0 }
 0x63c   :  { %v3246_v61 = vmax.f32 %v3244_v35, %v2974_v20  ;;  %v2882_v8 = vadd.f32 %v9065_v37, %v2881_v38  ;;  %6966 = vmatprep.mubr.f32.mxu0 %v2974_v20 }
 0x63d   :  { %6967 = vmatmul.mubr.f32.gmra.mrb[160].mxu0 %v2975_v18  ;;  %v2977_v24 = vmax.f32 %v2887_v60, 0.0 }
 0x63e   :  { %v9085_v9 = vmax.f32 %v3246_v61, %v3247_v6  ;;  %v2976_v21 = vmax.f32 %v2882_v8, 0.0  ;;  %v6894_v50 = vpop.f32.mrb[132].mxu0 }
 0x63f   :  { %v2897_v10 = vadd.f32 %v6894_v50, %v9065_v37  ;;  %v2891_v40 = vpop.f32.mrb[133].mxu0 }
 0x640   :  { %v2892_v39 = vadd.f32 %v9065_v37, %v2891_v40  ;;  %6969 = vmatprep.mubr.f32.mxu0 %v2976_v21  ;;  %v3249_v35 = vrot.slane %v9085_v9, 4 }
 0x641   :  { %v2979_v22 = vmax.f32 %v2897_v10, 0.0  ;;  %6970 = vmatmul.mubr.f32.gmra.mrb[162].mxu0 %v2977_v24 }
 0x642   :  { %v2978_v49 = vmax.f32 %v2892_v39, 0.0  ;;  %v6897_v25 = vpop.f32.mrb[134].mxu0  ;;  %v3250_v8 = vmax.f32 %v9085_v9, %v3249_v35  ;;  %v3843_v9 = vld [vmem:[#allocation3 + $0x180] sm:$0xff]  ;;  %v3514_v35 = vld [vmem:[#allocation9 + $0x148] sm:$0xff] }
 0x643   :  { %v3256_v14 = vmax.f32 %v2977_v24, %v2979_v22  ;;  %v2907_v52 = vadd.f32 %v6897_v25, %v9065_v37  ;;  %v2901_v11 = vpop.f32.mrb[135].mxu0 }
 0x644   :  { %v3255_v53 = vmax.f32 %v2976_v21, %v2978_v49  ;;  %v2902_v41 = vadd.f32 %v9065_v37, %v2901_v11  ;;  %6972 = vmatprep.mubr.f32.mxu0 %v2978_v49  ;;  %v3251_v10 = vrot.slane %v3250_v8, 2 }
 0x645   :  { %v2981_v57 = vmax.f32 %v2907_v52, 0.0  ;;  %6973 = vmatmul.mubr.f32.gmra.mrb[164].mxu0 %v2979_v22 }
 0x646   :  { %v2980_v42 = vmax.f32 %v2902_v41, 0.0  ;;  %v6900_v16 = vpop.f32.mrb[136].mxu0  ;;  %v3252_v22 = vmax.f32 %v3250_v8, %v3251_v10 }
 0x647   :  { %v3258_v58 = vmax.f32 %v3256_v14, %v2981_v57  ;;  %v2917_v26 = vadd.f32 %v6900_v16, %v9065_v37  ;;  %v2911_v15 = vpop.f32.mrb[137].mxu0  ;;  %v3845_v16 = vld [vmem:[#allocation3 + $0x190] sm:$0xff] }
 0x648   :  { %v3257_v27 = vmax.f32 %v3255_v53, %v2980_v42  ;;  %v2912_v13 = vadd.f32 %v9065_v37, %v2911_v15  ;;  %6975 = vmatprep.mubr.f32.mxu0 %v2980_v42  ;;  %v3253_v14 = vrot.slane %v3252_v22, 1  ;;  %v3847_v15 = vld [vmem:[#allocation3 + $0x1a0] sm:$0xff] }
 0x649   :  { %v2983_v28 = vmax.f32 %v2917_v26, 0.0  ;;  %6976 = vmatmul.mubr.f32.gmra.mrb[166].mxu0 %v2981_v57  ;;  %v3844_v57 = vld [vmem:[#allocation3 + $0x188] sm:$0xff] }
 0x64a   :  { %v2982_v0 = vmax.f32 %v2912_v13, 0.0  ;;  %v6903_v29 = vpop.f32.mrb[138].mxu0  ;;  %v7807_v42 = vpack.c.bf16 %v3844_v57, %v3843_v9  ;;  %v4125_v57 = vld [vmem:[#allocation6 + $0x180] sm:$0xff] }
 0x64b   :  { %v3260_v32 = vmax.f32 %v3258_v58, %v2983_v28  ;;  %v2927_v31 = vadd.f32 %v6903_v29, %v9065_v37  ;;  %v2921_v62 = vpop.f32.mrb[139].mxu0  ;;  %v3846_v58 = vld [vmem:[#allocation3 + $0x198] sm:$0xff] }
 0x64c   :  { %v3259_v23 = vmax.f32 %v3257_v27, %v2982_v0  ;;  %v2922_v43 = vadd.f32 %v9065_v37, %v2921_v62  ;;  %6978 = vmatprep.mubr.f32.mxu0 %v2982_v0  ;;  %7808 = vmatprep.subr.bf16.mxu0 %v7807_v42  ;;  %v7811_v26 = vpack.c.bf16 %v3846_v58, %v3845_v16  ;;  %v3848_v27 = vld [vmem:[#allocation3 + $0x1a8] sm:$0xff]  ;;  %v3850_v0 = vld [vmem:[#allocation3 + $0x1b8] sm:$0xff]  ;;  %v3505_v62 = vld [vmem:[#allocation9 + $0x100] sm:$0xff] }
 0x64d   :  { %v2985_v44 = vmax.f32 %v2927_v31, 0.0  ;;  %6979 = vmatmul.mubr.f32.gmra.mrb[168].mxu0 %v2983_v28  ;;  %v7815_v13 = vpack.c.bf16 %v3848_v27, %v3847_v15  ;;  %v3849_v28 = vld [vmem:[#allocation3 + $0x1b0] sm:$0xff]  ;;  %v3852_v31 = vld [vmem:[#allocation3 + $0x1c8] sm:$0xff] }
 0x64e   :  { %v2984_v1 = vmax.f32 %v2922_v43, 0.0  ;;  %v6906_v46 = vpop.f32.mrb[140].mxu0  ;;  %7810 = vmatpush3.bf16.msra.mxu0 %v7807_v42  ;;  %v7819_v29 = vpack.c.bf16 %v3850_v0, %v3849_v28  ;;  %v3506_v43 = vld [vmem:[#allocation9 + $0x108] sm:$0xff] }
 0x64f   :  { %v3262_v2 = vmax.f32 %v3260_v32, %v2985_v44  ;;  %v2937_v30 = vadd.f32 %v6906_v46, %v9065_v37  ;;  %v2931_v34 = vpop.f32.mrb[141].mxu0  ;;  %7812 = vmatprep.subr.bf16.mxu0 %v7811_v26  ;;  %v3851_v32 = vld [vmem:[#allocation3 + $0x1c0] sm:$0xff]  ;;  %v3508_v46 = vld [vmem:[#allocation9 + $0x118] sm:$0xff]  ;;  %v4126_v42 = vld [vmem:[#allocation6 + $0x188] sm:$0xff] }
 0x650   :  { %v3261_v45 = vmax.f32 %v3259_v23, %v2984_v1  ;;  %v2932_v19 = vadd.f32 %v9065_v37, %v2931_v34  ;;  %6981 = vmatprep.mubr.f32.mxu0 %v2984_v1  ;;  %v7823_v23 = vpack.c.bf16 %v3852_v31, %v3851_v32  ;;  %v3507_v1 = vld [vmem:[#allocation9 + $0x110] sm:$0xff]  ;;  %v3854_v34 = vld [vmem:[#allocation3 + $0x1d8] sm:$0xff]  ;;  %v9105_v16 = vpack.c.bf16 %v4126_v42, %v4125_v57  ;;  %v4129_v42 = vld [vmem:[#allocation6 + $0x1a0] sm:$0xff] }
 0x651   :  { %v2987_v33 = vmax.f32 %v2937_v30, 0.0  ;;  %6982 = vmatmul.mubr.f32.gmra.mrb[170].mxu0 %v2985_v44  ;;  %v7775_v44 = vpack.c.bf16 %v3506_v43, %v3505_v62  ;;  %v7779_v30 = vpack.c.bf16 %v3508_v46, %v3507_v1 }
 0x652   :  { %v2986_v51 = vmax.f32 %v2932_v19, 0.0  ;;  %v6909_v63 = vpop.f32.mrb[142].mxu0  ;;  %7814 = vmatpush3.bf16.msra.mxu0 %v7811_v26  ;;  %v3510_v19 = vld [vmem:[#allocation9 + $0x128] sm:$0xff] }
 0x653   :  { %v3264_v3 = vmax.f32 %v3262_v2, %v2987_v33  ;;  %v2947_v4 = vadd.f32 %v6909_v63, %v9065_v37  ;;  %v2941_v48 = vpop.f32.mrb[143].mxu0  ;;  %7816 = vmatprep.subr.bf16.mxu0 %v7815_v13  ;;  %7776 = vmatprep.subr.bf16.mxu1 %v7775_v44  ;;  %v3853_v2 = vld [vmem:[#allocation3 + $0x1d0] sm:$0xff]  ;;  %v3855_v63 = vld [vmem:[#allocation3 + $0x1e0] sm:$0xff] }
 0x654   :  { %v3263_v36 = vmax.f32 %v3261_v45, %v2986_v51  ;;  %v2942_v17 = vadd.f32 %v9065_v37, %v2941_v48  ;;  %6984 = vmatprep.mubr.f32.mxu0 %v2986_v51  ;;  %v3509_v45 = vld [vmem:[#allocation9 + $0x120] sm:$0xff]  ;;  %v3856_v48 = vld [vmem:[#allocation3 + $0x1e8] sm:$0xff] }
 0x655   :  { %v2989_v5 = vmax.f32 %v2947_v4, 0.0  ;;  %6985 = vmatmul.mubr.f32.gmra.mrb[172].mxu0 %v2987_v33  ;;  %v7827_v33 = vpack.c.bf16 %v3854_v34, %v3853_v2  ;;  %v7783_v51 = vpack.c.bf16 %v3510_v19, %v3509_v45  ;;  %v3512_v4 = vld [vmem:[#allocation9 + $0x138] sm:$0xff] }
 0x656   :  { %v2988_v7 = vmax.f32 %v2942_v17, 0.0  ;;  %v6912_v18 = vpop.f32.mrb[144].mxu0  ;;  %7818 = vmatpush3.bf16.msra.mxu0 %v7815_v13 }
 0x657   :  { %v3266_v20 = vmax.f32 %v3264_v3, %v2989_v5  ;;  %v2957_v47 = vadd.f32 %v6912_v18, %v9065_v37  ;;  %v2951_v6 = vpop.f32.mrb[145].mxu0  ;;  %7820 = vmatprep.subr.bf16.mxu0 %v7819_v29  ;;  %v3511_v3 = vld [vmem:[#allocation9 + $0x130] sm:$0xff] }
 0x658   :  { %v3265_v60 = vmax.f32 %v3263_v36, %v2988_v7  ;;  %v2952_v38 = vadd.f32 %v9065_v37, %v2951_v6  ;;  %6987 = vmatprep.mubr.f32.mxu0 %v2988_v7  ;;  %v3254_v37 = vmax.f32 %v3252_v22, %v3253_v14  ;;  %v7831_v36 = vpack.c.bf16 %v3856_v48, %v3855_v63  ;;  %v3515_v18 = vld [vmem:[#allocation9 + $0x150] sm:$0xff] }
 0x659   :  { %v2991_v61 = vmax.f32 %v2957_v47, 0.0  ;;  %6988 = vmatmul.mubr.f32.gmra.mrb[174].mxu0 %v2989_v5  ;;  %v7787_v17 = vpack.c.bf16 %v3512_v4, %v3511_v3  ;;  %v3513_v5 = vld [vmem:[#allocation9 + $0x140] sm:$0xff]  ;;  %v3857_v47 = vld [vmem:[#allocation3 + $0x1f0] sm:$0xff] }
 0x65a   :  { %v2990_v21 = vmax.f32 %v2952_v38, 0.0  ;;  %7822 = vmatpush3.bf16.msra.mxu0 %v7819_v29  ;;  %v7791_v7 = vpack.c.bf16 %v3514_v35, %v3513_v5  ;;  %v3517_v38 = vld [vmem:[#allocation9 + $0x160] sm:$0xff] }
 0x65b   :  { %v3268_v50 = vmax.f32 %v3266_v20, %v2991_v61  ;;  %7824 = vmatprep.subr.bf16.mxu0 %v7823_v23  ;;  %v3516_v20 = vld [vmem:[#allocation9 + $0x158] sm:$0xff]  ;;  %v9148_v4 = vld [vmem:[%s9640_s7 + $0x2] ss:$0 sm:$0xff] }
 0x65c   :  { %v3267_v24 = vmax.f32 %v3265_v60, %v2990_v21  ;;  %6990 = vmatprep.mubr.f32.mxu0 %v2990_v21  ;;  %v7795_v6 = vpack.c.bf16 %v3516_v20, %v3515_v18  ;;  %v3858_v60 = vld [vmem:[#allocation3 + $0x1f8] sm:$0xff] }
 0x65d   :  { %6991 = vmatmul.mubr.f32.gmra.mrb[176].mxu0 %v2991_v61  ;;  %v3518_v61 = vld [vmem:[#allocation9 + $0x168] sm:$0xff]  ;;  %v7835_v8 = vpack.c.bf16 %v3858_v60, %v3857_v47 }
 0x65e   :  { %v3269_v40 = vmax.f32 %v3267_v24, %v3268_v50  ;;  %7826 = vmatpush3.bf16.msra.mxu0 %v7823_v23  ;;  %v7799_v21 = vpack.c.bf16 %v3518_v61, %v3517_v38  ;;  %v3519_v50 = vld [vmem:[#allocation9 + $0x170] sm:$0xff]  ;;  %v3520_v24 = vld [vmem:[#allocation9 + $0x178] sm:$0xff] }
 0x65f   :  { %7828 = vmatprep.subr.bf16.mxu0 %v7827_v33  ;;  %v7803_v10 = vpack.c.bf16 %v3520_v24, %v3519_v50  ;;  %v4127_v61 = vld [vmem:[#allocation6 + $0x190] sm:$0xff] }
 0x660   :  { %v3270_v39 = vrot.slane %v3269_v40, 4 }
 0x662   :  { %v3271_v49 = vmax.f32 %v3269_v40, %v3270_v39  ;;  %7830 = vmatpush3.bf16.msra.mxu0 %v7827_v33 }
 0x663   :  { %7832 = vmatprep.subr.bf16.mxu0 %v7831_v36 }
 0x664   :  { %v3272_v25 = vrot.slane %v3271_v49, 2 }
 0x666   :  { %v3273_v52 = vmax.f32 %v3271_v49, %v3272_v25  ;;  %7834 = vmatpush3.bf16.msra.mxu0 %v7831_v36 }
 0x667   :  { %7836 = vmatprep.subr.bf16.mxu0 %v7835_v8 }
 0x668   :  { %v3274_v11 = vrot.slane %v3273_v52, 1 }
 0x66a   :  { %v3275_v53 = vmax.f32 %v3273_v52, %v3274_v11  ;;  %7838 = vmatpush3.bf16.msra.mxu0 %v7835_v8  ;;  %v4128_v8 = vld [vmem:[#allocation6 + $0x198] sm:$0xff] }
 0x66b   :  { %7871 = vmatprep.subr.bf16.mxu0 %v8212_v54 }
 0x66c   :  { %v3295_v41 = vsel %vm1096_vm2, %v3275_v53, %v3254_v37 }
 0x66d   :  { %7026 = vmatmul.mubr.f32.vlgmr.msra.gmra.mrb[82].mxu1 %v3295_v41 }
 0x66e   :  { %7778 = vmatpush3.bf16.msra.mxu1 %v7775_v44 }
 0x66f   :  { %7780 = vmatprep.subr.bf16.mxu1 %v7779_v30 }
 0x672   :  { %7782 = vmatpush3.bf16.msra.mxu1 %v7779_v30 }
 0x673   :  { %7784 = vmatprep.subr.bf16.mxu1 %v7783_v51 }
 0x676   :  { %7786 = vmatpush3.bf16.msra.mxu1 %v7783_v51 }
 0x677   :  { %7788 = vmatprep.subr.bf16.mxu1 %v7787_v17 }
 0x67a   :  { %7790 = vmatpush3.bf16.msra.mxu1 %v7787_v17 }
 0x67b   :  { %7792 = vmatprep.subr.bf16.mxu1 %v7791_v7 }
 0x67e   :  { %7794 = vmatpush3.bf16.msra.mxu1 %v7791_v7 }
 0x67f   :  { %7796 = vmatprep.subr.bf16.mxu1 %v7795_v6 }
 0x682   :  { %7798 = vmatpush3.bf16.msra.mxu1 %v7795_v6 }
 0x683   :  { %7800 = vmatprep.subr.bf16.mxu1 %v7799_v21 }
 0x686   :  { %7802 = vmatpush3.bf16.msra.mxu1 %v7799_v21 }
 0x687   :  { %7804 = vmatprep.subr.bf16.mxu1 %v7803_v10 }
 0x68a   :  { %7806 = vmatpush3.bf16.msra.mxu1 %v7803_v10 }
 0x68b   :  { %7840 = vmatprep.subr.bf16.mxu1 %v9105_v16 }
 0x6f4   :  { %v6947_v40 = vpop.f32.mrb[146].mxu0 }
 0x6f5   :  { %v3075_v39 = vpop.f32.mrb[147].mxu0 }
 0x6f8   :  { %v6950_v22 = vpop.f32.mrb[148].mxu0 }
 0x6f9   :  { %v3085_v49 = vpop.f32.mrb[149].mxu0 }
 0x6fc   :  { %v6953_v25 = vpop.f32.mrb[150].mxu0 }
 0x6fd   :  { %v3095_v14 = vpop.f32.mrb[151].mxu0 }
 0x700   :  { %v6956_v52 = vpop.f32.mrb[152].mxu0 }
 0x701   :  { %v3105_v11 = vpop.f32.mrb[153].mxu0 }
 0x704   :  { %v6959_v37 = vpop.f32.mrb[154].mxu0 }
 0x705   :  { %v3115_v53 = vpop.f32.mrb[155].mxu0 }
 0x708   :  { %v6962_v41 = vpop.f32.mrb[156].mxu0 }
 0x709   :  { %v3125_v9 = vpop.f32.mrb[157].mxu0 }
 0x70c   :  { %v6965_v58 = vpop.f32.mrb[158].mxu0 }
 0x70d   :  { %v3135_v26 = vpop.f32.mrb[159].mxu0 }
 0x710   :  { %v9108_v15 = vpop.f32.mrb[160].mxu0 }
 0x711   :  { %v3145_v27 = vpop.f32.mrb[161].mxu0 }
 0x714   :  { %v9110_v13 = vpop.f32.mrb[162].mxu0 }
 0x715   :  { %v9112_v28 = vpop.f32.mrb[163].mxu0 }
 0x718   :  { %v9114_v0 = vpop.f32.mrb[164].mxu0 }
 0x719   :  { %v9116_v29 = vpop.f32.mrb[165].mxu0 }
 0x71c   :  { %v9118_v32 = vpop.f32.mrb[166].mxu0 }
 0x71d   :  { %v9120_v31 = vpop.f32.mrb[167].mxu0 }
 0x720   :  { %v9122_v62 = vpop.f32.mrb[168].mxu0 }
 0x721   :  { %v9124_v23 = vpop.f32.mrb[169].mxu0 }
 0x724   :  { %v9126_v43 = vpop.f32.mrb[170].mxu0 }
 0x725   :  { %v9128_v44 = vpop.f32.mrb[171].mxu0 }
 0x728   :  { %v9130_v1 = vpop.f32.mrb[172].mxu0 }
 0x729   :  { %v9132_v46 = vpop.f32.mrb[173].mxu0 }
 0x72c   :  { %v9134_v2 = vpop.f32.mrb[174].mxu0 }
 0x72d   :  { %v9136_v30 = vpop.f32.mrb[175].mxu0 }
 0x730   :  { %v9138_v34 = vpop.f32.mrb[176].mxu0 }
 0x731   :  { %v9140_v45 = vpop.f32.mrb[177].mxu0 }
 0x740   :  { %v3363_v19 = vpop.f32.mrb[82].mxu1 }
 0x741   :  { %v3374_v33 = vrot.slane %v3363_v19, %v8671_v56  ;;  %v7027_v51 = vpop.f32.mrb[83].mxu1  ;;  %v4130_v19 = vld [vmem:[#allocation6 + $0x1a8] sm:$0xff] }
 0x743   :  { %v3382_v63 = vrot.slane %v3374_v33, %v8671_v56  ;;  %v3375_v48 = vcombine.high %v3374_v33, %v3374_v33 }
 0x745   :  { %v3393_v3 = vrot.slane %v3382_v63, %v8675_v59  ;;  %v3389_v21 = vrot.slane %v3375_v48, %v8671_v56  ;;  %v4131_v63 = vld [vmem:[#allocation6 + $0x1b0] sm:$0xff]  ;;  %v4132_v48 = vld [vmem:[#allocation6 + $0x1b8] sm:$0xff] }
 0x747   :  { %v3400_v36 = vadd.f32 %v3393_v3, %v3075_v39  ;;  %v3401_v17 = vadd.f32 %v6947_v40, %v3393_v3  ;;  %v3402_v5 = vadd.f32 %v3393_v3, %v3085_v49  ;;  %v3403_v35 = vadd.f32 %v6950_v22, %v3393_v3 }
 0x748   :  { %v3404_v7 = vadd.f32 %v3393_v3, %v3095_v14  ;;  %v3405_v18 = vadd.f32 %v6953_v25, %v3393_v3  ;;  %v3406_v20 = vadd.f32 %v3393_v3, %v3105_v11  ;;  %v3407_v38 = vadd.f32 %v6956_v52, %v3393_v3 }
 0x749   :  { %v3440_v47 = vadd.f32 %v9148_v4, %v3400_v36  ;;  %v3441_v6 = vadd.f32 %v9148_v4, %v3401_v17  ;;  %v3442_v60 = vadd.f32 %v9148_v4, %v3402_v5  ;;  %v3443_v10 = vadd.f32 %v9148_v4, %v3403_v35 }
 0x74a   :  { %v3444_v40 = vadd.f32 %v9148_v4, %v3404_v7  ;;  %v7843_v39 = vpack.c.bf16 %v4128_v8, %v4127_v61  ;;  %v3408_v49 = vadd.f32 %v3393_v3, %v3115_v53  ;;  %v3409_v25 = vadd.f32 %v6959_v37, %v3393_v3  ;;  %v4135_v8 = vld [vmem:[#allocation6 + $0x1d0] sm:$0xff] }
 0x74b   :  { %v3472_v50 = vmax.f32 %v3440_v47, 0.0  ;;  %v3473_v24 = vmax.f32 %v3441_v6, 0.0  ;;  %v3474_v22 = vmax.f32 %v3442_v60, 0.0  ;;  %v3410_v14 = vadd.f32 %v3393_v3, %v3125_v9 }
 0x74c   :  { %v9156_v52 = vadd.f32 %v6962_v41, %v3393_v3  ;;  %v9158_v11 = vadd.f32 %v3393_v3, %v3135_v26  ;;  %v9160_v57 = vadd.f32 %v6965_v58, %v3393_v3  ;;  %v9163_v33 = vrot.slane %v3389_v21, %v8675_v59  ;;  %v4136_v21 = vld [vmem:[#allocation6 + $0x1d8] sm:$0xff] }
 0x74d   :  { %7060 = vmatprep.mubr.f32.mxu1 %v3472_v50  ;;  %7140 = vmatprep.mubr.f32.mxu0 %v3472_v50  ;;  %v3475_v51 = vmax.f32 %v3443_v10, 0.0  ;;  %v3445_v53 = vadd.f32 %v9148_v4, %v3405_v18  ;;  %v9166_v37 = vadd.f32 %v3393_v3, %v3145_v27  ;;  %v3476_v41 = vmax.f32 %v3444_v40, 0.0  ;;  %v4134_v18 = vld [vmem:[#allocation6 + $0x1c8] sm:$0xff] }
 0x74e   :  { %7061 = vmatmul.mubr.f32.vlgmr.msra.gmra.mrb[18].mxu1 %v3473_v24  ;;  %7141 = vmatmul.mubr.f32.vlgmr.msra.gmra.mrb[178].mxu0 %v3473_v24  ;;  %v3446_v9 = vadd.f32 %v9148_v4, %v3406_v20  ;;  %v9171_v58 = vadd.f32 %v9108_v15, %v3393_v3  ;;  %v7847_v26 = vpack.c.bf16 %v4130_v19, %v4129_v42 }
 0x74f   :  { %7063 = vmatprep.mubr.f32.mxu1 %v3474_v22  ;;  %7143 = vmatprep.mubr.f32.mxu0 %v3474_v22  ;;  %v3447_v36 = vadd.f32 %v9148_v4, %v3407_v38  ;;  %v9176_v27 = vadd.f32 %v9163_v33, %v9112_v28  ;;  %v3477_v15 = vmax.f32 %v3445_v53, 0.0  ;;  %v9184_v3 = vadd.f32 %v9163_v33, %v9116_v29  ;;  %v4133_v29 = vld [vmem:[#allocation6 + $0x1c0] sm:$0xff] }
 0x750   :  { %7842 = vmatpush3.bf16.msra.mxu1 %v9105_v16  ;;  %v9180_v16 = vadd.f32 %v9110_v13, %v9163_v33  ;;  %v9188_v17 = vadd.f32 %v9114_v0, %v9163_v33  ;;  %v9192_v5 = vadd.f32 %v9163_v33, %v9120_v31  ;;  %v3478_v28 = vmax.f32 %v3446_v9, 0.0 }
 0x751   :  { %7844 = vmatprep.subr.bf16.mxu1 %v7843_v39  ;;  %v3448_v35 = vadd.f32 %v9148_v4, %v3408_v49  ;;  %v9197_v13 = vadd.f32 %v9118_v32, %v9163_v33  ;;  %v7851_v7 = vpack.c.bf16 %v4132_v48, %v4131_v63  ;;  %v9201_v0 = vadd.f32 %v9163_v33, %v9124_v23 }
 0x752   :  { %7064 = vmatmul.mubr.f32.gmra.mrb[20].mxu1 %v3475_v51  ;;  %7144 = vmatmul.mubr.f32.gmra.mrb[180].mxu0 %v3475_v51  ;;  %v3479_v31 = vmax.f32 %v3447_v36, 0.0  ;;  %v3449_v20 = vadd.f32 %v9148_v4, %v3409_v25  ;;  %v9206_v47 = vadd.f32 %v9122_v62, %v9163_v33  ;;  %v7855_v32 = vpack.c.bf16 %v4134_v18, %v4133_v29 }
 0x753   :  { %7066 = vmatprep.mubr.f32.mxu1 %v3476_v41  ;;  %7146 = vmatprep.mubr.f32.mxu0 %v3476_v41  ;;  %v3480_v6 = vmax.f32 %v3448_v35, 0.0  ;;  %v3450_v60 = vadd.f32 %v9148_v4, %v3410_v14  ;;  %v9211_v38 = vadd.f32 %v9163_v33, %v9128_v44  ;;  %v9215_v23 = vadd.f32 %v9126_v43, %v9163_v33 }
 0x754   :  { %7846 = vmatpush3.bf16.msra.mxu1 %v7843_v39  ;;  %v9219_v62 = vadd.f32 %v9163_v33, %v9132_v46  ;;  %v9223_v61 = vadd.f32 %v9130_v1, %v9163_v33  ;;  %v9227_v44 = vadd.f32 %v9163_v33, %v9136_v30  ;;  %v3481_v43 = vmax.f32 %v3449_v20, 0.0  ;;  %v4137_v39 = vld [vmem:[#allocation6 + $0x1e0] sm:$0xff] }
 0x755   :  { %7848 = vmatprep.subr.bf16.mxu1 %v7847_v26  ;;  %v3451_v50 = vadd.f32 %v9148_v4, %v9156_v52  ;;  %v9233_v46 = vadd.f32 %v9134_v2, %v9163_v33  ;;  %v3482_v24 = vmax.f32 %v3450_v60, 0.0  ;;  %v3452_v1 = vadd.f32 %v9148_v4, %v9158_v11  ;;  %v4138_v2 = vld [vmem:[#allocation6 + $0x1e8] sm:$0xff] }
 0x756   :  { %7067 = vmatmul.mubr.f32.gmra.mrb[22].mxu1 %v3477_v15  ;;  %7147 = vmatmul.mubr.f32.gmra.mrb[182].mxu0 %v3477_v15  ;;  %v9239_v10 = vadd.f32 %v9163_v33, %v9140_v45  ;;  %v7859_v30 = vpack.c.bf16 %v4136_v21, %v4135_v8  ;;  %v9243_v40 = vadd.f32 %v9138_v34, %v9163_v33  ;;  %v4410_v8 = vld [vmem:[#allocation8 + $0x188] sm:$0xff] }
 0x757   :  { %7069 = vmatprep.mubr.f32.mxu1 %v3478_v28  ;;  %7149 = vmatprep.mubr.f32.mxu0 %v3478_v28  ;;  %v3483_v22 = vmax.f32 %v3451_v50, 0.0  ;;  %v3453_v49 = vadd.f32 %v9148_v4, %v9160_v57  ;;  %v3484_v25 = vmax.f32 %v3452_v1, 0.0  ;;  %v3454_v45 = vadd.f32 %v9148_v4, %v9166_v37  ;;  %v4413_v50 = vld [vmem:[#allocation8 + $0x1a0] sm:$0xff] }
 0x758   :  { %7850 = vmatpush3.bf16.msra.mxu1 %v7847_v26  ;;  %v7863_v14 = vpack.c.bf16 %v4138_v2, %v4137_v39  ;;  %v3455_v52 = vadd.f32 %v9148_v4, %v9171_v58  ;;  %v3456_v57 = vadd.f32 %v9148_v4, %v9176_v27  ;;  %v3457_v19 = vadd.f32 %v9148_v4, %v9180_v16  ;;  %v4418_v39 = vld [vmem:[#allocation8 + $0x1c8] sm:$0xff] }
 0x759   :  { %7852 = vmatprep.subr.bf16.mxu1 %v7851_v7  ;;  %v3485_v34 = vmax.f32 %v3453_v49, 0.0  ;;  %v3486_v11 = vmax.f32 %v3454_v45, 0.0  ;;  %v3458_v51 = vadd.f32 %v9148_v4, %v9184_v3  ;;  %v3459_v37 = vadd.f32 %v9148_v4, %v9188_v17  ;;  %v4420_v49 = vld [vmem:[#allocation8 + $0x1d8] sm:$0xff]  ;;  %v4421_v45 = vld [vmem:[#allocation8 + $0x1e0] sm:$0xff] }
 0x75a   :  { %7070 = vmatmul.mubr.f32.gmra.mrb[24].mxu1 %v3479_v31  ;;  %7150 = vmatmul.mubr.f32.gmra.mrb[184].mxu0 %v3479_v31  ;;  %v3487_v42 = vmax.f32 %v3455_v52, 0.0  ;;  %v3488_v33 = vmax.f32 %v3456_v57, 0.0  ;;  %v3489_v53 = vmax.f32 %v3457_v19, 0.0  ;;  %v3460_v9 = vadd.f32 %v9148_v4, %v9192_v5 }
 0x75b   :  { %7072 = vmatprep.mubr.f32.mxu1 %v3480_v6  ;;  %7152 = vmatprep.mubr.f32.mxu0 %v3480_v6  ;;  %v3490_v41 = vmax.f32 %v3458_v51, 0.0  ;;  %v3491_v58 = vmax.f32 %v3459_v37, 0.0  ;;  %v3461_v26 = vadd.f32 %v9148_v4, %v9197_v13  ;;  %v3462_v48 = vadd.f32 %v9148_v4, %v9201_v0 }
 0x75c   :  { %7854 = vmatpush3.bf16.msra.mxu1 %v7851_v7  ;;  %v3492_v63 = vmax.f32 %v3460_v9, 0.0  ;;  %v3463_v27 = vadd.f32 %v9148_v4, %v9206_v47  ;;  %v3464_v15 = vadd.f32 %v9148_v4, %v9211_v38  ;;  %v3465_v17 = vadd.f32 %v9148_v4, %v9215_v23  ;;  %v4139_v38 = vld [vmem:[#allocation6 + $0x1f0] sm:$0xff]  ;;  %v4140_v23 = vld [vmem:[#allocation6 + $0x1f8] sm:$0xff] }
 0x75d   :  { %7856 = vmatprep.subr.bf16.mxu1 %v7855_v32  ;;  %v3493_v36 = vmax.f32 %v3461_v26, 0.0  ;;  %v3494_v16 = vmax.f32 %v3462_v48, 0.0  ;;  %v3466_v28 = vadd.f32 %v9148_v4, %v9219_v62  ;;  %v3467_v13 = vadd.f32 %v9148_v4, %v9223_v61  ;;  %v4409_v61 = vld [vmem:[#allocation8 + $0x180] sm:$0xff] }
 0x75e   :  { %7073 = vmatmul.mubr.f32.gmra.mrb[26].mxu1 %v3481_v43  ;;  %7153 = vmatmul.mubr.f32.gmra.mrb[186].mxu0 %v3481_v43  ;;  %v3495_v3 = vmax.f32 %v3463_v27, 0.0  ;;  %v3496_v5 = vmax.f32 %v3464_v15, 0.0  ;;  %v3497_v35 = vmax.f32 %v3465_v17, 0.0  ;;  %v3468_v29 = vadd.f32 %v9148_v4, %v9227_v44  ;;  %v4412_v44 = vld [vmem:[#allocation8 + $0x198] sm:$0xff] }
 0x75f   :  { %7075 = vmatprep.mubr.f32.mxu1 %v3482_v24  ;;  %7155 = vmatprep.mubr.f32.mxu0 %v3482_v24  ;;  %v3498_v7 = vmax.f32 %v3466_v28, 0.0  ;;  %v3499_v18 = vmax.f32 %v3467_v13, 0.0  ;;  %v3469_v0 = vadd.f32 %v9148_v4, %v9233_v46  ;;  %v3470_v20 = vadd.f32 %v9148_v4, %v9239_v10  ;;  %v4414_v46 = vld [vmem:[#allocation8 + $0x1a8] sm:$0xff]  ;;  %v4415_v24 = vld [vmem:[#allocation8 + $0x1b0] sm:$0xff]  ;;  %v4416_v10 = vld [vmem:[#allocation8 + $0x1b8] sm:$0xff] }
 0x760   :  { %7858 = vmatpush3.bf16.msra.mxu1 %v7855_v32  ;;  %v3500_v31 = vmax.f32 %v3468_v29, 0.0  ;;  %v3471_v32 = vadd.f32 %v9148_v4, %v9243_v40  ;;  %v7867_v62 = vpack.c.bf16 %v4140_v23, %v4139_v38  ;;  %v7872_v21 = vpack.c.bf16 %v4410_v8, %v4409_v61  ;;  %v4411_v4 = vld [vmem:[#allocation8 + $0x190] sm:$0xff]  ;;  %v4417_v40 = vld [vmem:[#allocation8 + $0x1c0] sm:$0xff] }
 0x761   :  { %7860 = vmatprep.subr.bf16.mxu1 %v7859_v30  ;;  %v3501_v47 = vmax.f32 %v3469_v0, 0.0  ;;  %v3502_v6 = vmax.f32 %v3470_v20, 0.0  ;;  %v7875_v43 = vpack.c.bf16 %v4412_v44, %v4411_v4  ;;  %v7878_v1 = vpack.c.bf16 %v4414_v46, %v4413_v50 }
 0x762   :  { %7076 = vmatmul.mubr.f32.gmra.mrb[28].mxu1 %v3483_v22  ;;  %7156 = vmatmul.mubr.f32.gmra.mrb[188].mxu0 %v3483_v22  ;;  %v3503_v60 = vmax.f32 %v3471_v32, 0.0  ;;  %v7884_v2 = vpack.c.bf16 %v4418_v39, %v4417_v40  ;;  %v4419_v22 = vld [vmem:[#allocation8 + $0x1d0] sm:$0xff] }
 0x763   :  { %7078 = vmatprep.mubr.f32.mxu1 %v3484_v25  ;;  %7158 = vmatprep.mubr.f32.mxu0 %v3484_v25  ;;  %v7887_v25 = vpack.c.bf16 %v4420_v49, %v4419_v22 }
 0x764   :  { %7862 = vmatpush3.bf16.msra.mxu1 %v7859_v30  ;;  %7873 = vmatpush3.bf16.msra.mxu0 %v7872_v21  ;;  %v7881_v30 = vpack.c.bf16 %v4416_v10, %v4415_v24 }
 0x765   :  { %7864 = vmatprep.subr.bf16.mxu1 %v7863_v14  ;;  %7874 = vmatprep.subr.bf16.mxu0 %v8212_v54 }
 0x766   :  { %7079 = vmatmul.mubr.f32.gmra.mrb[30].mxu1 %v3485_v34  ;;  %7159 = vmatmul.mubr.f32.gmra.mrb[190].mxu0 %v3485_v34  ;;  %v4423_v34 = vld [vmem:[#allocation8 + $0x1f0] sm:$0xff] }
 0x767   :  { %7081 = vmatprep.mubr.f32.mxu1 %v3486_v11  ;;  %7161 = vmatprep.mubr.f32.mxu0 %v3486_v11  ;;  %v4424_v11 = vld [vmem:[#allocation8 + $0x1f8] sm:$0xff] }
 0x768   :  { %7866 = vmatpush3.bf16.msra.mxu1 %v7863_v14  ;;  %7876 = vmatpush3.bf16.msra.mxu0 %v7875_v43  ;;  %v4422_v14 = vld [vmem:[#allocation8 + $0x1e8] sm:$0xff]  ;;  %v7893_v57 = vpack.c.bf16 %v4424_v11, %v4423_v34 }
 0x769   :  { %7868 = vmatprep.subr.bf16.mxu1 %v7867_v62  ;;  %7877 = vmatprep.subr.bf16.mxu0 %v8212_v54  ;;  %v7890_v52 = vpack.c.bf16 %v4422_v14, %v4421_v45 }
 0x76a   :  { %7082 = vmatmul.mubr.f32.gmra.mrb[32].mxu1 %v3487_v42  ;;  %7162 = vmatmul.mubr.f32.gmra.mrb[192].mxu0 %v3487_v42  ;;  %v9296_v42 = vld [vmem:[%s9668_s1 + $0x3] ss:$0 sm:$0xff] }
 0x76b   :  { %7084 = vmatprep.mubr.f32.mxu1 %v3488_v33  ;;  %7164 = vmatprep.mubr.f32.mxu0 %v3488_v33 }
 0x76c   :  { %7870 = vmatpush3.bf16.msra.mxu1 %v7867_v62  ;;  %7879 = vmatpush3.bf16.msra.mxu0 %v7878_v1 }
 0x76d   :  { %7880 = vmatprep.subr.bf16.mxu0 %v8212_v54 }
 0x76e   :  { %7085 = vmatmul.mubr.f32.gmra.mrb[34].mxu1 %v3489_v53  ;;  %7165 = vmatmul.mubr.f32.gmra.mrb[194].mxu0 %v3489_v53 }
 0x76f   :  { %7087 = vmatprep.mubr.f32.mxu1 %v3490_v41  ;;  %7167 = vmatprep.mubr.f32.mxu0 %v3490_v41 }
 0x770   :  { %7882 = vmatpush3.bf16.msra.mxu0 %v7881_v30 }
 0x771   :  { %7883 = vmatprep.subr.bf16.mxu0 %v8212_v54 }
 0x772   :  { %7088 = vmatmul.mubr.f32.gmra.mrb[36].mxu1 %v3491_v58  ;;  %7168 = vmatmul.mubr.f32.gmra.mrb[196].mxu0 %v3491_v58 }
 0x773   :  { %7090 = vmatprep.mubr.f32.mxu1 %v3492_v63  ;;  %7170 = vmatprep.mubr.f32.mxu0 %v3492_v63 }
 0x774   :  { %7885 = vmatpush3.bf16.msra.mxu0 %v7884_v2 }
 0x775   :  { %7886 = vmatprep.subr.bf16.mxu0 %v8212_v54 }
 0x776   :  { %7091 = vmatmul.mubr.f32.gmra.mrb[38].mxu1 %v3493_v36  ;;  %7171 = vmatmul.mubr.f32.gmra.mrb[198].mxu0 %v3493_v36 }
 0x777   :  { %7093 = vmatprep.mubr.f32.mxu1 %v3494_v16  ;;  %7173 = vmatprep.mubr.f32.mxu0 %v3494_v16 }
 0x778   :  { %7888 = vmatpush3.bf16.msra.mxu0 %v7887_v25 }
 0x779   :  { %7889 = vmatprep.subr.bf16.mxu0 %v8212_v54 }
 0x77a   :  { %7094 = vmatmul.mubr.f32.gmra.mrb[40].mxu1 %v3495_v3  ;;  %7174 = vmatmul.mubr.f32.gmra.mrb[200].mxu0 %v3495_v3 }
 0x77b   :  { %7096 = vmatprep.mubr.f32.mxu1 %v3496_v5  ;;  %7176 = vmatprep.mubr.f32.mxu0 %v3496_v5 }
 0x77c   :  { %7891 = vmatpush3.bf16.msra.mxu0 %v7890_v52 }
 0x77d   :  { %7892 = vmatprep.subr.bf16.mxu0 %v8212_v54 }
 0x77e   :  { %7097 = vmatmul.mubr.f32.gmra.mrb[42].mxu1 %v3497_v35  ;;  %7177 = vmatmul.mubr.f32.gmra.mrb[202].mxu0 %v3497_v35 }
 0x77f   :  { %7099 = vmatprep.mubr.f32.mxu1 %v3498_v7  ;;  %7179 = vmatprep.mubr.f32.mxu0 %v3498_v7 }
 0x780   :  { %7894 = vmatpush3.bf16.msra.mxu0 %v7893_v57 }
 0x781   :  { %7383 = vmatprep.subr.mxu0 %v8214_v12 }
 0x782   :  { %7100 = vmatmul.mubr.f32.gmra.mrb[44].mxu1 %v3499_v18  ;;  %7180 = vmatmul.mubr.f32.gmra.mrb[204].mxu0 %v3499_v18 }
 0x783   :  { %7102 = vmatprep.mubr.f32.mxu1 %v3500_v31  ;;  %7182 = vmatprep.mubr.f32.mxu0 %v3500_v31 }
 0x786   :  { %7103 = vmatmul.mubr.f32.gmra.mrb[46].mxu1 %v3501_v47  ;;  %7183 = vmatmul.mubr.f32.gmra.mrb[206].mxu0 %v3501_v47 }
 0x787   :  { %7105 = vmatprep.mubr.f32.mxu1 %v3502_v6  ;;  %7185 = vmatprep.mubr.f32.mxu0 %v3502_v6 }
 0x78a   :  { %7106 = vmatmul.mubr.f32.gmra.mrb[48].mxu1 %v3503_v60  ;;  %7186 = vmatmul.mubr.f32.gmra.mrb[208].mxu0 %v3503_v60 }
 0x78b   :  { %7300 = vmatprep.mubr.msk.f32.mxu0 %vm8213_vm1, %v8214_v12 }
 0x821   :  { %v7142_v19 = vpop.f32.mrb[178].mxu0 }
 0x822   :  { %v3939_v33 = vadd.f32 %v7142_v19, %v9296_v42  ;;  %v3933_v51 = vpop.f32.mrb[179].mxu0 }
 0x823   :  { %v3934_v53 = vadd.f32 %v9296_v42, %v3933_v51 }
 0x824   :  { %v4093_v9 = vmax.f32 %v3939_v33, 0.0 }
 0x825   :  { %v4092_v37 = vmax.f32 %v3934_v53, 0.0  ;;  %v7145_v41 = vpop.f32.mrb[180].mxu0 }
 0x826   :  { %v3949_v58 = vadd.f32 %v7145_v41, %v9296_v42  ;;  %v3943_v26 = vpop.f32.mrb[181].mxu0 }
 0x827   :  { %v3944_v63 = vadd.f32 %v9296_v42, %v3943_v26  ;;  %7220 = vmatprep.mubr.f32.mxu1 %v4092_v37 }
 0x828   :  { %v4095_v48 = vmax.f32 %v3949_v58, 0.0  ;;  %7221 = vmatmul.mubr.f32.vlgmr.msra.gmra.mrb[84].mxu1 %v4093_v9 }
 0x829   :  { %v4094_v36 = vmax.f32 %v3944_v63, 0.0  ;;  %v7148_v27 = vpop.f32.mrb[182].mxu0 }
 0x82a   :  { %v4367_v16 = vmax.f32 %v4093_v9, %v4095_v48  ;;  %v3959_v15 = vadd.f32 %v7148_v27, %v9296_v42  ;;  %v3953_v3 = vpop.f32.mrb[183].mxu0 }
 0x82b   :  { %v4366_v17 = vmax.f32 %v4092_v37, %v4094_v36  ;;  %v3954_v5 = vadd.f32 %v9296_v42, %v3953_v3  ;;  %7223 = vmatprep.mubr.f32.mxu1 %v4094_v36 }
 0x82c   :  { %v4097_v28 = vmax.f32 %v3959_v15, 0.0  ;;  %7224 = vmatmul.mubr.f32.gmra.mrb[86].mxu1 %v4095_v48 }
 0x82d   :  { %v4096_v35 = vmax.f32 %v3954_v5, 0.0  ;;  %v7151_v13 = vpop.f32.mrb[184].mxu0 }
 0x82e   :  { %v4369_v7 = vmax.f32 %v4367_v16, %v4097_v28  ;;  %v3969_v29 = vadd.f32 %v7151_v13, %v9296_v42  ;;  %v3963_v18 = vpop.f32.mrb[185].mxu0 }
 0x82f   :  { %v4368_v0 = vmax.f32 %v4366_v17, %v4096_v35  ;;  %v3964_v31 = vadd.f32 %v9296_v42, %v3963_v18  ;;  %7226 = vmatprep.mubr.f32.mxu1 %v4096_v35 }
 0x830   :  { %v4099_v20 = vmax.f32 %v3969_v29, 0.0  ;;  %7227 = vmatmul.mubr.f32.gmra.mrb[88].mxu1 %v4097_v28 }
 0x831   :  { %v4098_v47 = vmax.f32 %v3964_v31, 0.0  ;;  %v7154_v32 = vpop.f32.mrb[186].mxu0 }
 0x832   :  { %v4371_v6 = vmax.f32 %v4369_v7, %v4099_v20  ;;  %v3979_v60 = vadd.f32 %v7154_v32, %v9296_v42  ;;  %v3973_v38 = vpop.f32.mrb[187].mxu0 }
 0x833   :  { %v4370_v23 = vmax.f32 %v4368_v0, %v4098_v47  ;;  %v3974_v62 = vadd.f32 %v9296_v42, %v3973_v38  ;;  %7229 = vmatprep.mubr.f32.mxu1 %v4098_v47 }
 0x834   :  { %v4101_v61 = vmax.f32 %v3979_v60, 0.0  ;;  %7230 = vmatmul.mubr.f32.gmra.mrb[90].mxu1 %v4099_v20 }
 0x835   :  { %v4100_v8 = vmax.f32 %v3974_v62, 0.0  ;;  %v7157_v21 = vpop.f32.mrb[188].mxu0 }
 0x836   :  { %v4373_v4 = vmax.f32 %v4371_v6, %v4101_v61  ;;  %v3989_v44 = vadd.f32 %v7157_v21, %v9296_v42  ;;  %v3983_v43 = vpop.f32.mrb[189].mxu0 }
 0x837   :  { %v4372_v50 = vmax.f32 %v4370_v23, %v4100_v8  ;;  %v3984_v46 = vadd.f32 %v9296_v42, %v3983_v43  ;;  %7232 = vmatprep.mubr.f32.mxu1 %v4100_v8 }
 0x838   :  { %v4103_v24 = vmax.f32 %v3989_v44, 0.0  ;;  %7233 = vmatmul.mubr.f32.gmra.mrb[92].mxu1 %v4101_v61 }
 0x839   :  { %v4102_v1 = vmax.f32 %v3984_v46, 0.0  ;;  %v7160_v10 = vpop.f32.mrb[190].mxu0 }
 0x83a   :  { %v4375_v30 = vmax.f32 %v4373_v4, %v4103_v24  ;;  %v3999_v40 = vadd.f32 %v7160_v10, %v9296_v42  ;;  %v3993_v39 = vpop.f32.mrb[191].mxu0 }
 0x83b   :  { %v4374_v2 = vmax.f32 %v4372_v50, %v4102_v1  ;;  %v3994_v22 = vadd.f32 %v9296_v42, %v3993_v39  ;;  %7235 = vmatprep.mubr.f32.mxu1 %v4102_v1 }
 0x83c   :  { %v4105_v49 = vmax.f32 %v3999_v40, 0.0  ;;  %7236 = vmatmul.mubr.f32.gmra.mrb[94].mxu1 %v4103_v24 }
 0x83d   :  { %v4104_v25 = vmax.f32 %v3994_v22, 0.0  ;;  %v7163_v45 = vpop.f32.mrb[192].mxu0 }
 0x83e   :  { %v4377_v14 = vmax.f32 %v4375_v30, %v4105_v49  ;;  %v4009_v34 = vadd.f32 %v7163_v45, %v9296_v42  ;;  %v4003_v52 = vpop.f32.mrb[193].mxu0 }
 0x83f   :  { %v4376_v11 = vmax.f32 %v4374_v2, %v4104_v25  ;;  %v4004_v57 = vadd.f32 %v9296_v42, %v4003_v52  ;;  %7238 = vmatprep.mubr.f32.mxu1 %v4104_v25 }
 0x840   :  { %v4107_v19 = vmax.f32 %v4009_v34, 0.0  ;;  %7239 = vmatmul.mubr.f32.gmra.mrb[96].mxu1 %v4105_v49 }
 0x841   :  { %v4106_v33 = vmax.f32 %v4004_v57, 0.0  ;;  %v7166_v51 = vpop.f32.mrb[194].mxu0 }
 0x842   :  { %v4379_v53 = vmax.f32 %v4377_v14, %v4107_v19  ;;  %v4019_v37 = vadd.f32 %v7166_v51, %v9296_v42  ;;  %v4013_v41 = vpop.f32.mrb[195].mxu0 }
 0x843   :  { %v4378_v9 = vmax.f32 %v4376_v11, %v4106_v33  ;;  %v4014_v58 = vadd.f32 %v9296_v42, %v4013_v41  ;;  %7241 = vmatprep.mubr.f32.mxu1 %v4106_v33 }
 0x844   :  { %7242 = vmatmul.mubr.f32.gmra.mrb[98].mxu1 %v4107_v19  ;;  %v4109_v36 = vmax.f32 %v4019_v37, 0.0 }
 0x845   :  { %v9316_v26 = vmax.f32 %v4378_v9, %v4379_v53  ;;  %v4108_v63 = vmax.f32 %v4014_v58, 0.0  ;;  %v7169_v48 = vpop.f32.mrb[196].mxu0 }
 0x846   :  { %v4029_v27 = vadd.f32 %v7169_v48, %v9296_v42  ;;  %v4023_v16 = vpop.f32.mrb[197].mxu0 }
 0x847   :  { %v4024_v15 = vadd.f32 %v9296_v42, %v4023_v16  ;;  %7244 = vmatprep.mubr.f32.mxu1 %v4108_v63  ;;  %v4381_v11 = vrot.slane %v9316_v26, 4 }
 0x848   :  { %v4111_v3 = vmax.f32 %v4029_v27, 0.0  ;;  %7245 = vmatmul.mubr.f32.gmra.mrb[100].mxu1 %v4109_v36 }
 0x849   :  { %v4110_v17 = vmax.f32 %v4024_v15, 0.0  ;;  %v7172_v5 = vpop.f32.mrb[198].mxu0  ;;  %v4382_v58 = vmax.f32 %v9316_v26, %v4381_v11  ;;  %v5058_v26 = vld [vmem:[%s9644_s11] sm:$0xff] }
 0x84a   :  { %v4388_v28 = vmax.f32 %v4109_v36, %v4111_v3  ;;  %v4039_v35 = vadd.f32 %v7172_v5, %v9296_v42  ;;  %v4033_v13 = vpop.f32.mrb[199].mxu0 }
 0x84b   :  { %v4387_v7 = vmax.f32 %v4108_v63, %v4110_v17  ;;  %v4034_v29 = vadd.f32 %v9296_v42, %v4033_v13  ;;  %7247 = vmatprep.mubr.f32.mxu1 %v4110_v17  ;;  %v4383_v27 = vrot.slane %v4382_v58, 2 }
 0x84c   :  { %v4113_v18 = vmax.f32 %v4039_v35, 0.0  ;;  %7248 = vmatmul.mubr.f32.gmra.mrb[102].mxu1 %v4111_v3 }
 0x84d   :  { %v4112_v0 = vmax.f32 %v4034_v29, 0.0  ;;  %v7175_v31 = vpop.f32.mrb[200].mxu0  ;;  %v4384_v3 = vmax.f32 %v4382_v58, %v4383_v27 }
 0x84e   :  { %v4390_v20 = vmax.f32 %v4388_v28, %v4113_v18  ;;  %v4049_v47 = vadd.f32 %v7175_v31, %v9296_v42  ;;  %v4043_v32 = vpop.f32.mrb[201].mxu0  ;;  %v4638_v31 = vld [vmem:[#allocation9 + $0x188] sm:$0xff] }
 0x84f   :  { %v4389_v6 = vmax.f32 %v4387_v7, %v4112_v0  ;;  %v4044_v60 = vadd.f32 %v9296_v42, %v4043_v32  ;;  %7250 = vmatprep.mubr.f32.mxu1 %v4112_v0  ;;  %v4385_v28 = vrot.slane %v4384_v3, 1  ;;  %v4637_v0 = vld [vmem:[#allocation9 + $0x180] sm:$0xff]  ;;  %v4640_v32 = vld [vmem:[#allocation9 + $0x198] sm:$0xff] }
 0x850   :  { %v4115_v38 = vmax.f32 %v4049_v47, 0.0  ;;  %7251 = vmatmul.mubr.f32.gmra.mrb[104].mxu1 %v4113_v18  ;;  %v5057_v18 = vld [vmem:[%s9643_s10] sm:$0x3]  ;;  %v4639_v47 = vld [vmem:[#allocation9 + $0x190] sm:$0xff] }
 0x851   :  { %v4114_v23 = vmax.f32 %v4044_v60, 0.0  ;;  %v7178_v62 = vpop.f32.mrb[202].mxu0  ;;  %v7899_v60 = vpack.c.bf16 %v4640_v32, %v4639_v47 }
 0x852   :  { %v4392_v61 = vmax.f32 %v4390_v20, %v4115_v38  ;;  %v4059_v8 = vadd.f32 %v7178_v62, %v9296_v42  ;;  %v4053_v21 = vpop.f32.mrb[203].mxu0  ;;  %v7895_v20 = vpack.c.bf16 %v4638_v31, %v4637_v0  ;;  %v5141_v62 = vld [vmem:[%s9646_s13 + $0x8] sm:$0xff] }
 0x853   :  { %v4391_v4 = vmax.f32 %v4389_v6, %v4114_v23  ;;  %v4054_v44 = vadd.f32 %v9296_v42, %v4053_v21  ;;  %7253 = vmatprep.mubr.f32.mxu1 %v4114_v23  ;;  %v4641_v6 = vld [vmem:[#allocation9 + $0x1a0] sm:$0xff]  ;;  %v4643_v21 = vld [vmem:[#allocation9 + $0x1b0] sm:$0xff] }
 0x854   :  { %v4117_v43 = vmax.f32 %v4059_v8, 0.0  ;;  %7254 = vmatmul.mubr.f32.gmra.mrb[106].mxu1 %v4115_v38  ;;  %7896 = vmatprep.subr.bf16.mxu1 %v7895_v20  ;;  %v4642_v38 = vld [vmem:[#allocation9 + $0x1a8] sm:$0xff]  ;;  %v5140_v23 = vld [vmem:[%s9646_s13] sm:$0xff] }
 0x855   :  { %v4116_v50 = vmax.f32 %v4054_v44, 0.0  ;;  %v7181_v46 = vpop.f32.mrb[204].mxu0  ;;  %7898 = vmatpush3.bf16.msra.mxu1 %v7895_v20  ;;  %v7928_v8 = vpack.c.bf16 %v5141_v62, %v5140_v23  ;;  %v5142_v44 = vld [vmem:[%s9646_s13 + $0x10] sm:$0xff] }
 0x856   :  { %v4394_v24 = vmax.f32 %v4392_v61, %v4117_v43  ;;  %v4069_v1 = vadd.f32 %v7181_v46, %v9296_v42  ;;  %v4063_v10 = vpop.f32.mrb[205].mxu0  ;;  %v7903_v61 = vpack.c.bf16 %v4642_v38, %v4641_v6  ;;  %7900 = vmatprep.subr.bf16.mxu1 %v7899_v60 }
 0x857   :  { %v4393_v30 = vmax.f32 %v4391_v4, %v4116_v50  ;;  %v4064_v40 = vadd.f32 %v9296_v42, %v4063_v10  ;;  %7256 = vmatprep.mubr.f32.mxu1 %v4116_v50  ;;  %v4644_v4 = vld [vmem:[#allocation9 + $0x1b8] sm:$0xff] }
 0x858   :  { %v4119_v39 = vmax.f32 %v4069_v1, 0.0  ;;  %7257 = vmatmul.mubr.f32.gmra.mrb[108].mxu1 %v4117_v43  ;;  %v5143_v43 = vld [vmem:[%s9646_s13 + $0x18] sm:$0xff]  ;;  %v7907_v46 = vpack.c.bf16 %v4644_v4, %v4643_v21  ;;  %v4646_v1 = vld [vmem:[#allocation9 + $0x1c8] sm:$0xff]  ;;  %v5519_v21 = vld [vmem:[%s9645_s12] ss:$0 sm:$0xff] }
 0x859   :  { %v4118_v2 = vmax.f32 %v4064_v40, 0.0  ;;  %v7184_v22 = vpop.f32.mrb[206].mxu0  ;;  %7902 = vmatpush3.bf16.msra.mxu1 %v7899_v60  ;;  %v7931_v50 = vpack.c.bf16 %v5143_v43, %v5142_v44  ;;  %v5145_v40 = vld [vmem:[%s9646_s13 + $0x28] sm:$0xff] }
 0x85a   :  { %v4396_v49 = vmax.f32 %v4394_v24, %v4119_v39  ;;  %v4079_v25 = vadd.f32 %v7184_v22, %v9296_v42  ;;  %v4073_v45 = vpop.f32.mrb[207].mxu0  ;;  %7904 = vmatprep.subr.bf16.mxu1 %v7903_v61  ;;  %v4645_v24 = vld [vmem:[#allocation9 + $0x1c0] sm:$0xff]  ;;  %v4648_v22 = vld [vmem:[#allocation9 + $0x1d8] sm:$0xff] }
 0x85b   :  { %v4395_v14 = vmax.f32 %v4393_v30, %v4118_v2  ;;  %v4074_v34 = vadd.f32 %v9296_v42, %v4073_v45  ;;  %7259 = vmatprep.mubr.f32.mxu1 %v4118_v2  ;;  %v7911_v10 = vpack.c.bf16 %v4646_v1, %v4645_v24  ;;  %v5144_v30 = vld [vmem:[%s9646_s13 + $0x20] sm:$0xff]  ;;  %v5147_v45 = vld [vmem:[%s9646_s13 + $0x38] sm:$0xff] }
 0x85c   :  { %v4121_v52 = vmax.f32 %v4079_v25, 0.0  ;;  %7260 = vmatmul.mubr.f32.gmra.mrb[110].mxu1 %v4119_v39  ;;  %v4647_v39 = vld [vmem:[#allocation9 + $0x1d0] sm:$0xff]  ;;  %v7934_v2 = vpack.c.bf16 %v5145_v40, %v5144_v30  ;;  %v9432_v24 = vld [vmem:[%s9640_s7 + $0x3] ss:$0 sm:$0xff] }
 0x85d   :  { %v4120_v57 = vmax.f32 %v4074_v34, 0.0  ;;  %v7187_v19 = vpop.f32.mrb[208].mxu0  ;;  %7906 = vmatpush3.bf16.msra.mxu1 %v7903_v61  ;;  %v7915_v25 = vpack.c.bf16 %v4648_v22, %v4647_v39  ;;  %v4650_v34 = vld [vmem:[#allocation9 + $0x1e8] sm:$0xff]  ;;  %v5230_v30 = vld [vmem:[%s9649_s16] sm:$0xff] }
 0x85e   :  { %v4398_v33 = vmax.f32 %v4396_v49, %v4121_v52  ;;  %v4089_v51 = vadd.f32 %v7187_v19, %v9296_v42  ;;  %v4083_v53 = vpop.f32.mrb[209].mxu0  ;;  %7908 = vmatprep.subr.bf16.mxu1 %v7907_v46  ;;  %v5146_v49 = vld [vmem:[%s9646_s13 + $0x30] sm:$0xff]  ;;  %v4652_v19 = vld [vmem:[#allocation9 + $0x1f8] sm:$0xff]  ;;  %v5312_v22 = vld [vmem:[%s9651_s18 + $0x8] sm:$0xff] }
 0x85f   :  { %v4397_v37 = vmax.f32 %v4395_v14, %v4120_v57  ;;  %v4084_v41 = vadd.f32 %v9296_v42, %v4083_v53  ;;  %7262 = vmatprep.mubr.f32.mxu1 %v4120_v57  ;;  %v4386_v42 = vmax.f32 %v4384_v3, %v4385_v28  ;;  %v4649_v14 = vld [vmem:[#allocation9 + $0x1e0] sm:$0xff]  ;;  %v4651_v57 = vld [vmem:[#allocation9 + $0x1f0] sm:$0xff] }
 0x860   :  { %v4123_v9 = vmax.f32 %v4089_v51, 0.0  ;;  %7263 = vmatmul.mubr.f32.gmra.mrb[112].mxu1 %v4121_v52  ;;  %v7937_v52 = vpack.c.bf16 %v5147_v45, %v5146_v49  ;;  %v7919_v11 = vpack.c.bf16 %v4650_v34, %v4649_v14 }
 0x861   :  { %v4122_v63 = vmax.f32 %v4084_v41, 0.0  ;;  %7910 = vmatpush3.bf16.msra.mxu1 %v7907_v46 }
 0x862   :  { %v4400_v48 = vmax.f32 %v4398_v33, %v4123_v9  ;;  %7912 = vmatprep.subr.bf16.mxu1 %v7911_v10  ;;  %v7923_v33 = vpack.c.bf16 %v4652_v19, %v4651_v57  ;;  %v5313_v19 = vld [vmem:[%s9651_s18 + $0x10] sm:$0xff] }
 0x863   :  { %v4399_v36 = vmax.f32 %v4397_v37, %v4122_v63  ;;  %7265 = vmatprep.mubr.f32.mxu1 %v4122_v63 }
 0x864   :  { %7266 = vmatmul.mubr.f32.gmra.mrb[114].mxu1 %v4123_v9 }
 0x865   :  { %v4401_v16 = vmax.f32 %v4399_v36, %v4400_v48  ;;  %7914 = vmatpush3.bf16.msra.mxu1 %v7911_v10 }
 0x866   :  { %7916 = vmatprep.subr.bf16.mxu1 %v7915_v25 }
 0x867   :  { %v4402_v15 = vrot.slane %v4401_v16, 4 }
 0x869   :  { %v4403_v17 = vmax.f32 %v4401_v16, %v4402_v15  ;;  %7918 = vmatpush3.bf16.msra.mxu1 %v7915_v25 }
 0x86a   :  { %7920 = vmatprep.subr.bf16.mxu1 %v7919_v11 }
 0x86b   :  { %v4404_v5 = vrot.slane %v4403_v17, 2 }
 0x86d   :  { %v4405_v35 = vmax.f32 %v4403_v17, %v4404_v5  ;;  %7922 = vmatpush3.bf16.msra.mxu1 %v7919_v11 }
 0x86e   :  { %7924 = vmatprep.subr.bf16.mxu1 %v7923_v33 }
 0x86f   :  { %v4406_v13 = vrot.slane %v4405_v35, 1 }
 0x871   :  { %v4407_v7 = vmax.f32 %v4405_v35, %v4406_v13  ;;  %7926 = vmatpush3.bf16.msra.mxu1 %v7923_v33  ;;  %v5314_v33 = vld [vmem:[%s9651_s18 + $0x18] sm:$0xff] }
 0x873   :  { %v4427_v29 = vsel %vm1096_vm2, %v4407_v7, %v4386_v42 }
 0x874   :  { %7301 = vmatmul.mubr.f32.vlgmr.msra.gmra.mrb[210].mxu0 %v4427_v29 }
 0x875   :  { %7384 = vmatpush3.msra.mxu0 %v5058_v26  ;;  %7385 = vmatprep.mubr.msk.f32.mxu0 %vm8213_vm1, %v8214_v12 }
 0x876   :  { %7927 = vmatprep.subr.bf16.mxu0 %v8212_v54 }
 0x878   :  { %7386 = vmatmul.mubr.msk.f32.vlgmr.msra.gmra.mrb[212].mxu0 %vm161_vm0, %v5057_v18 }
 0x879   :  { %7404 = vmatprep.mubr.msk.f32.mxu0 %vm8213_vm1, %v8214_v12  ;;  %7929 = vmatpush3.bf16.msra.mxu0 %v7928_v8 }
 0x87a   :  { %7930 = vmatprep.subr.bf16.mxu0 %v8212_v54 }
 0x87d   :  { %7932 = vmatpush3.bf16.msra.mxu0 %v7931_v50 }
 0x87e   :  { %7933 = vmatprep.subr.bf16.mxu0 %v8212_v54 }
 0x881   :  { %7935 = vmatpush3.bf16.msra.mxu0 %v7934_v2  ;;  %v5311_v2 = vld [vmem:[%s9651_s18] sm:$0xff] }
 0x882   :  { %7936 = vmatprep.subr.bf16.mxu0 %v8212_v54 }
 0x885   :  { %7938 = vmatpush3.bf16.msra.mxu0 %v7937_v52 }
 0x886   :  { %7407 = vmatprep.subr.mxu0 %v8214_v12 }
 0x8fb   :  { %v7222_v51 = vpop.f32.mrb[84].mxu1 }
 0x8fc   :  { %v4207_v53 = vpop.f32.mrb[85].mxu1 }
 0x8ff   :  { %v7225_v37 = vpop.f32.mrb[86].mxu1 }
 0x900   :  { %v4217_v41 = vpop.f32.mrb[87].mxu1 }
 0x903   :  { %v7228_v9 = vpop.f32.mrb[88].mxu1 }
 0x904   :  { %v4227_v58 = vpop.f32.mrb[89].mxu1 }
 0x907   :  { %v7231_v63 = vpop.f32.mrb[90].mxu1 }
 0x908   :  { %v4237_v48 = vpop.f32.mrb[91].mxu1 }
 0x90b   :  { %v9375_v36 = vpop.f32.mrb[92].mxu1 }
 0x90c   :  { %v9377_v27 = vpop.f32.mrb[93].mxu1 }
 0x90f   :  { %v9379_v16 = vpop.f32.mrb[94].mxu1 }
 0x910   :  { %v9381_v15 = vpop.f32.mrb[95].mxu1 }
 0x913   :  { %v9383_v3 = vpop.f32.mrb[96].mxu1 }
 0x914   :  { %v9385_v17 = vpop.f32.mrb[97].mxu1 }
 0x917   :  { %v9387_v5 = vpop.f32.mrb[98].mxu1 }
 0x918   :  { %v9389_v28 = vpop.f32.mrb[99].mxu1 }
 0x91b   :  { %v9391_v35 = vpop.f32.mrb[100].mxu1 }
 0x91c   :  { %v9393_v13 = vpop.f32.mrb[101].mxu1 }
 0x91f   :  { %v9395_v42 = vpop.f32.mrb[102].mxu1 }
 0x920   :  { %v9397_v7 = vpop.f32.mrb[103].mxu1 }
 0x923   :  { %v9399_v26 = vpop.f32.mrb[104].mxu1 }
 0x924   :  { %v9401_v29 = vpop.f32.mrb[105].mxu1 }
 0x927   :  { %v9403_v18 = vpop.f32.mrb[106].mxu1 }
 0x928   :  { %v9405_v0 = vpop.f32.mrb[107].mxu1 }
 0x92b   :  { %v9407_v31 = vpop.f32.mrb[108].mxu1 }
 0x92c   :  { %v9409_v20 = vpop.f32.mrb[109].mxu1 }
 0x92f   :  { %v9411_v47 = vpop.f32.mrb[110].mxu1 }
 0x930   :  { %v9413_v32 = vpop.f32.mrb[111].mxu1 }
 0x933   :  { %v9415_v6 = vpop.f32.mrb[112].mxu1 }
 0x934   :  { %v9417_v60 = vpop.f32.mrb[113].mxu1 }
 0x937   :  { %v9419_v38 = vpop.f32.mrb[114].mxu1 }
 0x938   :  { %v9421_v23 = vpop.f32.mrb[115].mxu1 }
 0x947   :  { %v4495_v62 = vpop.f32.mrb[210].mxu0 }
 0x948   :  { %v4506_v61 = vrot.slane %v4495_v62, %v8671_v56  ;;  %v7302_v8 = vpop.f32.mrb[211].mxu0 }
 0x94a   :  { %v4514_v4 = vrot.slane %v4506_v61, %v8671_v56  ;;  %v4507_v1 = vcombine.high %v4506_v61, %v4506_v61 }
 0x94b   :  { %v5135_v44 = vpop.f32.mrb[212].mxu0 }
 0x94c   :  { %v4525_v43 = vrot.slane %v4514_v4, %v8675_v59  ;;  %v5136_v50 = vadd.f32 %v5519_v21, %v5135_v44  ;;  %v7387_v46 = vpop.f32.mrb[213].mxu0 }
 0x94e   :  { %v5139_v10 = vmax.f32 %v5136_v50, 0.0  ;;  %v4532_v40 = vadd.f32 %v4525_v43, %v4207_v53  ;;  %v4533_v39 = vadd.f32 %v7222_v51, %v4525_v43  ;;  %v4534_v49 = vadd.f32 %v4525_v43, %v4217_v41  ;;  %v5229_v51 = vld [vmem:[%s9648_s15] sm:$0x3] }
 0x94f   :  { %v4535_v25 = vadd.f32 %v7225_v37, %v4525_v43  ;;  %v4536_v45 = vadd.f32 %v4525_v43, %v4227_v58  ;;  %v4537_v14 = vadd.f32 %v7228_v9, %v4525_v43  ;;  %v4538_v11 = vadd.f32 %v4525_v43, %v4237_v48 }
 0x950   :  { %7405 = vmatmul.mubr.msk.f32.vlgmr.msra.gmra.mrb[214].mxu0 %vm5155_vm3, %v5139_v10  ;;  %v4572_v34 = vadd.f32 %v9432_v24, %v4532_v40  ;;  %v4573_v52 = vadd.f32 %v9432_v24, %v4533_v39  ;;  %v4539_v57 = vadd.f32 %v7231_v63, %v4525_v43  ;;  %v4574_v53 = vadd.f32 %v9432_v24, %v4534_v49 }
 0x951   :  { %7408 = vmatpush3.msra.mxu0 %v5230_v30  ;;  %7409 = vmatprep.mubr.msk.f32.mxu0 %vm8213_vm1, %v8214_v12  ;;  %v7940_v37 = vpack.c.bf16 %v5312_v22, %v5311_v2  ;;  %v4521_v41 = vrot.slane %v4507_v1, %v8671_v56  ;;  %v4575_v63 = vadd.f32 %v9432_v24, %v4535_v25 }
 0x952   :  { %v4604_v9 = vmax.f32 %v4572_v34, 0.0  ;;  %v4605_v58 = vmax.f32 %v4573_v52, 0.0  ;;  %7939 = vmatprep.subr.bf16.mxu0 %v8212_v54  ;;  %v7943_v48 = vpack.c.bf16 %v5314_v33, %v5313_v19  ;;  %v4606_v62 = vmax.f32 %v4574_v53, 0.0  ;;  %v5320_v52 = vld [vmem:[%s9651_s18 + $0x48] sm:$0xff] }
 0x953   :  { %v4576_v61 = vadd.f32 %v9432_v24, %v4536_v45  ;;  %v4540_v8 = vadd.f32 %v4525_v43, %v9377_v27  ;;  %v4541_v21 = vadd.f32 %v9375_v36, %v4525_v43  ;;  %v4542_v56 = vadd.f32 %v4525_v43, %v9381_v15  ;;  %v5315_v36 = vld [vmem:[%s9651_s18 + $0x20] sm:$0xff]  ;;  %v5316_v27 = vld [vmem:[%s9651_s18 + $0x28] sm:$0xff] }
 0x954   :  { %7335 = vmatprep.mubr.f32.mxu1 %v4604_v9  ;;  %7410 = vmatmul.mubr.msk.f32.vlgmr.msra.gmra.mrb[216].mxu0 %vm161_vm0, %v5229_v51  ;;  %v4543_v4 = vadd.f32 %v9379_v16, %v4525_v43  ;;  %v4544_v44 = vadd.f32 %v4525_v43, %v9385_v17  ;;  %v4529_v50 = vrot.slane %v4521_v41, %v8675_v59  ;;  %v4607_v16 = vmax.f32 %v4575_v63, 0.0 }
 0x955   :  { %7336 = vmatmul.mubr.f32.vlgmr.msra.gmra.mrb[18].mxu1 %v4605_v58  ;;  %7941 = vmatpush3.bf16.msra.mxu0 %v7940_v37  ;;  %v9469_v46 = vadd.f32 %v9383_v3, %v4525_v43  ;;  %v9472_v1 = vadd.f32 %v4525_v43, %v9389_v28  ;;  %v4577_v15 = vadd.f32 %v9432_v24, %v4537_v14  ;;  %v4608_v3 = vmax.f32 %v4576_v61, 0.0 }
 0x956   :  { %7338 = vmatprep.mubr.f32.mxu1 %v4606_v62  ;;  %v9482_v59 = vadd.f32 %v9387_v5, %v4525_v43  ;;  %7942 = vmatprep.subr.bf16.mxu0 %v8212_v54  ;;  %v4578_v17 = vadd.f32 %v9432_v24, %v4538_v11  ;;  %v7946_v28 = vpack.c.bf16 %v5316_v27, %v5315_v36 }
 0x957   :  { %7444 = vmatprep.mubr.msk.f32.mxu0 %vm8213_vm1, %v8214_v12  ;;  %v4579_v10 = vadd.f32 %v9432_v24, %v4539_v57  ;;  %v4548_v30 = vadd.f32 %v4529_v50, %v9393_v13  ;;  %v9491_v40 = vadd.f32 %v9391_v35, %v4529_v50  ;;  %v4609_v5 = vmax.f32 %v4577_v15, 0.0  ;;  %v5317_v13 = vld [vmem:[%s9651_s18 + $0x30] sm:$0xff] }
 0x958   :  { %v4550_v43 = vadd.f32 %v4529_v50, %v9397_v7  ;;  %v9496_v39 = vadd.f32 %v9395_v42, %v4529_v50  ;;  %v9499_v12 = vadd.f32 %v4529_v50, %v9401_v29  ;;  %v4610_v2 = vmax.f32 %v4578_v17, 0.0  ;;  %v5318_v42 = vld [vmem:[%s9651_s18 + $0x38] sm:$0xff] }
 0x959   :  { %7339 = vmatmul.mubr.f32.gmra.mrb[20].mxu1 %v4607_v16  ;;  %7944 = vmatpush3.bf16.msra.mxu0 %v7943_v48  ;;  %v4580_v22 = vadd.f32 %v9432_v24, %v4540_v8  ;;  %v9503_v49 = vadd.f32 %v9399_v26, %v4529_v50  ;;  %v9506_v35 = vadd.f32 %v4529_v50, %v9405_v0  ;;  %v4611_v29 = vmax.f32 %v4579_v10, 0.0 }
 0x95a   :  { %7341 = vmatprep.mubr.f32.mxu1 %v4608_v3  ;;  %7945 = vmatprep.subr.bf16.mxu0 %v8212_v54  ;;  %v9515_v7 = vadd.f32 %v9403_v18, %v4529_v50  ;;  %v4581_v26 = vadd.f32 %v9432_v24, %v4541_v21  ;;  %v7949_v0 = vpack.c.bf16 %v5318_v42, %v5317_v13  ;;  %v5319_v18 = vld [vmem:[%s9651_s18 + $0x40] sm:$0xff] }
 0x95b   :  { %v4612_v25 = vmax.f32 %v4580_v22, 0.0  ;;  %v4582_v45 = vadd.f32 %v9432_v24, %v4542_v56  ;;  %v4556_v14 = vadd.f32 %v4529_v50, %v9409_v20  ;;  %v9522_v34 = vadd.f32 %v9407_v31, %v4529_v50 }
 0x95c   :  { %v4558_v11 = vadd.f32 %v4529_v50, %v9413_v32  ;;  %v9532_v57 = vadd.f32 %v9411_v47, %v4529_v50  ;;  %v9535_v19 = vadd.f32 %v4529_v50, %v9417_v60  ;;  %v9538_v31 = vadd.f32 %v9415_v6, %v4529_v50  ;;  %v5321_v6 = vld [vmem:[%s9651_s18 + $0x50] sm:$0xff]  ;;  %v5322_v60 = vld [vmem:[%s9651_s18 + $0x58] sm:$0xff] }
 0x95d   :  { %7342 = vmatmul.mubr.f32.gmra.mrb[22].mxu1 %v4609_v5  ;;  %7947 = vmatpush3.bf16.msra.mxu0 %v7946_v28  ;;  %v9541_v20 = vadd.f32 %v4529_v50, %v9421_v23  ;;  %v4613_v33 = vmax.f32 %v4581_v26, 0.0  ;;  %v4583_v51 = vadd.f32 %v9432_v24, %v4543_v4  ;;  %v9545_v53 = vadd.f32 %v9419_v38, %v4529_v50 }
 0x95e   :  { %7344 = vmatprep.mubr.f32.mxu1 %v4610_v2  ;;  %7948 = vmatprep.subr.bf16.mxu0 %v8212_v54  ;;  %v7952_v32 = vpack.c.bf16 %v5320_v52, %v5319_v18  ;;  %v4614_v47 = vmax.f32 %v4582_v45, 0.0  ;;  %v4584_v37 = vadd.f32 %v9432_v24, %v4544_v44  ;;  %v4585_v38 = vadd.f32 %v9432_v24, %v9469_v46  ;;  %v5521_v18 = vld [vmem:[%s9647_s14] ss:$0 sm:$0xff] }
 0x95f   :  { %v4615_v23 = vmax.f32 %v4583_v51, 0.0  ;;  %v7955_v41 = vpack.c.bf16 %v5322_v60, %v5321_v6  ;;  %v4586_v58 = vadd.f32 %v9432_v24, %v9472_v1  ;;  %v4587_v48 = vadd.f32 %v9432_v24, %v9482_v59 }
 0x960   :  { %v4616_v9 = vmax.f32 %v4584_v37, 0.0  ;;  %v4617_v63 = vmax.f32 %v4585_v38, 0.0  ;;  %v4588_v61 = vadd.f32 %v9432_v24, %v4548_v30  ;;  %v4589_v21 = vadd.f32 %v9432_v24, %v9491_v40 }
 0x961   :  { %7345 = vmatmul.mubr.f32.gmra.mrb[24].mxu1 %v4611_v29  ;;  %7950 = vmatpush3.bf16.msra.mxu0 %v7949_v0  ;;  %v4618_v62 = vmax.f32 %v4586_v58, 0.0  ;;  %v4619_v8 = vmax.f32 %v4587_v48, 0.0  ;;  %v4590_v4 = vadd.f32 %v9432_v24, %v4550_v43  ;;  %v4591_v50 = vadd.f32 %v9432_v24, %v9496_v39  ;;  %v5323_v0 = vld [vmem:[%s9651_s18 + $0x60] sm:$0xff] }
 0x962   :  { %7347 = vmatprep.mubr.f32.mxu1 %v4612_v25  ;;  %7951 = vmatprep.subr.bf16.mxu0 %v8212_v54  ;;  %v4620_v56 = vmax.f32 %v4588_v61, 0.0  ;;  %v4621_v44 = vmax.f32 %v4589_v21, 0.0  ;;  %v4592_v1 = vadd.f32 %v9432_v24, %v9499_v12  ;;  %v4593_v27 = vadd.f32 %v9432_v24, %v9503_v49  ;;  %v5324_v25 = vld [vmem:[%s9651_s18 + $0x68] sm:$0xff] }
 0x963   :  { %v4622_v46 = vmax.f32 %v4590_v4, 0.0  ;;  %v4623_v36 = vmax.f32 %v4591_v50, 0.0  ;;  %v4594_v15 = vadd.f32 %v9432_v24, %v9506_v35  ;;  %v4595_v3 = vadd.f32 %v9432_v24, %v9515_v7 }
 0x964   :  { %v4624_v16 = vmax.f32 %v4592_v1, 0.0  ;;  %v4625_v59 = vmax.f32 %v4593_v27, 0.0  ;;  %v4596_v28 = vadd.f32 %v9432_v24, %v4556_v14  ;;  %v4597_v30 = vadd.f32 %v9432_v24, %v9522_v34  ;;  %v5326_v14 = vld [vmem:[%s9651_s18 + $0x78] sm:$0xff] }
 0x965   :  { %7348 = vmatmul.mubr.f32.gmra.mrb[26].mxu1 %v4613_v33  ;;  %7953 = vmatpush3.bf16.msra.mxu0 %v7952_v32  ;;  %v4626_v17 = vmax.f32 %v4594_v15, 0.0  ;;  %v4627_v10 = vmax.f32 %v4595_v3, 0.0  ;;  %v4598_v5 = vadd.f32 %v9432_v24, %v4558_v11  ;;  %v4599_v39 = vadd.f32 %v9432_v24, %v9532_v57 }
 0x966   :  { %7350 = vmatprep.mubr.f32.mxu1 %v4614_v47  ;;  %7954 = vmatprep.subr.bf16.mxu0 %v8212_v54  ;;  %v4628_v40 = vmax.f32 %v4596_v28, 0.0  ;;  %v4629_v43 = vmax.f32 %v4597_v30, 0.0  ;;  %v4600_v2 = vadd.f32 %v9432_v24, %v9535_v19  ;;  %v4601_v49 = vadd.f32 %v9432_v24, %v9538_v31 }
 0x967   :  { %v4630_v12 = vmax.f32 %v4598_v5, 0.0  ;;  %v4631_v22 = vmax.f32 %v4599_v39, 0.0  ;;  %v4602_v13 = vadd.f32 %v9432_v24, %v9541_v20  ;;  %v4603_v7 = vadd.f32 %v9432_v24, %v9545_v53  ;;  %v5325_v24 = vld [vmem:[%s9651_s18 + $0x70] sm:$0xff]  ;;  %s8217_s18 = smov 64  }
 0x968   :  { %v4632_v35 = vmax.f32 %v4600_v2, 0.0  ;;  %v4633_v42 = vmax.f32 %v4601_v49, 0.0  ;;  %v7958_v45 = vpack.c.bf16 %v5324_v25, %v5323_v0  ;;  %v7961_v34 = vpack.c.bf16 %v5326_v14, %v5325_v24 }
 0x969   :  { %7351 = vmatmul.mubr.f32.gmra.mrb[28].mxu1 %v4615_v23  ;;  %7956 = vmatpush3.bf16.msra.mxu0 %v7955_v41  ;;  %v4634_v29 = vmax.f32 %v4602_v13, 0.0  ;;  %v4635_v26 = vmax.f32 %v4603_v7, 0.0 }
 0x96a   :  { %7353 = vmatprep.mubr.f32.mxu1 %v4616_v9  ;;  %7957 = vmatprep.subr.bf16.mxu0 %v8212_v54 }
 0x96d   :  { %7354 = vmatmul.mubr.f32.gmra.mrb[30].mxu1 %v4617_v63  ;;  %7959 = vmatpush3.bf16.msra.mxu0 %v7958_v45 }
 0x96e   :  { %7356 = vmatprep.mubr.f32.mxu1 %v4618_v62  ;;  %7960 = vmatprep.subr.bf16.mxu0 %v8212_v54  ;;  %v5523_v54 = vld [vmem:[%s9650_s17] ss:$0 sm:$0xff] }
 0x971   :  { %7357 = vmatmul.mubr.f32.gmra.mrb[32].mxu1 %v4619_v8  ;;  %7962 = vmatpush3.bf16.msra.mxu0 %v7961_v34 }
 0x972   :  { %7359 = vmatprep.mubr.f32.mxu1 %v4620_v56 }
 0x975   :  { %7360 = vmatmul.mubr.f32.gmra.mrb[34].mxu1 %v4621_v44 }
 0x976   :  { %7362 = vmatprep.mubr.f32.mxu1 %v4622_v46 }
 0x979   :  { %7363 = vmatmul.mubr.f32.gmra.mrb[36].mxu1 %v4623_v36 }
 0x97a   :  { %7365 = vmatprep.mubr.f32.mxu1 %v4624_v16 }
 0x97d   :  { %7366 = vmatmul.mubr.f32.gmra.mrb[38].mxu1 %v4625_v59 }
 0x97e   :  { %7368 = vmatprep.mubr.f32.mxu1 %v4626_v17 }
 0x981   :  { %7369 = vmatmul.mubr.f32.gmra.mrb[40].mxu1 %v4627_v10 }
 0x982   :  { %7371 = vmatprep.mubr.f32.mxu1 %v4628_v40 }
 0x985   :  { %7372 = vmatmul.mubr.f32.gmra.mrb[42].mxu1 %v4629_v43 }
 0x986   :  { %7374 = vmatprep.mubr.f32.mxu1 %v4630_v12 }
 0x989   :  { %7375 = vmatmul.mubr.f32.gmra.mrb[44].mxu1 %v4631_v22 }
 0x98a   :  { %7377 = vmatprep.mubr.f32.mxu1 %v4632_v35 }
 0x98d   :  { %7378 = vmatmul.mubr.f32.gmra.mrb[46].mxu1 %v4633_v42 }
 0x98e   :  { %7380 = vmatprep.mubr.f32.mxu1 %v4634_v29 }
 0x991   :  { %7381 = vmatmul.mubr.f32.gmra.mrb[48].mxu1 %v4635_v26 }
 0xa23   :  { %v5225_v52 = vpop.f32.mrb[214].mxu0 }
 0xa24   :  { %v5226_v11 = vadd.f32 %v5521_v18, %v5225_v52  ;;  %v7406_v57 = vpop.f32.mrb[215].mxu0 }
 0xa26   :  { %5453 = vst.msk [vmem:[#allocation11 + $0x4] sm:$0x3] %vm5435_vm4, %v5226_v11 }
 0xa27   :  { %v5307_v19 = vpop.f32.mrb[216].mxu0 }
 0xa28   :  { %v5308_v31 = vadd.f32 %v5523_v54, %v5307_v19  ;;  %v7337_v20 = vpop.f32.mrb[18].mxu1  ;;  %v7411_v33 = vpop.f32.mrb[217].mxu0 }
 0xa29   :  { %v4719_v51 = vpop.f32.mrb[19].mxu1 }
 0xa2a   :  { %7445 = vmatmul.mubr.f32.vlgmr.msra.gmra.mrb[218].mxu0 %v5308_v31 }
 0xa2c   :  { %v7340_v53 = vpop.f32.mrb[20].mxu1 }
 0xa2d   :  { %v5007_v32 = vmax.f32 %v7337_v20, %v7340_v53  ;;  %v4729_v47 = vpop.f32.mrb[21].mxu1 }
 0xa2e   :  { %v5006_v37 = vmax.f32 %v4719_v51, %v4729_v47 }
 0xa30   :  { %v7343_v6 = vpop.f32.mrb[22].mxu1 }
 0xa31   :  { %v5009_v60 = vmax.f32 %v5007_v32, %v7343_v6  ;;  %v4739_v23 = vpop.f32.mrb[23].mxu1 }
 0xa32   :  { %v5008_v38 = vmax.f32 %v5006_v37, %v4739_v23 }
 0xa34   :  { %v7346_v41 = vpop.f32.mrb[24].mxu1 }
 0xa35   :  { %v5011_v9 = vmax.f32 %v5009_v60, %v7346_v41  ;;  %v4749_v58 = vpop.f32.mrb[25].mxu1  ;;  %v8216_v60 = vmov 1983009808  }
 0xa36   :  { %v5010_v63 = vmax.f32 %v5008_v38, %v4749_v58  ;;  %v5407_v23 = vunpack.c.l.s4 %v8216_v60 }
 0xa38   :  { %v7349_v48 = vpop.f32.mrb[26].mxu1  ;;  %v5408_v58 = vunpack.c.0.s8 %v5407_v23 }
 0xa39   :  { %v5013_v62 = vmax.f32 %v5011_v9, %v7349_v48  ;;  %v4759_v61 = vpop.f32.mrb[27].mxu1 }
 0xa3a   :  { %v5012_v8 = vmax.f32 %v5010_v63, %v4759_v61  ;;  %v5518_v63 = vld [vmem:[%s9642_s9] ss:$0 sm:$0xff] }
 0xa3c   :  { %v7352_v21 = vpop.f32.mrb[28].mxu1 }
 0xa3d   :  { %v5015_v56 = vmax.f32 %v5013_v62, %v7352_v21  ;;  %v4769_v4 = vpop.f32.mrb[29].mxu1 }
 0xa3e   :  { %v5014_v44 = vmax.f32 %v5012_v8, %v4769_v4  ;;  %v5411_v8 = vsub.s32 %v5408_v58, %v8668_v55  ;;  %v5525_v55 = vld [vmem:[%s9652_s19] ss:$0 sm:$0xff] }
 0xa40   :  { %v7355_v50 = vpop.f32.mrb[30].mxu1 }
 0xa41   :  { %v5017_v46 = vmax.f32 %v5015_v56, %v7355_v50  ;;  %v4779_v1 = vpop.f32.mrb[31].mxu1 }
 0xa42   :  { %v5016_v36 = vmax.f32 %v5014_v44, %v4779_v1 }
 0xa44   :  { %v7358_v27 = vpop.f32.mrb[32].mxu1 }
 0xa45   :  { %v5019_v16 = vmax.f32 %v5017_v46, %v7358_v27  ;;  %v4789_v15 = vpop.f32.mrb[33].mxu1 }
 0xa46   :  { %v5018_v59 = vmax.f32 %v5016_v36, %v4789_v15 }
 0xa48   :  { %v5020_v3 = vmax.f32 %v5018_v59, %v5019_v16  ;;  %v7361_v17 = vpop.f32.mrb[34].mxu1 }
 0xa49   :  { %v4799_v28 = vpop.f32.mrb[35].mxu1 }
 0xa4a   :  { %v5021_v24 = vrot.slane %v5020_v3, 4 }
 0xa4c   :  { %v7364_v10 = vpop.f32.mrb[36].mxu1  ;;  %v5022_v11 = vmax.f32 %v5020_v3, %v5021_v24 }
 0xa4d   :  { %v5028_v30 = vmax.f32 %v7361_v17, %v7364_v10  ;;  %v4809_v40 = vpop.f32.mrb[37].mxu1 }
 0xa4e   :  { %v5027_v5 = vmax.f32 %v4799_v28, %v4809_v40  ;;  %v5023_v20 = vrot.slane %v5022_v11, 2 }
 0xa50   :  { %v7367_v43 = vpop.f32.mrb[38].mxu1  ;;  %v5024_v53 = vmax.f32 %v5022_v11, %v5023_v20 }
 0xa51   :  { %v5030_v39 = vmax.f32 %v5028_v30, %v7367_v43  ;;  %v4819_v12 = vpop.f32.mrb[39].mxu1 }
 0xa52   :  { %v5029_v2 = vmax.f32 %v5027_v5, %v4819_v12  ;;  %v5025_v37 = vrot.slane %v5024_v53, 1 }
 0xa54   :  { %v7370_v22 = vpop.f32.mrb[40].mxu1  ;;  %v5026_v41 = vmax.f32 %v5024_v53, %v5025_v37 }
 0xa55   :  { %v5032_v49 = vmax.f32 %v5030_v39, %v7370_v22  ;;  %v4829_v35 = vpop.f32.mrb[41].mxu1 }
 0xa56   :  { %v5031_v13 = vmax.f32 %v5029_v2, %v4829_v35  ;;  %v5055_v62 = vadd.f32 %v5518_v63, %v5026_v41 }
 0xa58   :  { %v7373_v42 = vpop.f32.mrb[42].mxu1  ;;  %v5412_v56 = vrot.slane %v5055_v62, %v5411_v8 }
 0xa59   :  { %v5034_v7 = vmax.f32 %v5032_v49, %v7373_v42  ;;  %v4839_v29 = vpop.f32.mrb[43].mxu1 }
 0xa5a   :  { %v5033_v26 = vmax.f32 %v5031_v13, %v4839_v29 }
 0xa5c   :  { %v7376_v0 = vpop.f32.mrb[44].mxu1 }
 0xa5d   :  { %v5036_v25 = vmax.f32 %v5034_v7, %v7376_v0  ;;  %v4849_v45 = vpop.f32.mrb[45].mxu1 }
 0xa5e   :  { %v5035_v14 = vmax.f32 %v5033_v26, %v4849_v45 }
 0xa60   :  { %v7379_v34 = vpop.f32.mrb[46].mxu1 }
 0xa61   :  { %v5038_v18 = vmax.f32 %v5036_v25, %v7379_v34  ;;  %v4859_v52 = vpop.f32.mrb[47].mxu1 }
 0xa62   :  { %v5037_v57 = vmax.f32 %v5035_v14, %v4859_v52 }
 0xa64   :  { %v7382_v54 = vpop.f32.mrb[48].mxu1 }
 0xa65   :  { %v5040_v19 = vmax.f32 %v5038_v18, %v7382_v54  ;;  %v4869_v31 = vpop.f32.mrb[49].mxu1 }
 0xa66   :  { %v5039_v33 = vmax.f32 %v5037_v57, %v4869_v31 }
 0xa68   :  { %v5041_v51 = vmax.f32 %v5039_v33, %v5040_v19 }
 0xa6a   :  { %v5042_v32 = vrot.slane %v5041_v51, 4 }
 0xa6c   :  { %v5043_v47 = vmax.f32 %v5041_v51, %v5042_v32 }
 0xa6e   :  { %v5044_v6 = vrot.slane %v5043_v47, 2 }
 0xa70   :  { %v5045_v38 = vmax.f32 %v5043_v47, %v5044_v6 }
 0xa72   :  { %v5046_v9 = vrot.slane %v5045_v38, 1 }
 0xa74   :  { %v5047_v48 = vmax.f32 %v5045_v38, %v5046_v9 }
 0xa76   :  { %v5056_v61 = vadd.f32 %v5518_v63, %v5047_v48 }
 0xa78   :  { %v5419_v21 = vrot.slane %v5056_v61, %v5411_v8 }
 0xa7a   :  { %v5424_v4 = vrot.slane %v5419_v21, 7 }
 0xa7c   :  { %v5425_v44 = vsel %vm1096_vm2, %v5424_v4, %v5412_v56 }
 0xa7d   :  { %v5427_v50 = vsel %vm5426_vm5, %v5424_v4, %v5425_v44 }
 0xa7e   :  { %v5429_v46 = vsel %vm5428_vm6, %v5424_v4, %v5427_v50 }
 0xa7f   :  { %v5431_v1 = vsel %vm5430_vm7, %v5424_v4, %v5429_v46 }
 0xa80   :  { %5432 = vrot.lane.b32.xlu0 %v5431_v1, %s8217_s18  ;;  %5451 = vst.msk [vmem:[#allocation11 + $0x2] sm:$0x3] %vm5435_vm4, %v5431_v1 }
 0xaf2   :  { %v5433_v36 = vpop.permute.xlu0 %5432 }
 0xaf3   :  { %5436 = vst.msk [vmem:[#allocation11] sm:$0x3] %vm5435_vm4, %v5433_v36 }
 0xafd   :  { %v5400_v27 = vpop.f32.mrb[218].mxu0 }
 0xafe   :  { %v5401_v16 = vadd.f32 %v5525_v55, %v5400_v27  ;;  %v7446_v15 = vpop.f32.mrb[219].mxu0 }
 0xb00   :  { %v5444_v59 = vrot.slane %v5401_v16, %v5411_v8  ;;  %5452 = vst.msk [vmem:[#allocation11 + $0x2] sm:$0x3] %vm5448_vm8, %v5401_v16 }
 0xb02   :  { %5445 = vrot.lane.b32.xlu0 %v5444_v59, %s8217_s18 }
 0xb74   :  { %v5446_v3 = vpop.permute.xlu0 %5445 }
 0xb75   :  { %5449 = vst.msk [vmem:[#allocation11] sm:$0x3] %vm5448_vm8, %v5446_v3 }
 0xb76   :  { %8187 = shalt.err (!%p8184_p8)
}
 0xb77   :  { %s9669_s30 = sld [smem:[#allocation21_spill]] }
 0xb7d   :  { %s8188_s0 = scalar_lea.hbm %s9669_s30, 96 }
 0xb7e   :  { %p8189_p9 = scmp.ne.s32.totalorder %s9669_s30, %s8188_s0  ;;  %p8192_p10 = scmp.lt.u32.totalorder %s8188_s0, %s9669_s30 }
 0xb80   :  { %p8194_p11 = pnand %p8192_p10, %p8189_p9 }
 0xb82   :  { %8197 = shalt.err (!%p8194_p11)
}
 0xb83   :  { %5463 = dma.vmem_to_hbm [thread:$0]  %s5461_s21, 96, %s9669_s30, [#allocation5]  }
 0xb84   :  { %8204 = dma.done.wait [#allocation5], 96  }
 0xb85   :  { %8205 = vsyncadd [#allocation5], 4294967200 }
 0xb86   :  { %5467 = vsyncpa [#allocation4], 1 }
 0xb87   :  { %5468 = vsyncpa [#allocation7], 1 }
 0xb88   :  { %5469 = vsyncpa [#allocation10], 1 }
 0xb89   :  { %5470 = vsyncpa [#allocation5], 1 }

</bundles_post_ra>
